<compile_context>
chip_gen: v7x
topology: tpu7x:2x2x1
jax: 0.10.0
libtpu: 0.0.40
codegen_flags: <defaults>
</compile_context>

<pallas_src>
import functools

import jax
import jax.numpy as jnp
import numpy as np
from jax.experimental import pallas as pl
from jax.experimental.pallas import tpu as pltpu

_EPS = 1e-5


# ----------------------------------------------------------------------------
# Host-side constant builders (static shapes only; evaluated at trace time)
# ----------------------------------------------------------------------------
def _pool_pad_selector(b_tile, lp_in, n_raw, l_conv, stride, j_pool, pad_out, dtype):
    """Fused stride-extract + MaxPool1d(2,2,padding=1) + zero-pad selector.

    Returns S of shape (2 * b_tile * lp_out, n_raw), lp_out = j_pool + 2*pad_out.
    For the raw, slab-flattened conv+BN+ReLU output y (n_raw, C):
        x_next = max(S[:half] @ y, S[half:] @ y)
    places each batch element's pooled sequence at slab offset `pad_out`.
    Rows outside the valid region come out exactly 0, which is simultaneously
    the next conv's zero padding and the pool's -inf padding (valid since the
    selectors only ever read post-ReLU values >= 0).
    """
    lp_out = j_pool + 2 * pad_out
    sel = np.zeros((2, b_tile * lp_out, n_raw), np.float32)
    for b in range(b_tile):
        for j in range(j_pool):
            row = b * lp_out + pad_out + j
            ia, ib = 2 * j - 1, 2 * j            # MaxPool1d(2,2,padding=1) window
            if 0 <= ia < l_conv:
                sel[0, row, b * lp_in + ia * stride] = 1.0
            if 0 <= ib < l_conv:
                sel[1, row, b * lp_in + ib * stride] = 1.0
    return jnp.asarray(sel.reshape(2 * b_tile * lp_out, n_raw), dtype)


def _flatten_consts(b_tile, j3, cf):
    """Constants turning p3 (b_tile*j3, cf) into torch's channel-major flatten.

    feat[b, c*j3 + j] = p3[b*j3 + j, c] is computed in-kernel as
        feat = COL @ ((p3 @ DUP) * MASK)
    (all sums touch exactly one nonzero, so the result is exact in f32).
    """
    dup = np.zeros((cf, cf * j3), np.float32)          # duplicate channel c -> block c
    for c in range(cf):
        dup[c, c * j3:(c + 1) * j3] = 1.0
    mask = np.zeros((b_tile * j3, cf * j3), np.float32)
    for r in range(b_tile * j3):
        mask[r, (r % j3)::j3] = 1.0                    # keep column c*j3 + (r % j3)
    col = np.zeros((b_tile, b_tile * j3), np.float32)
    for b in range(b_tile):
        col[b, b * j3:(b + 1) * j3] = 1.0              # collapse rows of batch b
    return jnp.asarray(dup), jnp.asarray(mask), jnp.asarray(col)


# ----------------------------------------------------------------------------
# In-kernel helpers
# ----------------------------------------------------------------------------
def _conv_bn_relu(xp, wf, ss, *, K, Cin):
    """Conv1d taps over the slab-flattened layout -> folded BN -> ReLU.

    xp: (N, Cin) bf16 (batch-slab-flattened, zero-padded per slab).
    wf: (K*Cin, Cout) bf16 with wf[k*Cin + ci, co] = W_torch[co, ci, k].
    ss: (2, Cout) f32 (BN scale / shift).
    Returns y (N - K + 1, Cout) f32, y >= 0.  Rows whose window crosses a slab
    boundary are garbage; the following selector matmul never reads them.
    """
    n = xp.shape[0]
    r = n - K + 1
    cout = wf.shape[1]
    acc = jnp.zeros((r, cout), jnp.float32)
    for k in range(K):                         # acc += dot form (MRB-friendly on v7x)
        wk = wf[k * Cin:(k + 1) * Cin, :]
        xs = xp[k:k + r, :]
        if Cin == 1:
            # Degenerate contraction: broadcast multiply on the VPU.
            acc = acc + xs.astype(jnp.float32) * wk.astype(jnp.float32)
        else:
            acc = acc + jnp.dot(xs, wk, preferred_element_type=jnp.float32)
    return jnp.maximum(acc * ss[0:1, :] + ss[1:2, :], 0.0)


def _tfc_kernel(x_ref, w1_ref, ss1_ref, w2_ref, ss2_ref, w3_ref, ss3_ref,
                pw1_ref, pss_ref, pw2_ref, pb2_ref,
                s1_ref, s2_ref, s3_ref, dup_ref, mask_ref, col_ref,
                h_ref, z_ref, *, k1, cin):
    # ---- conv block 1: conv(k1) -> BN -> ReLU -> pool+repad (selector) ----
    y1 = _conv_bn_relu(x_ref[...], w1_ref[...], ss1_ref[...], K=k1, Cin=cin)
    s1 = s1_ref[...]
    m1 = s1.shape[0] // 2
    p = jnp.dot(s1, y1.astype(jnp.bfloat16), preferred_element_type=jnp.float32)
    x2 = jnp.maximum(p[:m1, :], p[m1:, :]).astype(jnp.bfloat16)
    # Dropout(config['dropout']) is identity in eval mode.

    # ---- conv block 2 ----
    y2 = _conv_bn_relu(x2, w2_ref[...], ss2_ref[...], K=8, Cin=w1_ref.shape[1])
    s2 = s2_ref[...]
    m2 = s2.shape[0] // 2
    p = jnp.dot(s2, y2.astype(jnp.bfloat16), preferred_element_type=jnp.float32)
    x3 = jnp.maximum(p[:m2, :], p[m2:, :]).astype(jnp.bfloat16)

    # ---- conv block 3 (final pool kept in f32 so `h` keeps f32 precision) ----
    y3 = _conv_bn_relu(x3, w3_ref[...], ss3_ref[...], K=8, Cin=w2_ref.shape[1])
    s3 = s3_ref[...]
    m3 = s3.shape[0] // 2
    p = jnp.dot(s3, y3, preferred_element_type=jnp.float32)
    p3 = jnp.maximum(p[:m3, :], p[m3:, :])                  # (B_tile*J3, Cf) f32

    # ---- channel-major flatten: feat[b, c*J3 + j] = p3[b*J3 + j, c] ----
    g = jnp.dot(p3, dup_ref[...], preferred_element_type=jnp.float32) * mask_ref[...]
    feat = jnp.dot(col_ref[...], g, preferred_element_type=jnp.float32)  # (B_tile, Cf*J3)
    h_ref[...] = feat.astype(h_ref.dtype)

    # ---- projector: Linear -> folded BN -> ReLU -> Linear ----
    pss = pss_ref[...]
    z1 = jnp.dot(feat.astype(jnp.bfloat16), pw1_ref[...],
                 preferred_element_type=jnp.float32)
    z1 = jnp.maximum(z1 * pss[0:1, :] + pss[1:2, :], 0.0)
    z = jnp.dot(z1.astype(jnp.bfloat16), pw2_ref[...],
                preferred_element_type=jnp.float32) + pb2_ref[...]
    z_ref[...] = z.astype(z_ref.dtype)


# ----------------------------------------------------------------------------
# Host-side parameter folding / layout prep (plain JAX, tiny tensors)
# ----------------------------------------------------------------------------
def _bn_fold(gamma, beta, mean, var, eps=_EPS):
    scale = gamma / jnp.sqrt(var + eps)
    shift = beta - mean * scale
    return scale, shift


def _prep_branch(p):
    def conv_prep(W, bn):
        cout, cin_, k = W.shape
        wf = jnp.transpose(W, (2, 1, 0)).reshape(k * cin_, cout).astype(jnp.bfloat16)
        s, t = _bn_fold(*bn)
        return wf, jnp.stack([s, t], 0).astype(jnp.float32)

    w1, ss1 = conv_prep(p["W1"], p["bn1"])
    w2, ss2 = conv_prep(p["W2"], p["bn2"])
    w3, ss3 = conv_prep(p["W3"], p["bn3"])
    # torch Linear weight (256, Cf*J3) already indexes inputs channel-major
    # (c*J3 + j), which matches the in-kernel feat layout: plain transpose.
    pw1 = jnp.transpose(p["p_W1"]).astype(jnp.bfloat16)       # (Cf*J3, 256)
    s, t = _bn_fold(*p["p_bn"])
    pss = jnp.stack([s, p["p_b1"] * s + t], 0).astype(jnp.float32)
    pw2 = jnp.transpose(p["p_W2"]).astype(jnp.bfloat16)       # (256, 128)
    pb2 = p["p_b2"].reshape(1, -1).astype(jnp.float32)        # (1, 128)
    return (w1, ss1, w2, ss2, w3, ss3, pw1, pss, pw2, pb2)


def tfc_forward(x_in_t, x_in_f, params, config, max_batch_tile=8):
    ks = config["kernel_size"]
    stride = config["stride"]
    cin = config["input_channels"]
    cf = config["final_out_channels"]
    pad1 = ks // 2
    B, _, L = x_in_t.shape

    # Batch tiling: whole batch per grid cell when small; cap the tile size so
    # the host-built selection matrices stay tiny.
    nbt = -(-B // max_batch_tile)
    bt = -(-B // nbt)
    Bp = nbt * bt

    # Static layer geometry (Conv1d / MaxPool1d(2,2,1) output-size formulas).
    lp1 = L + 2 * pad1
    l1 = (lp1 - ks) // stride + 1
    j1 = l1 // 2 + 1
    lp2 = j1 + 8
    l2 = lp2 - 8 + 1
    j2 = l2 // 2 + 1
    lp3 = j2 + 8
    l3 = lp3 - 8 + 1
    j3 = l3 // 2 + 1
    assert j3 == config["CNNoutput_channel"], "config['CNNoutput_channel'] mismatch"

    r1 = bt * lp1 - ks + 1          # raw (slab-flattened) conv output row counts
    r2 = bt * lp2 - 8 + 1
    r3 = bt * lp3 - 8 + 1

    # Input: zero-padded slabs, channels-last, bf16: (2, nbt, bt*lp1, cin).
    def prep(x):
        x = jnp.pad(x, ((0, Bp - B), (0, 0), (pad1, pad1)))
        x = jnp.transpose(x, (0, 2, 1))
        return x.reshape(nbt, bt * lp1, cin)

    x_all = jnp.stack([prep(x_in_t), prep(x_in_f)], 0).astype(jnp.bfloat16)

    # Host-built constants (shared by both branches).
    s1 = _pool_pad_selector(bt, lp1, r1, l1, stride, j1, 4, jnp.bfloat16)
    s2 = _pool_pad_selector(bt, lp2, r2, l2, 1, j2, 4, jnp.bfloat16)
    s3 = _pool_pad_selector(bt, lp3, r3, l3, 1, j3, 0, jnp.float32)
    dup, mask, col = _flatten_consts(bt, j3, cf)
    consts = (s1, s2, s3, dup, mask, col)

    pt = _prep_branch(params["t"])
    pf = _prep_branch(params["f"])
    stacked = tuple(jnp.stack([a, b], 0) for a, b in zip(pt, pf))  # lead dim 2
    n_proj = stacked[-2].shape[2]                                  # 128

    kernel = functools.partial(_tfc_kernel, k1=ks, cin=cin)

    # Weight-like inputs: one block per branch, constant across the batch-tile
    # axis (Pallas skips the re-fetch when the block index does not change).
    w_specs = [pl.BlockSpec((None,) + a.shape[1:], lambda br, t: (br, 0, 0))
               for a in stacked]
    # Shared constants: a single block, fetched once.
    c_specs = [pl.BlockSpec(c.shape, lambda br, t: (0, 0)) for c in consts]

    h, z = pl.pallas_call(
        kernel,
        out_shape=(jax.ShapeDtypeStruct((2, nbt, bt, cf * j3), jnp.float32),
                   jax.ShapeDtypeStruct((2, nbt, bt, n_proj), jnp.float32)),
        grid=(2, nbt),
        in_specs=[pl.BlockSpec((None, None, bt * lp1, cin),
                               lambda br, t: (br, t, 0, 0))] + w_specs + c_specs,
        out_specs=(pl.BlockSpec((None, None, bt, cf * j3),
                                lambda br, t: (br, t, 0, 0)),
                   pl.BlockSpec((None, None, bt, n_proj),
                                lambda br, t: (br, t, 0, 0))),
        compiler_params=pltpu.CompilerParams(
            dimension_semantics=("parallel", "parallel")),
    )(x_all, *stacked, *consts)

    h = h.reshape(2, Bp, cf * j3)[:, :B]     # already torch's channel-major layout
    z = z.reshape(2, Bp, n_proj)[:, :B]
    return h[0], z[0], h[1], z[1]


# ----------------------------------------------------------------------------
# Pure-JAX eval-mode reference (for the correctness check in __main__)
# ----------------------------------------------------------------------------
def _ref_branch(x, p, config):
    def block(x, W, bn, stride, pad):
        out = jax.lax.conv_general_dilated(
            x, W, window_strides=(stride,), padding=[(pad, pad)],
            dimension_numbers=("NCH", "OIH", "NCH"))
        g, b_, m, v = bn
        s = g / jnp.sqrt(v + _EPS)
        y = jnp.maximum(out * s[None, :, None] + (b_ - m * s)[None, :, None], 0.0)
        y = jnp.pad(y, ((0, 0), (0, 0), (1, 1)), constant_values=-jnp.inf)
        return jax.lax.reduce_window(y, -jnp.inf, jax.lax.max,
                                     (1, 1, 2), (1, 1, 2), "VALID")

    y = block(x, p["W1"], p["bn1"], config["stride"], config["kernel_size"] // 2)
    y = block(y, p["W2"], p["bn2"], 1, 4)
    y = block(y, p["W3"], p["bn3"], 1, 4)
    h = y.reshape(y.shape[0], -1)
    s = p["p_bn"][0] / jnp.sqrt(p["p_bn"][3] + _EPS)
    z1 = h @ p["p_W1"].T + p["p_b1"]
    z1 = jnp.maximum((z1 - p["p_bn"][2]) * s + p["p_bn"][1], 0.0)
    z = z1 @ p["p_W2"].T + p["p_b2"]
    return h, z


# ----------------------------------------------------------------------------
# Deterministic parameter init (matches the PyTorch module's shapes)
# ----------------------------------------------------------------------------
def _init_bn(key, n):
    k1, k2, k3, k4 = jax.random.split(key, 4)
    gamma = 1.0 + 0.1 * jax.random.normal(k1, (n,), jnp.float32)
    beta = 0.1 * jax.random.normal(k2, (n,), jnp.float32)
    mean = 0.1 * jax.random.normal(k3, (n,), jnp.float32)
    var = 0.5 + jax.random.uniform(k4, (n,), jnp.float32)
    return (gamma, beta, mean, var)


def _init_branch(key, config):
    cin = config["input_channels"]
    ks = config["kernel_size"]
    cf = config["final_out_channels"]
    flat = config["CNNoutput_channel"] * cf
    keys = jax.random.split(key, 12)
    return {
        "W1": 0.1 * jax.random.normal(keys[0], (32, cin, ks), jnp.float32),
        "bn1": _init_bn(keys[1], 32),
        "W2": 0.1 * jax.random.normal(keys[2], (64, 32, 8), jnp.float32),
        "bn2": _init_bn(keys[3], 64),
        "W3": 0.1 * jax.random.normal(keys[4], (cf, 64, 8), jnp.float32),
        "bn3": _init_bn(keys[5], cf),
        "p_W1": 0.1 * jax.random.normal(keys[6], (256, flat), jnp.float32),
        "p_b1": 0.1 * jax.random.normal(keys[7], (256,), jnp.float32),
        "p_bn": _init_bn(keys[8], 256),
        "p_W2": 0.1 * jax.random.normal(keys[9], (128, 256), jnp.float32),
        "p_b2": 0.1 * jax.random.normal(keys[10], (128,), jnp.float32),
    }


if __name__ == "__main__":
    # L=64 input -> block1: conv 65, pool 33 | block2: conv 34, pool 18
    # | block3: conv 19, pool 10  ->  CNNoutput_channel = 10.
    config = {
        "input_channels": 1,
        "kernel_size": 8,
        "stride": 1,
        "dropout": 0.0,
        "final_out_channels": 32,
        "CNNoutput_channel": 10,
    }
    B, L = 2, 64

    key = jax.random.PRNGKey(0)
    k_t, k_f, k_xt, k_xf = jax.random.split(key, 4)
    params = {"t": _init_branch(k_t, config), "f": _init_branch(k_f, config)}

    x_in_t = jax.random.normal(k_xt, (B, config["input_channels"], L), jnp.float32)
    x_in_f = jax.random.normal(k_xf, (B, config["input_channels"], L), jnp.float32)

    fwd = jax.jit(lambda xt, xf, p: tfc_forward(xt, xf, p, config))
    h_time, z_time, h_freq, z_freq = fwd(x_in_t, x_in_f, params)
    jax.block_until_ready((h_time, z_time, h_freq, z_freq))

    assert h_time.shape == (B, config["CNNoutput_channel"] * config["final_out_channels"])
    assert z_time.shape == (B, 128)
    assert h_freq.shape == h_time.shape and z_freq.shape == z_time.shape
    assert bool(jnp.all(jnp.isfinite(z_time))) and bool(jnp.all(jnp.isfinite(z_freq)))

    # Numerical check against a pure-JAX eval-mode reference (bf16 tolerance).
    hr_t, zr_t = _ref_branch(x_in_t, params["t"], config)
    hr_f, zr_f = _ref_branch(x_in_f, params["f"], config)
    for got, ref in ((h_time, hr_t), (z_time, zr_t), (h_freq, hr_f), (z_freq, zr_f)):
        err = float(jnp.max(jnp.abs(got - ref)) / (jnp.max(jnp.abs(ref)) + 1e-6))
        assert err < 0.1, f"mismatch vs reference: rel err {err}"

    print("KERNEL_OK")
</pallas_src>

<mosaic_0001>
module attributes {stable_mosaic.version = 11 : i64} {
  func.func @_tfc_kernel(%arg0: i32, %arg1: i32, %arg2: memref<1x1x144x1xbf16, #tpu.memory_space<vmem>>, %arg3: memref<1x8x32xbf16, #tpu.memory_space<vmem>>, %arg4: memref<1x2x32xf32, #tpu.memory_space<vmem>>, %arg5: memref<1x256x64xbf16, #tpu.memory_space<vmem>>, %arg6: memref<1x2x64xf32, #tpu.memory_space<vmem>>, %arg7: memref<1x512x32xbf16, #tpu.memory_space<vmem>>, %arg8: memref<1x2x32xf32, #tpu.memory_space<vmem>>, %arg9: memref<1x320x256xbf16, #tpu.memory_space<vmem>>, %arg10: memref<1x2x256xf32, #tpu.memory_space<vmem>>, %arg11: memref<1x256x128xbf16, #tpu.memory_space<vmem>>, %arg12: memref<1x1x128xf32, #tpu.memory_space<vmem>>, %arg13: memref<164x137xbf16, #tpu.memory_space<vmem>>, %arg14: memref<104x75xbf16, #tpu.memory_space<vmem>>, %arg15: memref<40x45xf32, #tpu.memory_space<vmem>>, %arg16: memref<32x320xf32, #tpu.memory_space<vmem>>, %arg17: memref<20x320xf32, #tpu.memory_space<vmem>>, %arg18: memref<2x20xf32, #tpu.memory_space<vmem>>, %arg19: memref<1x1x2x320xf32, #tpu.memory_space<vmem>>, %arg20: memref<1x1x2x128xf32, #tpu.memory_space<vmem>>) attributes {dimension_semantics = [#tpu.dimension_semantics<parallel>, #tpu.dimension_semantics<parallel>], iteration_bounds = array<i64: 2, 1>, scalar_prefetch = 0 : i64, scratch_operands = 0 : i64, tpu.core_type = #tpu.core_type<tc>, window_params = [{transform_indices = @transform_0, window_bounds = array<i64: 1, 1, 144, 1>}, {transform_indices = @transform_1, window_bounds = array<i64: 1, 8, 32>}, {transform_indices = @transform_2, window_bounds = array<i64: 1, 2, 32>}, {transform_indices = @transform_3, window_bounds = array<i64: 1, 256, 64>}, {transform_indices = @transform_4, window_bounds = array<i64: 1, 2, 64>}, {transform_indices = @transform_5, window_bounds = array<i64: 1, 512, 32>}, {transform_indices = @transform_6, window_bounds = array<i64: 1, 2, 32>}, {transform_indices = @transform_7, window_bounds = array<i64: 1, 320, 256>}, {transform_indices = @transform_8, window_bounds = array<i64: 1, 2, 256>}, {transform_indices = @transform_9, window_bounds = array<i64: 1, 256, 128>}, {transform_indices = @transform_10, window_bounds = array<i64: 1, 1, 128>}, {pipeline_mode = #tpu.pipeline_mode<synchronous>, transform_indices = @transform_11, window_bounds = array<i64: 164, 137>}, {pipeline_mode = #tpu.pipeline_mode<synchronous>, transform_indices = @transform_12, window_bounds = array<i64: 104, 75>}, {pipeline_mode = #tpu.pipeline_mode<synchronous>, transform_indices = @transform_13, window_bounds = array<i64: 40, 45>}, {pipeline_mode = #tpu.pipeline_mode<synchronous>, transform_indices = @transform_14, window_bounds = array<i64: 32, 320>}, {pipeline_mode = #tpu.pipeline_mode<synchronous>, transform_indices = @transform_15, window_bounds = array<i64: 20, 320>}, {pipeline_mode = #tpu.pipeline_mode<synchronous>, transform_indices = @transform_16, window_bounds = array<i64: 2, 20>}, {transform_indices = @transform_17, window_bounds = array<i64: 1, 1, 2, 320>}, {transform_indices = @transform_18, window_bounds = array<i64: 1, 1, 2, 128>}]} {
    %c0 = arith.constant 0 : index
    %c0_0 = arith.constant 0 : index
    %c0_1 = arith.constant 0 : index
    %c0_2 = arith.constant 0 : index
    %0 = vector.load %arg2[%c0, %c0_0, %c0_1, %c0_2] : memref<1x1x144x1xbf16, #tpu.memory_space<vmem>>, vector<1x1x144x1xbf16>
    %1 = vector.shape_cast %0 : vector<1x1x144x1xbf16> to vector<144x1xbf16>
    %c0_3 = arith.constant 0 : index
    %c0_4 = arith.constant 0 : index
    %c0_5 = arith.constant 0 : index
    %2 = vector.load %arg3[%c0_3, %c0_4, %c0_5] : memref<1x8x32xbf16, #tpu.memory_space<vmem>>, vector<1x8x32xbf16>
    %3 = vector.shape_cast %2 : vector<1x8x32xbf16> to vector<8x32xbf16>
    %c0_6 = arith.constant 0 : index
    %c0_7 = arith.constant 0 : index
    %c0_8 = arith.constant 0 : index
    %4 = vector.load %arg4[%c0_6, %c0_7, %c0_8] : memref<1x2x32xf32, #tpu.memory_space<vmem>>, vector<1x2x32xf32>
    %5 = vector.shape_cast %4 : vector<1x2x32xf32> to vector<2x32xf32>
    %cst = arith.constant 0.000000e+00 : f32
    %6 = vector.broadcast %cst : f32 to vector<137x32xf32>
    %7 = vector.extract_strided_slice %3 {offsets = [0, 0], sizes = [1, 32], strides = [1, 1]} : vector<8x32xbf16> to vector<1x32xbf16>
    %8 = vector.extract_strided_slice %1 {offsets = [0, 0], sizes = [137, 1], strides = [1, 1]} : vector<144x1xbf16> to vector<137x1xbf16>
    %9 = arith.extf %8 : vector<137x1xbf16> to vector<137x1xf32>
    %10 = arith.extf %7 : vector<1x32xbf16> to vector<1x32xf32>
    %11 = vector.broadcast %9 : vector<137x1xf32> to vector<137x32xf32>
    %12 = vector.broadcast %10 : vector<1x32xf32> to vector<137x32xf32>
    %13 = arith.mulf %11, %12 : vector<137x32xf32>
    %14 = arith.addf %6, %13 : vector<137x32xf32>
    %15 = vector.extract_strided_slice %3 {offsets = [1, 0], sizes = [1, 32], strides = [1, 1]} : vector<8x32xbf16> to vector<1x32xbf16>
    %16 = vector.extract_strided_slice %1 {offsets = [1, 0], sizes = [137, 1], strides = [1, 1]} : vector<144x1xbf16> to vector<137x1xbf16>
    %17 = arith.extf %16 : vector<137x1xbf16> to vector<137x1xf32>
    %18 = arith.extf %15 : vector<1x32xbf16> to vector<1x32xf32>
    %19 = vector.broadcast %17 : vector<137x1xf32> to vector<137x32xf32>
    %20 = vector.broadcast %18 : vector<1x32xf32> to vector<137x32xf32>
    %21 = arith.mulf %19, %20 : vector<137x32xf32>
    %22 = arith.addf %14, %21 : vector<137x32xf32>
    %23 = vector.extract_strided_slice %3 {offsets = [2, 0], sizes = [1, 32], strides = [1, 1]} : vector<8x32xbf16> to vector<1x32xbf16>
    %24 = vector.extract_strided_slice %1 {offsets = [2, 0], sizes = [137, 1], strides = [1, 1]} : vector<144x1xbf16> to vector<137x1xbf16>
    %25 = arith.extf %24 : vector<137x1xbf16> to vector<137x1xf32>
    %26 = arith.extf %23 : vector<1x32xbf16> to vector<1x32xf32>
    %27 = vector.broadcast %25 : vector<137x1xf32> to vector<137x32xf32>
    %28 = vector.broadcast %26 : vector<1x32xf32> to vector<137x32xf32>
    %29 = arith.mulf %27, %28 : vector<137x32xf32>
    %30 = arith.addf %22, %29 : vector<137x32xf32>
    %31 = vector.extract_strided_slice %3 {offsets = [3, 0], sizes = [1, 32], strides = [1, 1]} : vector<8x32xbf16> to vector<1x32xbf16>
    %32 = vector.extract_strided_slice %1 {offsets = [3, 0], sizes = [137, 1], strides = [1, 1]} : vector<144x1xbf16> to vector<137x1xbf16>
    %33 = arith.extf %32 : vector<137x1xbf16> to vector<137x1xf32>
    %34 = arith.extf %31 : vector<1x32xbf16> to vector<1x32xf32>
    %35 = vector.broadcast %33 : vector<137x1xf32> to vector<137x32xf32>
    %36 = vector.broadcast %34 : vector<1x32xf32> to vector<137x32xf32>
    %37 = arith.mulf %35, %36 : vector<137x32xf32>
    %38 = arith.addf %30, %37 : vector<137x32xf32>
    %39 = vector.extract_strided_slice %3 {offsets = [4, 0], sizes = [1, 32], strides = [1, 1]} : vector<8x32xbf16> to vector<1x32xbf16>
    %40 = vector.extract_strided_slice %1 {offsets = [4, 0], sizes = [137, 1], strides = [1, 1]} : vector<144x1xbf16> to vector<137x1xbf16>
    %41 = arith.extf %40 : vector<137x1xbf16> to vector<137x1xf32>
    %42 = arith.extf %39 : vector<1x32xbf16> to vector<1x32xf32>
    %43 = vector.broadcast %41 : vector<137x1xf32> to vector<137x32xf32>
    %44 = vector.broadcast %42 : vector<1x32xf32> to vector<137x32xf32>
    %45 = arith.mulf %43, %44 : vector<137x32xf32>
    %46 = arith.addf %38, %45 : vector<137x32xf32>
    %47 = vector.extract_strided_slice %3 {offsets = [5, 0], sizes = [1, 32], strides = [1, 1]} : vector<8x32xbf16> to vector<1x32xbf16>
    %48 = vector.extract_strided_slice %1 {offsets = [5, 0], sizes = [137, 1], strides = [1, 1]} : vector<144x1xbf16> to vector<137x1xbf16>
    %49 = arith.extf %48 : vector<137x1xbf16> to vector<137x1xf32>
    %50 = arith.extf %47 : vector<1x32xbf16> to vector<1x32xf32>
    %51 = vector.broadcast %49 : vector<137x1xf32> to vector<137x32xf32>
    %52 = vector.broadcast %50 : vector<1x32xf32> to vector<137x32xf32>
    %53 = arith.mulf %51, %52 : vector<137x32xf32>
    %54 = arith.addf %46, %53 : vector<137x32xf32>
    %55 = vector.extract_strided_slice %3 {offsets = [6, 0], sizes = [1, 32], strides = [1, 1]} : vector<8x32xbf16> to vector<1x32xbf16>
    %56 = vector.extract_strided_slice %1 {offsets = [6, 0], sizes = [137, 1], strides = [1, 1]} : vector<144x1xbf16> to vector<137x1xbf16>
    %57 = arith.extf %56 : vector<137x1xbf16> to vector<137x1xf32>
    %58 = arith.extf %55 : vector<1x32xbf16> to vector<1x32xf32>
    %59 = vector.broadcast %57 : vector<137x1xf32> to vector<137x32xf32>
    %60 = vector.broadcast %58 : vector<1x32xf32> to vector<137x32xf32>
    %61 = arith.mulf %59, %60 : vector<137x32xf32>
    %62 = arith.addf %54, %61 : vector<137x32xf32>
    %63 = vector.extract_strided_slice %3 {offsets = [7, 0], sizes = [1, 32], strides = [1, 1]} : vector<8x32xbf16> to vector<1x32xbf16>
    %64 = vector.extract_strided_slice %1 {offsets = [7, 0], sizes = [137, 1], strides = [1, 1]} : vector<144x1xbf16> to vector<137x1xbf16>
    %65 = arith.extf %64 : vector<137x1xbf16> to vector<137x1xf32>
    %66 = arith.extf %63 : vector<1x32xbf16> to vector<1x32xf32>
    %67 = vector.broadcast %65 : vector<137x1xf32> to vector<137x32xf32>
    %68 = vector.broadcast %66 : vector<1x32xf32> to vector<137x32xf32>
    %69 = arith.mulf %67, %68 : vector<137x32xf32>
    %70 = arith.addf %62, %69 : vector<137x32xf32>
    %71 = vector.extract_strided_slice %5 {offsets = [0, 0], sizes = [1, 32], strides = [1, 1]} : vector<2x32xf32> to vector<1x32xf32>
    %72 = vector.broadcast %71 : vector<1x32xf32> to vector<137x32xf32>
    %73 = arith.mulf %70, %72 : vector<137x32xf32>
    %74 = vector.extract_strided_slice %5 {offsets = [1, 0], sizes = [1, 32], strides = [1, 1]} : vector<2x32xf32> to vector<1x32xf32>
    %75 = vector.broadcast %74 : vector<1x32xf32> to vector<137x32xf32>
    %76 = arith.addf %73, %75 : vector<137x32xf32>
    %cst_9 = arith.constant 0.000000e+00 : f32
    %77 = vector.broadcast %cst_9 : f32 to vector<137x32xf32>
    %78 = arith.maximumf %76, %77 : vector<137x32xf32>
    %c0_10 = arith.constant 0 : index
    %c0_11 = arith.constant 0 : index
    %79 = vector.load %arg13[%c0_10, %c0_11] : memref<164x137xbf16, #tpu.memory_space<vmem>>, vector<164x137xbf16>
    %80 = arith.truncf %78 : vector<137x32xf32> to vector<137x32xbf16>
    %cst_12 = arith.constant dense<0.000000e+00> : vector<164x32xf32>
    %81 = tpu.matmul %79, %80, %cst_12 {dimension_numbers = #tpu.dot_dimension_numbers<[1], [0], [0], [1], [0, 0, 1, 1], [], []>} : vector<164x137xbf16>, vector<137x32xbf16>, vector<164x32xf32> -> vector<164x32xf32>
    %82 = vector.extract_strided_slice %81 {offsets = [0, 0], sizes = [82, 32], strides = [1, 1]} : vector<164x32xf32> to vector<82x32xf32>
    %83 = vector.extract_strided_slice %81 {offsets = [82, 0], sizes = [82, 32], strides = [1, 1]} : vector<164x32xf32> to vector<82x32xf32>
    %84 = arith.maximumf %82, %83 : vector<82x32xf32>
    %85 = arith.truncf %84 : vector<82x32xf32> to vector<82x32xbf16>
    %c0_13 = arith.constant 0 : index
    %c0_14 = arith.constant 0 : index
    %c0_15 = arith.constant 0 : index
    %86 = vector.load %arg5[%c0_13, %c0_14, %c0_15] : memref<1x256x64xbf16, #tpu.memory_space<vmem>>, vector<1x256x64xbf16>
    %87 = vector.shape_cast %86 : vector<1x256x64xbf16> to vector<256x64xbf16>
    %c0_16 = arith.constant 0 : index
    %c0_17 = arith.constant 0 : index
    %c0_18 = arith.constant 0 : index
    %88 = vector.load %arg6[%c0_16, %c0_17, %c0_18] : memref<1x2x64xf32, #tpu.memory_space<vmem>>, vector<1x2x64xf32>
    %89 = vector.shape_cast %88 : vector<1x2x64xf32> to vector<2x64xf32>
    %cst_19 = arith.constant 0.000000e+00 : f32
    %90 = vector.broadcast %cst_19 : f32 to vector<75x64xf32>
    %91 = vector.extract_strided_slice %87 {offsets = [0, 0], sizes = [32, 64], strides = [1, 1]} : vector<256x64xbf16> to vector<32x64xbf16>
    %92 = vector.extract_strided_slice %85 {offsets = [0, 0], sizes = [75, 32], strides = [1, 1]} : vector<82x32xbf16> to vector<75x32xbf16>
    %cst_20 = arith.constant dense<0.000000e+00> : vector<75x64xf32>
    %93 = tpu.matmul %92, %91, %cst_20 {dimension_numbers = #tpu.dot_dimension_numbers<[1], [0], [0], [1], [0, 0, 1, 1], [], []>} : vector<75x32xbf16>, vector<32x64xbf16>, vector<75x64xf32> -> vector<75x64xf32>
    %94 = arith.addf %90, %93 : vector<75x64xf32>
    %95 = vector.extract_strided_slice %87 {offsets = [32, 0], sizes = [32, 64], strides = [1, 1]} : vector<256x64xbf16> to vector<32x64xbf16>
    %96 = vector.extract_strided_slice %85 {offsets = [1, 0], sizes = [75, 32], strides = [1, 1]} : vector<82x32xbf16> to vector<75x32xbf16>
    %cst_21 = arith.constant dense<0.000000e+00> : vector<75x64xf32>
    %97 = tpu.matmul %96, %95, %cst_21 {dimension_numbers = #tpu.dot_dimension_numbers<[1], [0], [0], [1], [0, 0, 1, 1], [], []>} : vector<75x32xbf16>, vector<32x64xbf16>, vector<75x64xf32> -> vector<75x64xf32>
    %98 = arith.addf %94, %97 : vector<75x64xf32>
    %99 = vector.extract_strided_slice %87 {offsets = [64, 0], sizes = [32, 64], strides = [1, 1]} : vector<256x64xbf16> to vector<32x64xbf16>
    %100 = vector.extract_strided_slice %85 {offsets = [2, 0], sizes = [75, 32], strides = [1, 1]} : vector<82x32xbf16> to vector<75x32xbf16>
    %cst_22 = arith.constant dense<0.000000e+00> : vector<75x64xf32>
    %101 = tpu.matmul %100, %99, %cst_22 {dimension_numbers = #tpu.dot_dimension_numbers<[1], [0], [0], [1], [0, 0, 1, 1], [], []>} : vector<75x32xbf16>, vector<32x64xbf16>, vector<75x64xf32> -> vector<75x64xf32>
    %102 = arith.addf %98, %101 : vector<75x64xf32>
    %103 = vector.extract_strided_slice %87 {offsets = [96, 0], sizes = [32, 64], strides = [1, 1]} : vector<256x64xbf16> to vector<32x64xbf16>
    %104 = vector.extract_strided_slice %85 {offsets = [3, 0], sizes = [75, 32], strides = [1, 1]} : vector<82x32xbf16> to vector<75x32xbf16>
    %cst_23 = arith.constant dense<0.000000e+00> : vector<75x64xf32>
    %105 = tpu.matmul %104, %103, %cst_23 {dimension_numbers = #tpu.dot_dimension_numbers<[1], [0], [0], [1], [0, 0, 1, 1], [], []>} : vector<75x32xbf16>, vector<32x64xbf16>, vector<75x64xf32> -> vector<75x64xf32>
    %106 = arith.addf %102, %105 : vector<75x64xf32>
    %107 = vector.extract_strided_slice %87 {offsets = [128, 0], sizes = [32, 64], strides = [1, 1]} : vector<256x64xbf16> to vector<32x64xbf16>
    %108 = vector.extract_strided_slice %85 {offsets = [4, 0], sizes = [75, 32], strides = [1, 1]} : vector<82x32xbf16> to vector<75x32xbf16>
    %cst_24 = arith.constant dense<0.000000e+00> : vector<75x64xf32>
    %109 = tpu.matmul %108, %107, %cst_24 {dimension_numbers = #tpu.dot_dimension_numbers<[1], [0], [0], [1], [0, 0, 1, 1], [], []>} : vector<75x32xbf16>, vector<32x64xbf16>, vector<75x64xf32> -> vector<75x64xf32>
    %110 = arith.addf %106, %109 : vector<75x64xf32>
    %111 = vector.extract_strided_slice %87 {offsets = [160, 0], sizes = [32, 64], strides = [1, 1]} : vector<256x64xbf16> to vector<32x64xbf16>
    %112 = vector.extract_strided_slice %85 {offsets = [5, 0], sizes = [75, 32], strides = [1, 1]} : vector<82x32xbf16> to vector<75x32xbf16>
    %cst_25 = arith.constant dense<0.000000e+00> : vector<75x64xf32>
    %113 = tpu.matmul %112, %111, %cst_25 {dimension_numbers = #tpu.dot_dimension_numbers<[1], [0], [0], [1], [0, 0, 1, 1], [], []>} : vector<75x32xbf16>, vector<32x64xbf16>, vector<75x64xf32> -> vector<75x64xf32>
    %114 = arith.addf %110, %113 : vector<75x64xf32>
    %115 = vector.extract_strided_slice %87 {offsets = [192, 0], sizes = [32, 64], strides = [1, 1]} : vector<256x64xbf16> to vector<32x64xbf16>
    %116 = vector.extract_strided_slice %85 {offsets = [6, 0], sizes = [75, 32], strides = [1, 1]} : vector<82x32xbf16> to vector<75x32xbf16>
    %cst_26 = arith.constant dense<0.000000e+00> : vector<75x64xf32>
    %117 = tpu.matmul %116, %115, %cst_26 {dimension_numbers = #tpu.dot_dimension_numbers<[1], [0], [0], [1], [0, 0, 1, 1], [], []>} : vector<75x32xbf16>, vector<32x64xbf16>, vector<75x64xf32> -> vector<75x64xf32>
    %118 = arith.addf %114, %117 : vector<75x64xf32>
    %119 = vector.extract_strided_slice %87 {offsets = [224, 0], sizes = [32, 64], strides = [1, 1]} : vector<256x64xbf16> to vector<32x64xbf16>
    %120 = vector.extract_strided_slice %85 {offsets = [7, 0], sizes = [75, 32], strides = [1, 1]} : vector<82x32xbf16> to vector<75x32xbf16>
    %cst_27 = arith.constant dense<0.000000e+00> : vector<75x64xf32>
    %121 = tpu.matmul %120, %119, %cst_27 {dimension_numbers = #tpu.dot_dimension_numbers<[1], [0], [0], [1], [0, 0, 1, 1], [], []>} : vector<75x32xbf16>, vector<32x64xbf16>, vector<75x64xf32> -> vector<75x64xf32>
    %122 = arith.addf %118, %121 : vector<75x64xf32>
    %123 = vector.extract_strided_slice %89 {offsets = [0, 0], sizes = [1, 64], strides = [1, 1]} : vector<2x64xf32> to vector<1x64xf32>
    %124 = vector.broadcast %123 : vector<1x64xf32> to vector<75x64xf32>
    %125 = arith.mulf %122, %124 : vector<75x64xf32>
    %126 = vector.extract_strided_slice %89 {offsets = [1, 0], sizes = [1, 64], strides = [1, 1]} : vector<2x64xf32> to vector<1x64xf32>
    %127 = vector.broadcast %126 : vector<1x64xf32> to vector<75x64xf32>
    %128 = arith.addf %125, %127 : vector<75x64xf32>
    %cst_28 = arith.constant 0.000000e+00 : f32
    %129 = vector.broadcast %cst_28 : f32 to vector<75x64xf32>
    %130 = arith.maximumf %128, %129 : vector<75x64xf32>
    %c0_29 = arith.constant 0 : index
    %c0_30 = arith.constant 0 : index
    %131 = vector.load %arg14[%c0_29, %c0_30] : memref<104x75xbf16, #tpu.memory_space<vmem>>, vector<104x75xbf16>
    %132 = arith.truncf %130 : vector<75x64xf32> to vector<75x64xbf16>
    %cst_31 = arith.constant dense<0.000000e+00> : vector<104x64xf32>
    %133 = tpu.matmul %131, %132, %cst_31 {dimension_numbers = #tpu.dot_dimension_numbers<[1], [0], [0], [1], [0, 0, 1, 1], [], []>} : vector<104x75xbf16>, vector<75x64xbf16>, vector<104x64xf32> -> vector<104x64xf32>
    %134 = vector.extract_strided_slice %133 {offsets = [0, 0], sizes = [52, 64], strides = [1, 1]} : vector<104x64xf32> to vector<52x64xf32>
    %135 = vector.extract_strided_slice %133 {offsets = [52, 0], sizes = [52, 64], strides = [1, 1]} : vector<104x64xf32> to vector<52x64xf32>
    %136 = arith.maximumf %134, %135 : vector<52x64xf32>
    %137 = arith.truncf %136 : vector<52x64xf32> to vector<52x64xbf16>
    %c0_32 = arith.constant 0 : index
    %c0_33 = arith.constant 0 : index
    %c0_34 = arith.constant 0 : index
    %138 = vector.load %arg7[%c0_32, %c0_33, %c0_34] : memref<1x512x32xbf16, #tpu.memory_space<vmem>>, vector<1x512x32xbf16>
    %139 = vector.shape_cast %138 : vector<1x512x32xbf16> to vector<512x32xbf16>
    %c0_35 = arith.constant 0 : index
    %c0_36 = arith.constant 0 : index
    %c0_37 = arith.constant 0 : index
    %140 = vector.load %arg8[%c0_35, %c0_36, %c0_37] : memref<1x2x32xf32, #tpu.memory_space<vmem>>, vector<1x2x32xf32>
    %141 = vector.shape_cast %140 : vector<1x2x32xf32> to vector<2x32xf32>
    %cst_38 = arith.constant 0.000000e+00 : f32
    %142 = vector.broadcast %cst_38 : f32 to vector<45x32xf32>
    %143 = vector.extract_strided_slice %139 {offsets = [0, 0], sizes = [64, 32], strides = [1, 1]} : vector<512x32xbf16> to vector<64x32xbf16>
    %144 = vector.extract_strided_slice %137 {offsets = [0, 0], sizes = [45, 64], strides = [1, 1]} : vector<52x64xbf16> to vector<45x64xbf16>
    %cst_39 = arith.constant dense<0.000000e+00> : vector<45x32xf32>
    %145 = tpu.matmul %144, %143, %cst_39 {dimension_numbers = #tpu.dot_dimension_numbers<[1], [0], [0], [1], [0, 0, 1, 1], [], []>} : vector<45x64xbf16>, vector<64x32xbf16>, vector<45x32xf32> -> vector<45x32xf32>
    %146 = arith.addf %142, %145 : vector<45x32xf32>
    %147 = vector.extract_strided_slice %139 {offsets = [64, 0], sizes = [64, 32], strides = [1, 1]} : vector<512x32xbf16> to vector<64x32xbf16>
    %148 = vector.extract_strided_slice %137 {offsets = [1, 0], sizes = [45, 64], strides = [1, 1]} : vector<52x64xbf16> to vector<45x64xbf16>
    %cst_40 = arith.constant dense<0.000000e+00> : vector<45x32xf32>
    %149 = tpu.matmul %148, %147, %cst_40 {dimension_numbers = #tpu.dot_dimension_numbers<[1], [0], [0], [1], [0, 0, 1, 1], [], []>} : vector<45x64xbf16>, vector<64x32xbf16>, vector<45x32xf32> -> vector<45x32xf32>
    %150 = arith.addf %146, %149 : vector<45x32xf32>
    %151 = vector.extract_strided_slice %139 {offsets = [128, 0], sizes = [64, 32], strides = [1, 1]} : vector<512x32xbf16> to vector<64x32xbf16>
    %152 = vector.extract_strided_slice %137 {offsets = [2, 0], sizes = [45, 64], strides = [1, 1]} : vector<52x64xbf16> to vector<45x64xbf16>
    %cst_41 = arith.constant dense<0.000000e+00> : vector<45x32xf32>
    %153 = tpu.matmul %152, %151, %cst_41 {dimension_numbers = #tpu.dot_dimension_numbers<[1], [0], [0], [1], [0, 0, 1, 1], [], []>} : vector<45x64xbf16>, vector<64x32xbf16>, vector<45x32xf32> -> vector<45x32xf32>
    %154 = arith.addf %150, %153 : vector<45x32xf32>
    %155 = vector.extract_strided_slice %139 {offsets = [192, 0], sizes = [64, 32], strides = [1, 1]} : vector<512x32xbf16> to vector<64x32xbf16>
    %156 = vector.extract_strided_slice %137 {offsets = [3, 0], sizes = [45, 64], strides = [1, 1]} : vector<52x64xbf16> to vector<45x64xbf16>
    %cst_42 = arith.constant dense<0.000000e+00> : vector<45x32xf32>
    %157 = tpu.matmul %156, %155, %cst_42 {dimension_numbers = #tpu.dot_dimension_numbers<[1], [0], [0], [1], [0, 0, 1, 1], [], []>} : vector<45x64xbf16>, vector<64x32xbf16>, vector<45x32xf32> -> vector<45x32xf32>
    %158 = arith.addf %154, %157 : vector<45x32xf32>
    %159 = vector.extract_strided_slice %139 {offsets = [256, 0], sizes = [64, 32], strides = [1, 1]} : vector<512x32xbf16> to vector<64x32xbf16>
    %160 = vector.extract_strided_slice %137 {offsets = [4, 0], sizes = [45, 64], strides = [1, 1]} : vector<52x64xbf16> to vector<45x64xbf16>
    %cst_43 = arith.constant dense<0.000000e+00> : vector<45x32xf32>
    %161 = tpu.matmul %160, %159, %cst_43 {dimension_numbers = #tpu.dot_dimension_numbers<[1], [0], [0], [1], [0, 0, 1, 1], [], []>} : vector<45x64xbf16>, vector<64x32xbf16>, vector<45x32xf32> -> vector<45x32xf32>
    %162 = arith.addf %158, %161 : vector<45x32xf32>
    %163 = vector.extract_strided_slice %139 {offsets = [320, 0], sizes = [64, 32], strides = [1, 1]} : vector<512x32xbf16> to vector<64x32xbf16>
    %164 = vector.extract_strided_slice %137 {offsets = [5, 0], sizes = [45, 64], strides = [1, 1]} : vector<52x64xbf16> to vector<45x64xbf16>
    %cst_44 = arith.constant dense<0.000000e+00> : vector<45x32xf32>
    %165 = tpu.matmul %164, %163, %cst_44 {dimension_numbers = #tpu.dot_dimension_numbers<[1], [0], [0], [1], [0, 0, 1, 1], [], []>} : vector<45x64xbf16>, vector<64x32xbf16>, vector<45x32xf32> -> vector<45x32xf32>
    %166 = arith.addf %162, %165 : vector<45x32xf32>
    %167 = vector.extract_strided_slice %139 {offsets = [384, 0], sizes = [64, 32], strides = [1, 1]} : vector<512x32xbf16> to vector<64x32xbf16>
    %168 = vector.extract_strided_slice %137 {offsets = [6, 0], sizes = [45, 64], strides = [1, 1]} : vector<52x64xbf16> to vector<45x64xbf16>
    %cst_45 = arith.constant dense<0.000000e+00> : vector<45x32xf32>
    %169 = tpu.matmul %168, %167, %cst_45 {dimension_numbers = #tpu.dot_dimension_numbers<[1], [0], [0], [1], [0, 0, 1, 1], [], []>} : vector<45x64xbf16>, vector<64x32xbf16>, vector<45x32xf32> -> vector<45x32xf32>
    %170 = arith.addf %166, %169 : vector<45x32xf32>
    %171 = vector.extract_strided_slice %139 {offsets = [448, 0], sizes = [64, 32], strides = [1, 1]} : vector<512x32xbf16> to vector<64x32xbf16>
    %172 = vector.extract_strided_slice %137 {offsets = [7, 0], sizes = [45, 64], strides = [1, 1]} : vector<52x64xbf16> to vector<45x64xbf16>
    %cst_46 = arith.constant dense<0.000000e+00> : vector<45x32xf32>
    %173 = tpu.matmul %172, %171, %cst_46 {dimension_numbers = #tpu.dot_dimension_numbers<[1], [0], [0], [1], [0, 0, 1, 1], [], []>} : vector<45x64xbf16>, vector<64x32xbf16>, vector<45x32xf32> -> vector<45x32xf32>
    %174 = arith.addf %170, %173 : vector<45x32xf32>
    %175 = vector.extract_strided_slice %141 {offsets = [0, 0], sizes = [1, 32], strides = [1, 1]} : vector<2x32xf32> to vector<1x32xf32>
    %176 = vector.broadcast %175 : vector<1x32xf32> to vector<45x32xf32>
    %177 = arith.mulf %174, %176 : vector<45x32xf32>
    %178 = vector.extract_strided_slice %141 {offsets = [1, 0], sizes = [1, 32], strides = [1, 1]} : vector<2x32xf32> to vector<1x32xf32>
    %179 = vector.broadcast %178 : vector<1x32xf32> to vector<45x32xf32>
    %180 = arith.addf %177, %179 : vector<45x32xf32>
    %cst_47 = arith.constant 0.000000e+00 : f32
    %181 = vector.broadcast %cst_47 : f32 to vector<45x32xf32>
    %182 = arith.maximumf %180, %181 : vector<45x32xf32>
    %c0_48 = arith.constant 0 : index
    %c0_49 = arith.constant 0 : index
    %183 = vector.load %arg15[%c0_48, %c0_49] : memref<40x45xf32, #tpu.memory_space<vmem>>, vector<40x45xf32>
    %cst_50 = arith.constant dense<0.000000e+00> : vector<40x32xf32>
    %184 = tpu.matmul %183, %182, %cst_50 {dimension_numbers = #tpu.dot_dimension_numbers<[1], [0], [0], [1], [0, 0, 1, 1], [], []>} : vector<40x45xf32>, vector<45x32xf32>, vector<40x32xf32> -> vector<40x32xf32>
    %185 = vector.extract_strided_slice %184 {offsets = [0, 0], sizes = [20, 32], strides = [1, 1]} : vector<40x32xf32> to vector<20x32xf32>
    %186 = vector.extract_strided_slice %184 {offsets = [20, 0], sizes = [20, 32], strides = [1, 1]} : vector<40x32xf32> to vector<20x32xf32>
    %187 = arith.maximumf %185, %186 : vector<20x32xf32>
    %c0_51 = arith.constant 0 : index
    %c0_52 = arith.constant 0 : index
    %188 = vector.load %arg16[%c0_51, %c0_52] : memref<32x320xf32, #tpu.memory_space<vmem>>, vector<32x320xf32>
    %cst_53 = arith.constant dense<0.000000e+00> : vector<20x320xf32>
    %189 = tpu.matmul %187, %188, %cst_53 {dimension_numbers = #tpu.dot_dimension_numbers<[1], [0], [0], [1], [0, 0, 1, 1], [], []>} : vector<20x32xf32>, vector<32x320xf32>, vector<20x320xf32> -> vector<20x320xf32>
    %c0_54 = arith.constant 0 : index
    %c0_55 = arith.constant 0 : index
    %190 = vector.load %arg17[%c0_54, %c0_55] : memref<20x320xf32, #tpu.memory_space<vmem>>, vector<20x320xf32>
    %191 = arith.mulf %189, %190 : vector<20x320xf32>
    %c0_56 = arith.constant 0 : index
    %c0_57 = arith.constant 0 : index
    %192 = vector.load %arg18[%c0_56, %c0_57] : memref<2x20xf32, #tpu.memory_space<vmem>>, vector<2x20xf32>
    %cst_58 = arith.constant dense<0.000000e+00> : vector<2x320xf32>
    %193 = tpu.matmul %192, %191, %cst_58 {dimension_numbers = #tpu.dot_dimension_numbers<[1], [0], [0], [1], [0, 0, 1, 1], [], []>} : vector<2x20xf32>, vector<20x320xf32>, vector<2x320xf32> -> vector<2x320xf32>
    %c0_59 = arith.constant 0 : index
    %c0_60 = arith.constant 0 : index
    %c0_61 = arith.constant 0 : index
    %c0_62 = arith.constant 0 : index
    %194 = vector.load %arg19[%c0_59, %c0_60, %c0_61, %c0_62] : memref<1x1x2x320xf32, #tpu.memory_space<vmem>>, vector<1x1x2x320xf32>
    %195 = vector.shape_cast %194 : vector<1x1x2x320xf32> to vector<2x320xf32>
    %196 = vector.shape_cast %193 : vector<2x320xf32> to vector<1x1x2x320xf32>
    tpu.vector_store %arg19[%c0_59, %c0_60, %c0_61, %c0_62], %196 {strides = array<i32>} : memref<1x1x2x320xf32, #tpu.memory_space<vmem>>, vector<1x1x2x320xf32>,
    %c0_63 = arith.constant 0 : index
    %c0_64 = arith.constant 0 : index
    %c0_65 = arith.constant 0 : index
    %197 = vector.load %arg10[%c0_63, %c0_64, %c0_65] : memref<1x2x256xf32, #tpu.memory_space<vmem>>, vector<1x2x256xf32>
    %198 = vector.shape_cast %197 : vector<1x2x256xf32> to vector<2x256xf32>
    %199 = arith.truncf %193 : vector<2x320xf32> to vector<2x320xbf16>
    %c0_66 = arith.constant 0 : index
    %c0_67 = arith.constant 0 : index
    %c0_68 = arith.constant 0 : index
    %200 = vector.load %arg9[%c0_66, %c0_67, %c0_68] : memref<1x320x256xbf16, #tpu.memory_space<vmem>>, vector<1x320x256xbf16>
    %201 = vector.shape_cast %200 : vector<1x320x256xbf16> to vector<320x256xbf16>
    %cst_69 = arith.constant dense<0.000000e+00> : vector<2x256xf32>
    %202 = tpu.matmul %199, %201, %cst_69 {dimension_numbers = #tpu.dot_dimension_numbers<[1], [0], [0], [1], [0, 0, 1, 1], [], []>} : vector<2x320xbf16>, vector<320x256xbf16>, vector<2x256xf32> -> vector<2x256xf32>
    %203 = vector.extract_strided_slice %198 {offsets = [0, 0], sizes = [1, 256], strides = [1, 1]} : vector<2x256xf32> to vector<1x256xf32>
    %204 = vector.broadcast %203 : vector<1x256xf32> to vector<2x256xf32>
    %205 = arith.mulf %202, %204 : vector<2x256xf32>
    %206 = vector.extract_strided_slice %198 {offsets = [1, 0], sizes = [1, 256], strides = [1, 1]} : vector<2x256xf32> to vector<1x256xf32>
    %207 = vector.broadcast %206 : vector<1x256xf32> to vector<2x256xf32>
    %208 = arith.addf %205, %207 : vector<2x256xf32>
    %cst_70 = arith.constant 0.000000e+00 : f32
    %209 = vector.broadcast %cst_70 : f32 to vector<2x256xf32>
    %210 = arith.maximumf %208, %209 : vector<2x256xf32>
    %211 = arith.truncf %210 : vector<2x256xf32> to vector<2x256xbf16>
    %c0_71 = arith.constant 0 : index
    %c0_72 = arith.constant 0 : index
    %c0_73 = arith.constant 0 : index
    %212 = vector.load %arg11[%c0_71, %c0_72, %c0_73] : memref<1x256x128xbf16, #tpu.memory_space<vmem>>, vector<1x256x128xbf16>
    %213 = vector.shape_cast %212 : vector<1x256x128xbf16> to vector<256x128xbf16>
    %cst_74 = arith.constant dense<0.000000e+00> : vector<2x128xf32>
    %214 = tpu.matmul %211, %213, %cst_74 {dimension_numbers = #tpu.dot_dimension_numbers<[1], [0], [0], [1], [0, 0, 1, 1], [], []>} : vector<2x256xbf16>, vector<256x128xbf16>, vector<2x128xf32> -> vector<2x128xf32>
    %c0_75 = arith.constant 0 : index
    %c0_76 = arith.constant 0 : index
    %c0_77 = arith.constant 0 : index
    %215 = vector.load %arg12[%c0_75, %c0_76, %c0_77] : memref<1x1x128xf32, #tpu.memory_space<vmem>>, vector<1x1x128xf32>
    %216 = vector.shape_cast %215 : vector<1x1x128xf32> to vector<1x128xf32>
    %217 = vector.broadcast %216 : vector<1x128xf32> to vector<2x128xf32>
    %218 = arith.addf %214, %217 : vector<2x128xf32>
    %c0_78 = arith.constant 0 : index
    %c0_79 = arith.constant 0 : index
    %c0_80 = arith.constant 0 : index
    %c0_81 = arith.constant 0 : index
    %219 = vector.load %arg20[%c0_78, %c0_79, %c0_80, %c0_81] : memref<1x1x2x128xf32, #tpu.memory_space<vmem>>, vector<1x1x2x128xf32>
    %220 = vector.shape_cast %219 : vector<1x1x2x128xf32> to vector<2x128xf32>
    %221 = vector.shape_cast %218 : vector<2x128xf32> to vector<1x1x2x128xf32>
    tpu.vector_store %arg20[%c0_78, %c0_79, %c0_80, %c0_81], %221 {strides = array<i32>} : memref<1x1x2x128xf32, #tpu.memory_space<vmem>>, vector<1x1x2x128xf32>,
    return
  }
  func.func @transform_0(%arg0: i32, %arg1: i32) -> (i32, i32, i32, i32) {
    %c0_i32 = arith.constant 0 : i32
    %c0_i32_0 = arith.constant 0 : i32
    %c0_i32_1 = arith.constant 0 : i32
    return %arg0, %arg1, %c0_i32, %c0_i32_0 : i32, i32, i32, i32
  }
  func.func @transform_1(%arg0: i32, %arg1: i32) -> (i32, i32, i32) {
    %c0_i32 = arith.constant 0 : i32
    %c0_i32_0 = arith.constant 0 : i32
    %c0_i32_1 = arith.constant 0 : i32
    return %arg0, %c0_i32, %c0_i32_0 : i32, i32, i32
  }
  func.func @transform_2(%arg0: i32, %arg1: i32) -> (i32, i32, i32) {
    %c0_i32 = arith.constant 0 : i32
    %c0_i32_0 = arith.constant 0 : i32
    %c0_i32_1 = arith.constant 0 : i32
    return %arg0, %c0_i32, %c0_i32_0 : i32, i32, i32
  }
  func.func @transform_3(%arg0: i32, %arg1: i32) -> (i32, i32, i32) {
    %c0_i32 = arith.constant 0 : i32
    %c0_i32_0 = arith.constant 0 : i32
    %c0_i32_1 = arith.constant 0 : i32
    return %arg0, %c0_i32, %c0_i32_0 : i32, i32, i32
  }
  func.func @transform_4(%arg0: i32, %arg1: i32) -> (i32, i32, i32) {
    %c0_i32 = arith.constant 0 : i32
    %c0_i32_0 = arith.constant 0 : i32
    %c0_i32_1 = arith.constant 0 : i32
    return %arg0, %c0_i32, %c0_i32_0 : i32, i32, i32
  }
  func.func @transform_5(%arg0: i32, %arg1: i32) -> (i32, i32, i32) {
    %c0_i32 = arith.constant 0 : i32
    %c0_i32_0 = arith.constant 0 : i32
    %c0_i32_1 = arith.constant 0 : i32
    return %arg0, %c0_i32, %c0_i32_0 : i32, i32, i32
  }
  func.func @transform_6(%arg0: i32, %arg1: i32) -> (i32, i32, i32) {
    %c0_i32 = arith.constant 0 : i32
    %c0_i32_0 = arith.constant 0 : i32
    %c0_i32_1 = arith.constant 0 : i32
    return %arg0, %c0_i32, %c0_i32_0 : i32, i32, i32
  }
  func.func @transform_7(%arg0: i32, %arg1: i32) -> (i32, i32, i32) {
    %c0_i32 = arith.constant 0 : i32
    %c0_i32_0 = arith.constant 0 : i32
    %c0_i32_1 = arith.constant 0 : i32
    return %arg0, %c0_i32, %c0_i32_0 : i32, i32, i32
  }
  func.func @transform_8(%arg0: i32, %arg1: i32) -> (i32, i32, i32) {
    %c0_i32 = arith.constant 0 : i32
    %c0_i32_0 = arith.constant 0 : i32
    %c0_i32_1 = arith.constant 0 : i32
    return %arg0, %c0_i32, %c0_i32_0 : i32, i32, i32
  }
  func.func @transform_9(%arg0: i32, %arg1: i32) -> (i32, i32, i32) {
    %c0_i32 = arith.constant 0 : i32
    %c0_i32_0 = arith.constant 0 : i32
    %c0_i32_1 = arith.constant 0 : i32
    return %arg0, %c0_i32, %c0_i32_0 : i32, i32, i32
  }
  func.func @transform_10(%arg0: i32, %arg1: i32) -> (i32, i32, i32) {
    %c0_i32 = arith.constant 0 : i32
    %c0_i32_0 = arith.constant 0 : i32
    %c0_i32_1 = arith.constant 0 : i32
    return %arg0, %c0_i32, %c0_i32_0 : i32, i32, i32
  }
  func.func @transform_11(%arg0: i32, %arg1: i32) -> (i32, i32) {
    %c0_i32 = arith.constant 0 : i32
    %c0_i32_0 = arith.constant 0 : i32
    %c0_i32_1 = arith.constant 0 : i32
    return %c0_i32, %c0_i32_0 : i32, i32
  }
  func.func @transform_12(%arg0: i32, %arg1: i32) -> (i32, i32) {
    %c0_i32 = arith.constant 0 : i32
    %c0_i32_0 = arith.constant 0 : i32
    %c0_i32_1 = arith.constant 0 : i32
    return %c0_i32, %c0_i32_0 : i32, i32
  }
  func.func @transform_13(%arg0: i32, %arg1: i32) -> (i32, i32) {
    %c0_i32 = arith.constant 0 : i32
    %c0_i32_0 = arith.constant 0 : i32
    %c0_i32_1 = arith.constant 0 : i32
    return %c0_i32, %c0_i32_0 : i32, i32
  }
  func.func @transform_14(%arg0: i32, %arg1: i32) -> (i32, i32) {
    %c0_i32 = arith.constant 0 : i32
    %c0_i32_0 = arith.constant 0 : i32
    %c0_i32_1 = arith.constant 0 : i32
    return %c0_i32, %c0_i32_0 : i32, i32
  }
  func.func @transform_15(%arg0: i32, %arg1: i32) -> (i32, i32) {
    %c0_i32 = arith.constant 0 : i32
    %c0_i32_0 = arith.constant 0 : i32
    %c0_i32_1 = arith.constant 0 : i32
    return %c0_i32, %c0_i32_0 : i32, i32
  }
  func.func @transform_16(%arg0: i32, %arg1: i32) -> (i32, i32) {
    %c0_i32 = arith.constant 0 : i32
    %c0_i32_0 = arith.constant 0 : i32
    %c0_i32_1 = arith.constant 0 : i32
    return %c0_i32, %c0_i32_0 : i32, i32
  }
  func.func @transform_17(%arg0: i32, %arg1: i32) -> (i32, i32, i32, i32) {
    %c0_i32 = arith.constant 0 : i32
    %c0_i32_0 = arith.constant 0 : i32
    %c0_i32_1 = arith.constant 0 : i32
    return %arg0, %arg1, %c0_i32, %c0_i32_0 : i32, i32, i32, i32
  }
  func.func @transform_18(%arg0: i32, %arg1: i32) -> (i32, i32, i32, i32) {
    %c0_i32 = arith.constant 0 : i32
    %c0_i32_0 = arith.constant 0 : i32
    %c0_i32_1 = arith.constant 0 : i32
    return %arg0, %arg1, %c0_i32, %c0_i32_0 : i32, i32, i32, i32
  }
}

</mosaic_0001>

<bundles_post_ra>
// kernel: _lambda_.1
= control target key start
LH: loop header
LB: loop body
LE: loop exit
PB: predicated region body
PF: predicated region fallthrough
CT: control target
= control target key end

     0   :  { %s7249_s27 = smov 0   ;;  %s7251_s28 = smov 0   ;;  %s9258_s0 = inlined_call_operand.vmem [shape: bf16[2,1,144,1], index: 0, kind: input, shape index: {}]   ;;  %s9259_s1 = inlined_call_operand.vmem [shape: bf16[2,8,32], index: 1, kind: input, shape index: {}]   ;;  %s9260_s2 = inlined_call_operand.vmem [shape: f32[2,2,32], index: 2, kind: input, shape index: {}]   ;;  %s9261_s3 = inlined_call_operand.vmem [shape: bf16[2,256,64], index: 3, kind: input, shape index: {}]   ;;  %s9262_s4 = inlined_call_operand.vmem [shape: f32[2,2,64], index: 4, kind: input, shape index: {}]   ;;  %s9263_s5 = inlined_call_operand.vmem [shape: bf16[2,512,32], index: 5, kind: input, shape index: {}]   ;;  %s9264_s6 = inlined_call_operand.vmem [shape: f32[2,2,32], index: 6, kind: input, shape index: {}]   ;;  %s9265_s7 = inlined_call_operand.vmem [shape: bf16[2,320,256], index: 7, kind: input, shape index: {}]   ;;  %s9266_s8 = inlined_call_operand.vmem [shape: f32[2,2,256], index: 8, kind: input, shape index: {}]   ;;  %s9267_s9 = inlined_call_operand.vmem [shape: bf16[2,256,128], index: 9, kind: input, shape index: {}]   ;;  %s9268_s10 = inlined_call_operand.vmem [shape: f32[2,1,128], index: 10, kind: input, shape index: {}]   ;;  %s9269_s11 = inlined_call_operand.vmem [shape: bf16[164,137], index: 11, kind: input, shape index: {}]   ;;  %s9270_s12 = inlined_call_operand.vmem [shape: bf16[104,75], index: 12, kind: input, shape index: {}]   ;;  %s9271_s13 = inlined_call_operand.vmem [shape: f32[40,45], index: 13, kind: input, shape index: {}]   ;;  %s9272_s14 = inlined_call_operand.vmem [shape: f32[32,320], index: 14, kind: input, shape index: {}]   ;;  %s9273_s15 = inlined_call_operand.vmem [shape: f32[20,320], index: 15, kind: input, shape index: {}]   ;;  %s9274_s16 = inlined_call_operand.vmem [shape: f32[2,20], index: 16, kind: input, shape index: {}]   ;;  %s9275_s17 = inlined_call_operand.vmem [shape: f32[2,1,2,320], index: 17, kind: output, shape index: {0}]   ;;  %s9276_s18 = inlined_call_operand.vmem [shape: f32[2,1,2,128], index: 18, kind: output, shape index: {1}]  }
   0x1   :  { %9295 = sst [smem:[#allocation9_spill]] %s9258_s0  ;;  %s7253_s29 = smov 0  }
   0x2   :  { %9296 = sst [smem:[#allocation10_spill]] %s9259_s1 }
   0x3   :  { %9297 = sst [smem:[#allocation11_spill]] %s9260_s2 }
   0x4   :  { %9298 = sst [smem:[#allocation12_spill]] %s9261_s3 }
   0x5   :  { %9299 = sst [smem:[#allocation13_spill]] %s9263_s5 }
   0x6   :  { %9300 = sst [smem:[#allocation14_spill]] %s9265_s7 }
   0x7 LB: > { %9301 = sst [smem:[#allocation2_spill]] %s7141_s28  ;;  %s41_s30 = sadd.s32 1, %s7141_s28  ;;  %s7145_s29 = sphi %s7253_s29, %s29_s29   ;;  %s7141_s28 = sphi %s7251_s28, %s9334_s28   ;;  %s7137_s27 = sphi %s7249_s27, %s9333_s27  }
   0x8   : > { %9302 = sst [smem:[#allocation3_spill]] %s7145_s29  ;;  %p5703_p0 = scmp.ge.s32.totalorder %s7145_s29, 1 }
   0x9   : > { %p43_p1 = scmp.ge.s32.totalorder %s41_s30, 2  ;;  %p631_p2 = scmp.lt.s32.totalorder %s7145_s29, 3 }
   0xb   : > { %s9336_s30 = smov (%p43_p1, %s41_s30), 0  ;;  %p632_p3 = pnand %p5703_p0, %p631_p2 }
   0xc   : > { %9303 = sst [smem:[#allocation4_spill]] %s9336_s30 }
   0xd   : > { %635 = sbr.rel (%p632_p3) target bundleno = 2939 (0xb7b), region = 88 }
  0x14   : > { %p744_p4 = scmp.lt.s32.totalorder %s7137_s27, 1  ;;  %v9281_v0 = vmov 0   ;;  %s9304_s20 = sld [smem:[#allocation9_spill]]  ;;  %v943_v36 = vlaneseq  ;;  %vm1023_vm0 = vcmask 1046528   ;;  %vm1135_vm1 = vcmask 1045504  }
  0x15   : > { %6924 = vset.pattern.permute.xlu1 %v9281_v0  ;;  %6918 = vset.pattern.permute.xlu0 %v9281_v0  ;;  %s9305_s3 = sld [smem:[#allocation12_spill]]  ;;  %s9306_s7 = sld [smem:[#allocation14_spill]]  ;;  %vm1247_vm2 = vcmask 1044480   ;;  %vm1359_vm3 = vcmask 1043456   ;;  %vm1471_vm4 = vcmask 1042432   ;;  %vm1583_vm5 = vcmask 1041408  }
  0x16   : > { %s9338_s27 = smov (!%p744_p4, %s7137_s27), 1  ;;  %1994 = vmatprep.subr.bf16.mxu0 %v9281_v0  ;;  %s9307_s5 = sld [smem:[#allocation13_spill]]  ;;  %v7323_v37 = vshrl.u32 %v943_v36, 7  ;;  %vm1695_vm6 = vcmask 1040384   ;;  %vm1955_vm7 = vcmask 72704   ;;  %vm7150_vm8 = vmmov 0  }
  0x17   : > { %s6884_s0 = smul.u32 72, %s9338_s27  ;;  %s5956_s22 = sshll.u32 %s9338_s27, 7  ;;  %vm2207_vm9 = vsmask.f32 7424  ;;  %vm2259_vm10 = vcmask 261120   ;;  %vm3299_vm14 = vcmask 613376  }
  0x18   : > { %s6885_s25 = smul.u32 320, %s9338_s27  ;;  %s5957_s1 = sshll.u32 %s9338_s27, 8  ;;  %9309 = vst [vmem:[#allocation5_spill] sm:$0xff] %v7323_v37  ;;  %v7330_v40 = vsub.s32 1, %v7323_v37  ;;  %v7333_v41 = vsub.s32 0, %v7323_v37  ;;  %v9280_v43 = vsub.s32 2, %v7323_v37 }
  0x19   : > { %s7312_s26 = scalar_lea.vmem %s9267_s9, %s5956_s22  ;;  %s9308_s30 = sld [smem:[#allocation10_spill]]  ;;  %v9279_v44 = vsub.s32 3, %v7323_v37  ;;  %v1321_v45 = vsub.s32 4, %v7323_v37  ;;  %v1433_v46 = vsub.s32 5, %v7323_v37  ;;  %v1545_v47 = vsub.s32 6, %v7323_v37 }
  0x1a   : > { %s7276_s21 = scalar_lea.vmem %s9304_s20, %s6884_s0  ;;  %s5705_s0 = sshll.u32 %s9338_s27, 2  ;;  %9311 = vst [vmem:[#allocation6_spill] sm:$0xff] %v7330_v40  ;;  %9312 = vst [vmem:[#allocation7_spill] sm:$0xff] %v7333_v41  ;;  %v1657_v48 = vsub.s32 7, %v7323_v37  ;;  %vm2568_vm11 = vsmask.f32 6400 }
  0x1b   : > { %v5996_v1 = vld [vmem:[%s7276_s21 + $0x8] sm:$0xff]   ;;  %v5997_v2 = vld [vmem:[%s7276_s21 + $0x10] sm:$0xff]   ;;  %v5961_v5 = vld [vmem:[%s7276_s21] sm:$0xff]   ;;  %s7290_s24 = scalar_lea.vmem %s9305_s3, %s5956_s22  ;;  %s7298_s19 = scalar_lea.vmem %s9306_s7, %s6885_s25  ;;  %vm2818_vm12 = vsmask.f32 5376  ;;  %vm3564_vm15 = vcmask 523264  }
  0x1c   : > { %v5967_v3 = vunpack.c.h.bf16 %v5996_v1  ;;  %v5970_v4 = vunpack.c.l.bf16 %v5997_v2  ;;  %v5998_v6 = vld [vmem:[%s7276_s21 + $0x18] sm:$0xff]   ;;  %v5999_v7 = vld [vmem:[%s7276_s21 + $0x20] sm:$0xff]   ;;  %v5971_v8 = vunpack.c.h.bf16 %v5997_v2  ;;  %v6000_v9 = vld [vmem:[%s7276_s21 + $0x28] sm:$0xff]   ;;  %v5962_v11 = vunpack.c.l.bf16 %v5961_v5  ;;  %s7321_s20 = sshll.u32 %s9338_s27, 1  ;;  %s6886_s22 = smul.u32 6, %s9338_s27 }
  0x1d   : > { %v5963_v12 = vunpack.c.h.bf16 %v5961_v5  ;;  %v5974_v13 = vunpack.c.l.bf16 %v5998_v6  ;;  %v6001_v14 = vld [vmem:[%s7276_s21 + $0x30] sm:$0xff]   ;;  %v6002_v15 = vld [vmem:[%s7276_s21 + $0x38] sm:$0xff]   ;;  %v5979_v17 = vunpack.c.h.bf16 %v5999_v7  ;;  %v5982_v18 = vunpack.c.l.bf16 %v6000_v9  ;;  %v6003_v26 = vld [vmem:[%s7276_s21 + $0x40] sm:$0xff]   ;;  %s7305_s21 = scalar_lea.vmem %s9307_s5, %s5957_s1  ;;  %s9310_s5 = sld [smem:[#allocation11_spill]] }
  0x1e   : > { %v6925_v10 = vpack.i.bf16 %v5970_v4, %v5967_v3  ;;  %v5966_v20 = vunpack.c.l.bf16 %v5996_v1  ;;  %v5975_v21 = vunpack.c.h.bf16 %v5998_v6  ;;  %v5978_v22 = vunpack.c.l.bf16 %v5999_v7  ;;  %s769_s2 = scalar_lea.vmem %s9262_s4, %s7321_s20  ;;  %s796_s3 = scalar_lea.vmem %s9268_s10, %s9338_s27 }
  0x1f   : > { %v6919_v16 = vpack.i.bf16 %v5963_v12, %v5962_v11  ;;  %v6930_v19 = vpack.i.bf16 %v5974_v13, %v5971_v8  ;;  %v6940_v23 = vpack.i.bf16 %v5982_v18, %v5979_v17  ;;  %v5987_v24 = vunpack.c.h.bf16 %v6001_v14  ;;  %s756_s28 = scalar_lea.vmem %s9308_s30, %s5705_s0  ;;  %s812_s7 = scalar_lea.vmem %s9276_s18, %s7321_s20 }
  0x20   : > { %6926 = vperm.xlu1 %6924, %v6925_v10   ;;  %v5990_v25 = vunpack.c.l.bf16 %v6002_v15  ;;  %v6935_v27 = vpack.i.bf16 %v5978_v22, %v5975_v21  ;;  %v5983_v28 = vunpack.c.h.bf16 %v6000_v9  ;;  %v5986_v29 = vunpack.c.l.bf16 %v6001_v14  ;;  %v832_v38 = vld [vmem:[%s756_s28] sm:$0xf]  ;;  %s778_s28 = scalar_lea.vmem %s9264_s6, %s7321_s20 }
  0x21   : > { %6920 = vperm.xlu0 %6918, %v6919_v16   ;;  %v5991_v32 = vunpack.c.h.bf16 %v6002_v15  ;;  %v5994_v33 = vunpack.c.l.bf16 %v6003_v26  ;;  %v5995_v34 = vunpack.c.h.bf16 %v6003_v26  ;;  %v852_v39 = vunpack.c.l.bf16 %v832_v38 }
  0x22   : > { %v6950_v30 = vpack.i.bf16 %v5990_v25, %v5987_v24  ;;  %v6945_v31 = vpack.i.bf16 %v5986_v29, %v5983_v28  ;;  %vm3071_vm13 = vsmask.f32 4352 }
  0x23   : > { %v6955_v35 = vpack.i.bf16 %v5994_v33, %v5991_v32  ;;  %s760_s29 = scalar_lea.vmem %s9310_s5, %s7321_s20  ;;  %v7342_v49 = vrot.slane %v852_v39, %v7330_v40  ;;  %v7345_v50 = vrot.slane %v852_v39, %v7333_v41  ;;  %v7352_v53 = vrot.slane %v852_v39, %v9280_v43 }
  0x24   : > { %6931 = vperm.xlu1 %6924, %v6930_v19   ;;  %v833_v42 = vld [vmem:[%s760_s29] sm:$0x3]  ;;  %v7356_v54 = vrot.slane %v852_v39, %v9279_v44  ;;  %v7362_v57 = vrot.slane %v852_v39, %v1321_v45  ;;  %v7364_v58 = vrot.slane %v852_v39, %v1433_v46  ;;  %v7366_v59 = vrot.slane %v852_v39, %v1545_v47 }
  0x25   : > { %865 = vperm.xlu0 %6918, %v5966_v20   ;;  %v7348_v51 = vrot.slane %v833_v42, %v7333_v41  ;;  %v7368_v60 = vrot.slane %v852_v39, %v1657_v48  ;;  %v7371_v62 = vrot.slane %v833_v42, %v7330_v40 }
  0x28   : > { %6941 = vperm.xlu1 %6924, %v6940_v23  }
  0x29   : > { %6936 = vperm.xlu0 %6918, %v6935_v27  }
  0x2c   : > { %6951 = vperm.xlu1 %6924, %v6950_v30  }
  0x2d   : > { %6946 = vperm.xlu0 %6918, %v6945_v31  }
  0x30   : > { %940 = vperm.xlu1 %6924, %v5995_v34  }
  0x31   : > { %6956 = vperm.xlu0 %6918, %v6955_v35  }
  0x9f   : > { %v6927_v52 = vpop.permute.xlu1 %6926 }
  0xa0   : > { %v7358_v55 = vunpack.i.h.bf16 %v6927_v52  ;;  %v7360_v56 = vunpack.i.l.bf16 %v6927_v52  ;;  %v6921_v61 = vpop.permute.xlu0 %6920 }
  0xa1   : > { %v7373_v63 = vunpack.i.h.bf16 %v6921_v61  ;;  %v7375_v1 = vunpack.i.l.bf16 %v6921_v61 }
  0xa2   : > { %v7379_v2 = vmul.f32 %v7360_v56, %v7342_v49  ;;  %v7383_v4 = vmul.f32 %v7360_v56, %v7345_v50  ;;  %v7387_v5 = vmul.f32 %v7358_v55, %v7342_v49  ;;  %v7393_v7 = vmul.f32 %v7360_v56, %v7352_v53 }
  0xa3   : > { %v6932_v3 = vpop.permute.xlu1 %6931  ;;  %v7397_v8 = vmul.f32 %v7358_v55, %v7352_v53  ;;  %v7401_v9 = vmul.f32 %v7360_v56, %v7356_v54  ;;  %v987_v12 = vmul.f32 %v7375_v1, %v7342_v49  ;;  %v988_v13 = vmul.f32 %v7373_v63, %v7342_v49 }
  0xa4   : > { %v7389_v6 = vunpack.i.h.bf16 %v6932_v3  ;;  %v7403_v10 = vunpack.i.l.bf16 %v6932_v3  ;;  %v7405_v11 = vpop.permute.xlu0 %865  ;;  %v1099_v14 = vmul.f32 %v7375_v1, %v7352_v53  ;;  %v9284_v15 = vrot.slane %v7379_v2, 1 }
  0xa5   : > { %v989_v16 = vmul.f32 %v7342_v49, %v7405_v11  ;;  %v7418_v17 = vmul.f32 %v7352_v53, %v7405_v11  ;;  %v7422_v18 = vmul.f32 %v7356_v54, %v7405_v11  ;;  %v947_v20 = vmul.f32 %v7375_v1, %v7345_v50 }
  0xa6   : > { %v1024_v21 = vrot.slane %v987_v12, 1  ;;  %v1025_v22 = vrot.slane %v988_v13, 1  ;;  %v1100_v23 = vmul.f32 %v7373_v63, %v7352_v53  ;;  %v949_v24 = vmul.f32 %v7345_v50, %v7405_v11 }
  0xa7   : > { %v6942_v19 = vpop.permute.xlu1 %6941  ;;  %v1027_v25 = vrot.slane %v989_v16, 1  ;;  %v7432_v26 = vmul.f32 %v7362_v57, %v7405_v11  ;;  %v948_v27 = vmul.f32 %v7373_v63, %v7345_v50  ;;  %v9283_v28 = vrot.slane %v7418_v17, 2 }
  0xa8   : > { %v6937_v29 = vpop.permute.xlu0 %6936  ;;  %v1026_v30 = vsel %vm1023_vm0, %v1024_v21, %v1025_v22  ;;  %v1136_v31 = vrot.slane %v1099_v14, 2  ;;  %v1137_v32 = vrot.slane %v1100_v23, 2  ;;  %v9292_v34 = vrot.slane %v7422_v18, 3 }
  0xa9   : > { %v1030_v33 = vsel %vm1023_vm0, %v1027_v25, %v9284_v15  ;;  %v7442_v35 = vunpack.i.h.bf16 %v6942_v19  ;;  %v1028_v36 = vsel %vm1023_vm0, %v1025_v22, %v1027_v25  ;;  %v7445_v38 = vunpack.i.l.bf16 %v6942_v19 }
  0xaa   : > { %v7447_v39 = vunpack.i.h.bf16 %v6937_v29  ;;  %v1077_v45 = vadd.f32 %v1026_v30, %v947_v20  ;;  %v1078_v46 = vadd.f32 %v1028_v36, %v948_v27  ;;  %v7449_v47 = vadd.f32 %v1030_v33, %v949_v24 }
  0xab   : > { %v6952_v42 = vpop.permute.xlu1 %6951  ;;  %v7451_v48 = vunpack.i.l.bf16 %v6937_v29  ;;  %v1138_v52 = vsel %vm1135_vm1, %v1136_v31, %v1137_v32  ;;  %v1211_v61 = vmul.f32 %v7375_v1, %v7356_v54  ;;  %v1140_v13 = vsel %vm1135_vm1, %v1137_v32, %v9283_v28 }
  0xac   : > { %v7456_v3 = vunpack.i.h.bf16 %v6952_v42  ;;  %v6947_v12 = vpop.permute.xlu0 %6946  ;;  %v1212_v14 = vmul.f32 %v7373_v63, %v7356_v54  ;;  %v1323_v16 = vmul.f32 %v7375_v1, %v7362_v57  ;;  %v7465_v19 = vunpack.i.l.bf16 %v6952_v42 }
  0xad   : > { %v1189_v20 = vadd.f32 %v1138_v52, %v1077_v45  ;;  %v1190_v21 = vadd.f32 %v1140_v13, %v1078_v46  ;;  %v1248_v22 = vrot.slane %v1211_v61, 3  ;;  %v7467_v23 = vunpack.i.h.bf16 %v6947_v12 }
  0xae   : > { %v7469_v24 = vunpack.i.l.bf16 %v6947_v12  ;;  %v1249_v27 = vrot.slane %v1212_v14, 3  ;;  %v1324_v29 = vmul.f32 %v7373_v63, %v7362_v57  ;;  %v1360_v33 = vrot.slane %v1323_v16, 4 }
  0xaf   : > { %v7471_v25 = vpop.permute.xlu1 %940  ;;  %v1435_v52 = vmul.f32 %v7375_v1, %v7364_v58  ;;  %v7520_v44 = vmul.f32 %v7364_v58, %v7405_v11 }
  0xb0   : > { %9313 = vst [vmem:[#allocation8_spill] sm:$0xff] %v7471_v25  ;;  %v7477_v30 = vmul.f32 %v7342_v49, %v7471_v25  ;;  %v7481_v31 = vmul.f32 %v7352_v53, %v7471_v25  ;;  %v7485_v32 = vmul.f32 %v7356_v54, %v7471_v25  ;;  %v964_v36 = vmul.f32 %v7345_v50, %v7471_v25  ;;  %v6957_v45 = vpop.permute.xlu0 %6956 }
  0xb1   : > { %v7491_v42 = vmul.f32 %v7362_v57, %v7471_v25  ;;  %v7499_v12 = vmul.f32 %v7364_v58, %v7471_v25  ;;  %v7503_v13 = vmul.f32 %v7366_v59, %v7471_v25  ;;  %v1250_v14 = vsel %vm1247_vm2, %v1248_v22, %v1249_v27 }
  0xb2   : > { %v9291_v61 = vrot.slane %v7477_v30, 1  ;;  %v9293_v16 = vrot.slane %v7481_v31, 2  ;;  %v7509_v0 = vunpack.i.h.bf16 %v6957_v45  ;;  %v1252_v15 = vsel %vm1247_vm2, %v1249_v27, %v9292_v34 }
  0xb3   : > { %v1301_v46 = vadd.f32 %v1250_v14, %v1189_v20  ;;  %v1361_v37 = vrot.slane %v1324_v29, 4  ;;  %v1302_v40 = vadd.f32 %v1252_v15, %v1190_v21  ;;  %v1436_v22 = vmul.f32 %v7373_v63, %v7364_v58 }
  0xb4   : > { %v1094_v28 = vadd.f32 %v9291_v61, %v964_v36  ;;  %v1472_v43 = vrot.slane %v1435_v52, 5  ;;  %v9314_v61 = vrot.slane %v7432_v26, 4  ;;  %v1547_v15 = vmul.f32 %v7375_v1, %v7366_v59 }
  0xb5   : > { %v1362_v36 = vsel %vm1359_vm3, %v1360_v33, %v1361_v37  ;;  %v1473_v29 = vrot.slane %v1436_v22, 5  ;;  %v1475_v14 = vrot.slane %v7520_v44, 5  ;;  %v7531_v34 = vunpack.i.l.bf16 %v6957_v45 }
  0xb6   : > { %v1206_v41 = vadd.f32 %v9293_v16, %v1094_v28  ;;  %v1364_v27 = vsel %vm1359_vm3, %v1361_v37, %v9314_v61  ;;  %v1413_v20 = vadd.f32 %v1362_v36, %v1301_v46  ;;  %v1548_v52 = vmul.f32 %v7373_v63, %v7366_v59 }
  0xb7   : > { %v1414_v21 = vadd.f32 %v1364_v27, %v1302_v40  ;;  %v7537_v28 = vmul.f32 %v7366_v59, %v7405_v11  ;;  %v1584_v33 = vrot.slane %v1547_v15, 6  ;;  %v1474_v37 = vsel %vm1471_vm4, %v1472_v43, %v1473_v29 }
  0xb8   : > { %v1476_v61 = vsel %vm1471_vm4, %v1473_v29, %v1475_v14  ;;  %v1659_v40 = vmul.f32 %v7375_v1, %v7368_v60  ;;  %v1660_v44 = vmul.f32 %v7373_v63, %v7368_v60  ;;  %v9315_v45 = vrot.slane %v7485_v32, 3 }
  0xb9   : > { %v1525_v22 = vadd.f32 %v1474_v37, %v1413_v20  ;;  %v1526_v36 = vadd.f32 %v1476_v61, %v1414_v21  ;;  %v1585_v27 = vrot.slane %v1548_v52, 6  ;;  %v1587_v16 = vrot.slane %v7537_v28, 6 }
  0xba   : > { %v7547_v46 = vadd.f32 %v9315_v45, %v1206_v41  ;;  %v7552_v43 = vmul.f32 %v7368_v60, %v7405_v11  ;;  %v1696_v15 = vrot.slane %v1659_v40, 7  ;;  %v1697_v29 = vrot.slane %v1660_v44, 7 }
  0xbb   : > { %v1586_v1 = vsel %vm1583_vm5, %v1584_v33, %v1585_v27  ;;  %v1031_v25 = vrot.slane %v7387_v5, 1  ;;  %v1141_v63 = vrot.slane %v7393_v7, 2  ;;  %v1143_v41 = vrot.slane %v7397_v8, 2 }
  0xbc   : > { %v1588_v20 = vsel %vm1583_vm5, %v1585_v27, %v1587_v16  ;;  %v1637_v21 = vadd.f32 %v1586_v1, %v1525_v22  ;;  %v1698_v52 = vsel %vm1695_vm6, %v1696_v15, %v1697_v29  ;;  %v1699_v28 = vrot.slane %v7552_v43, 7 }
  0xbd   : > { %v1638_v37 = vadd.f32 %v1588_v20, %v1526_v36  ;;  %v9316_v11 = vrot.slane %v7379_v2, 1  ;;  %v9317_v61 = vrot.slane %v7418_v17, 2  ;;  %v1144_v40 = vsel %vm1135_vm1, %v1141_v63, %v1143_v41 }
  0xbe   : > { %v1700_v44 = vsel %vm1695_vm6, %v1697_v29, %v1699_v28  ;;  %v1749_v45 = vadd.f32 %v1698_v52, %v1637_v21  ;;  %v7577_v2 = vmul.f32 %v7358_v55, %v7356_v54  ;;  %v1253_v17 = vrot.slane %v7401_v9, 3 }
  0xbf   : > { %v1032_v33 = vsel %vm1023_vm0, %v9316_v11, %v1031_v25  ;;  %v1142_v7 = vsel %vm1135_vm1, %v9317_v61, %v1141_v63  ;;  %v1750_v27 = vadd.f32 %v1700_v44, %v1638_v37  ;;  %v1326_v43 = vmul.f32 %v7360_v56, %v7362_v57 }
  0xc0   : > { %v1080_v22 = vadd.f32 %v1032_v33, %v7383_v4  ;;  %v1191_v36 = vadd.f32 %v1142_v7, %v7449_v47  ;;  %v1771_v15 = vmul.f32 %v7348_v51, %v1749_v45  ;;  %v7585_v29 = vmul.f32 %v7358_v55, %v7362_v57 }
  0xc1   : > { %v1438_v4 = vmul.f32 %v7360_v56, %v7364_v58  ;;  %v1772_v47 = vmul.f32 %v7348_v51, %v1750_v27  ;;  %v9318_v63 = vrot.slane %v7422_v18, 3  ;;  %v1255_v9 = vrot.slane %v7577_v2, 3 }
  0xc2   : > { %v1192_v1 = vadd.f32 %v1144_v40, %v1080_v22  ;;  %v1365_v21 = vrot.slane %v1326_v43, 4  ;;  %v1793_v52 = vadd.f32 %v7371_v62, %v1771_v15  ;;  %v1367_v11 = vrot.slane %v7585_v29, 4 }
  0xc3   : > { %v1254_v20 = vsel %vm1247_vm2, %v9318_v63, %v1253_v17  ;;  %v7598_v33 = vmul.f32 %v7358_v55, %v7364_v58  ;;  %v1794_v61 = vadd.f32 %v7371_v62, %v1772_v47  ;;  %v1256_v18 = vsel %vm1247_vm2, %v1253_v17, %v1255_v9 }
  0xc4   : > { %v1303_v37 = vadd.f32 %v1254_v20, %v1191_v36  ;;  %v9319_v7 = vrot.slane %v7432_v26, 4  ;;  %v1477_v44 = vrot.slane %v1438_v4, 5  ;;  %v1811_v45 = vmax.f32 %v1793_v52, 0.0 }
  0xc5   : > { %v1304_v22 = vadd.f32 %v1256_v18, %v1192_v1  ;;  %v1368_v36 = vsel %vm1359_vm3, %v1365_v21, %v1367_v11  ;;  %v1812_v43 = vmax.f32 %v1794_v61, 0.0  ;;  %v1479_v47 = vrot.slane %v7598_v33, 5 }
  0xc6   : > { %v1366_v40 = vsel %vm1359_vm3, %v9319_v7, %v1365_v21  ;;  %v1478_v15 = vsel %vm1471_vm4, %v1475_v14, %v1477_v44  ;;  %v1550_v17 = vmul.f32 %v7360_v56, %v7366_v59  ;;  %v7616_v4 = vmul.f32 %v7358_v55, %v7366_v59 }
  0xc7   : > { %v1415_v27 = vadd.f32 %v1366_v40, %v1303_v37  ;;  %v1416_v63 = vadd.f32 %v1368_v36, %v1304_v22  ;;  %v1662_v1 = vmul.f32 %v7360_v56, %v7368_v60  ;;  %v1850_v20 = vpack.c.bf16 %v1812_v43, %v1811_v45 }
  0xc8   : > { %v1480_v21 = vsel %vm1471_vm4, %v1477_v44, %v1479_v47  ;;  %v1589_v14 = vrot.slane %v1550_v17, 6  ;;  %v7625_v52 = vmul.f32 %v7358_v55, %v7368_v60  ;;  %v1591_v61 = vrot.slane %v7616_v4, 6 }
  0xc9   : > { %v1527_v26 = vadd.f32 %v1478_v15, %v1415_v27  ;;  %v1528_v37 = vadd.f32 %v1480_v21, %v1416_v63  ;;  %v1701_v18 = vrot.slane %v1662_v1, 7  ;;  %v951_v7 = vmul.f32 %v7358_v55, %v7345_v50  ;;  %1995 = vmatpush1.bf16.msra.mxu0 %v1850_v20 }
  0xca   : > { %v1590_v56 = vsel %vm1583_vm5, %v1587_v16, %v1589_v14  ;;  %v1703_v40 = vrot.slane %v7625_v52, 7  ;;  %v952_v44 = vmul.f32 %v7403_v10, %v7345_v50  ;;  %v992_v45 = vmul.f32 %v7403_v10, %v7342_v49 }
  0xcb   : > { %v9320_v22 = vmov 0   ;;  %v1592_v36 = vsel %vm1583_vm5, %v1589_v14, %v1591_v61  ;;  %v1639_v27 = vadd.f32 %v1590_v56, %v1527_v26  ;;  %v1702_v55 = vsel %vm1695_vm6, %v1699_v28, %v1701_v18 }
  0xcc   : > { %1996 = vmatprep.subr.bf16.mxu0 %v9320_v22  ;;  %v7643_v16 = vmul.f32 %v7389_v6, %v7342_v49  ;;  %v1640_v43 = vadd.f32 %v1592_v36, %v1528_v37  ;;  %v1704_v15 = vsel %vm1695_vm6, %v1701_v18, %v1703_v40  ;;  %v1033_v17 = vrot.slane %v992_v45, 1 }
  0xcd   : > { %v1104_v63 = vmul.f32 %v7403_v10, %v7352_v53  ;;  %v1751_v1 = vadd.f32 %v1702_v55, %v1639_v27  ;;  %v7653_v26 = vmul.f32 %v7389_v6, %v7352_v53  ;;  %v1216_v28 = vmul.f32 %v7403_v10, %v7356_v54 }
  0xce   : > { %v1035_v20 = vrot.slane %v7643_v16, 1  ;;  %v1752_v21 = vadd.f32 %v1704_v15, %v1640_v43  ;;  %v1034_v14 = vsel %vm1023_vm0, %v1031_v25, %v1033_v17  ;;  %v7662_v18 = vmul.f32 %v7389_v6, %v7356_v54 }
  0xcf   : > { %v1145_v37 = vrot.slane %v1104_v63, 2  ;;  %v1773_v56 = vmul.f32 %v7348_v51, %v1751_v1  ;;  %v1081_v36 = vadd.f32 %v1034_v14, %v951_v7  ;;  %v1147_v27 = vrot.slane %v7653_v26, 2 }
  0xd0   : > { %v1036_v45 = vsel %vm1023_vm0, %v1033_v17, %v1035_v20  ;;  %v1774_v55 = vmul.f32 %v7348_v51, %v1752_v21  ;;  %v1257_v25 = vrot.slane %v1216_v28, 3  ;;  %v1259_v17 = vrot.slane %v7662_v18, 3 }
  0xd1   : > { %v1082_v43 = vadd.f32 %v1036_v45, %v952_v44  ;;  %v1146_v5 = vsel %vm1135_vm1, %v1143_v41, %v1145_v37  ;;  %v1795_v15 = vadd.f32 %v7371_v62, %v1773_v56  ;;  %v1148_v63 = vsel %vm1135_vm1, %v1145_v37, %v1147_v27 }
  0xd2   : > { %v1193_v1 = vadd.f32 %v1146_v5, %v1081_v36  ;;  %v1796_v7 = vadd.f32 %v7371_v62, %v1774_v55  ;;  %v1258_v44 = vsel %vm1247_vm2, %v1255_v9, %v1257_v25  ;;  %v1328_v8 = vmul.f32 %v7403_v10, %v7362_v57 }
  0xd3   : > { %v1194_v14 = vadd.f32 %v1148_v63, %v1082_v43  ;;  %v1813_v41 = vmax.f32 %v1795_v15, 0.0  ;;  %v1260_v28 = vsel %vm1247_vm2, %v1257_v25, %v1259_v17  ;;  %v7689_v37 = vmul.f32 %v7389_v6, %v7362_v57 }
  0xd4   : > { %v1305_v21 = vadd.f32 %v1258_v44, %v1193_v1  ;;  %v1814_v56 = vmax.f32 %v1796_v7, 0.0  ;;  %v1369_v36 = vrot.slane %v1328_v8, 4  ;;  %v1440_v2 = vmul.f32 %v7403_v10, %v7364_v58 }
  0xd5   : > { %v1306_v45 = vadd.f32 %v1260_v28, %v1194_v14  ;;  %v1371_v9 = vrot.slane %v7689_v37, 4  ;;  %v7696_v55 = vmul.f32 %v7389_v6, %v7364_v58  ;;  %v1552_v43 = vmul.f32 %v7403_v10, %v7366_v59 }
  0xd6   : > { %v7702_v5 = vmul.f32 %v7389_v6, %v7366_v59  ;;  %v1851_v25 = vpack.c.bf16 %v1814_v56, %v1813_v41  ;;  %v1370_v15 = vsel %vm1359_vm3, %v1367_v11, %v1369_v36  ;;  %v1481_v63 = vrot.slane %v1440_v2, 5 }
  0xd7   : > { %v1664_v1 = vmul.f32 %v7403_v10, %v7368_v60  ;;  %v1372_v7 = vsel %vm1359_vm3, %v1369_v36, %v1371_v9  ;;  %v1417_v14 = vadd.f32 %v1370_v15, %v1305_v21  ;;  %v1483_v44 = vrot.slane %v7696_v55, 5 }
  0xd8   : > { %v1593_v8 = vrot.slane %v1552_v43, 6  ;;  %1997 = vmatpush1.bf16.msra.mxu0 %v1851_v25  ;;  %v1418_v28 = vadd.f32 %v1372_v7, %v1306_v45  ;;  %v1482_v29 = vsel %vm1471_vm4, %v1479_v47, %v1481_v63  ;;  %v1595_v11 = vrot.slane %v7702_v5, 6 }
  0xd9   : > { %v7719_v41 = vmul.f32 %v7389_v6, %v7368_v60  ;;  %1998 = vmatprep.subr.bf16.mxu0 %v9320_v22  ;;  %v1484_v10 = vsel %vm1471_vm4, %v1481_v63, %v1483_v44  ;;  %v1529_v21 = vadd.f32 %v1482_v29, %v1417_v14  ;;  %v1705_v33 = vrot.slane %v1664_v1, 7 }
  0xda   : > { %v1594_v56 = vsel %vm1583_vm5, %v1591_v61, %v1593_v8  ;;  %v1530_v45 = vadd.f32 %v1484_v10, %v1418_v28  ;;  %v1596_v47 = vsel %vm1583_vm5, %v1593_v8, %v1595_v11  ;;  %v953_v2 = vmul.f32 %v7389_v6, %v7345_v50 }
  0xdb   : > { %v1707_v36 = vrot.slane %v7719_v41, 7  ;;  %v1641_v43 = vadd.f32 %v1594_v56, %v1529_v21  ;;  %v1706_v25 = vsel %vm1695_vm6, %v1703_v40, %v1705_v33  ;;  %v954_v4 = vmul.f32 %v7451_v48, %v7345_v50 }
  0xdc   : > { %v994_v61 = vmul.f32 %v7451_v48, %v7342_v49  ;;  %v1642_v15 = vadd.f32 %v1596_v47, %v1530_v45  ;;  %v7746_v1 = vmul.f32 %v7447_v39, %v7342_v49  ;;  %v1106_v6 = vmul.f32 %v7451_v48, %v7352_v53 }
  0xdd   : > { %v1708_v63 = vsel %vm1695_vm6, %v1705_v33, %v1707_v36  ;;  %v1753_v52 = vadd.f32 %v1706_v25, %v1641_v43  ;;  %v7752_v7 = vmul.f32 %v7447_v39, %v7352_v53  ;;  %v1218_v14 = vmul.f32 %v7451_v48, %v7356_v54 }
  0xde   : > { %v1037_v40 = vrot.slane %v994_v61, 1  ;;  %v1754_v8 = vadd.f32 %v1708_v63, %v1642_v15  ;;  %v1039_v28 = vrot.slane %v7746_v1, 1  ;;  %v1149_v29 = vrot.slane %v1106_v6, 2 }
  0xdf   : > { %v7759_v10 = vmul.f32 %v7447_v39, %v7356_v54  ;;  %v1775_v21 = vmul.f32 %v7348_v51, %v1753_v52  ;;  %v1151_v33 = vrot.slane %v7752_v7, 2  ;;  %v1261_v45 = vrot.slane %v1218_v14, 3 }
  0xe0   : > { %v1038_v56 = vsel %vm1023_vm0, %v1035_v20, %v1037_v40  ;;  %v1776_v47 = vmul.f32 %v7348_v51, %v1754_v8  ;;  %v1040_v43 = vsel %vm1023_vm0, %v1037_v40, %v1039_v28  ;;  %v1150_v61 = vsel %vm1135_vm1, %v1147_v27, %v1149_v29 }
  0xe1   : > { %v1083_v25 = vadd.f32 %v1038_v56, %v953_v2  ;;  %v1797_v15 = vadd.f32 %v7371_v62, %v1775_v21  ;;  %v1084_v63 = vadd.f32 %v1040_v43, %v954_v4  ;;  %v1152_v16 = vsel %vm1135_vm1, %v1149_v29, %v1151_v33 }
  0xe2   : > { %v1262_v20 = vsel %vm1247_vm2, %v1259_v17, %v1261_v45  ;;  %v1798_v6 = vadd.f32 %v7371_v62, %v1776_v47  ;;  %v1263_v2 = vrot.slane %v7759_v10, 3  ;;  %v1330_v26 = vmul.f32 %v7451_v48, %v7362_v57 }
  0xe3   : > { %v1195_v52 = vadd.f32 %v1150_v61, %v1083_v25  ;;  %v1815_v27 = vmax.f32 %v1797_v15, 0.0  ;;  %v1196_v40 = vadd.f32 %v1152_v16, %v1084_v63  ;;  %v7786_v4 = vmul.f32 %v7447_v39, %v7362_v57 }
  0xe4   : > { %v1442_v14 = vmul.f32 %v7451_v48, %v7364_v58  ;;  %v1816_v18 = vmax.f32 %v1798_v6, 0.0  ;;  %v1264_v17 = vsel %vm1247_vm2, %v1261_v45, %v1263_v2  ;;  %v1373_v29 = vrot.slane %v1330_v26, 4 }
  0xe5   : > { %v1307_v8 = vadd.f32 %v1262_v20, %v1195_v52  ;;  %v1308_v21 = vadd.f32 %v1264_v17, %v1196_v40  ;;  %v1375_v56 = vrot.slane %v7786_v4, 4  ;;  %v7796_v47 = vmul.f32 %v7447_v39, %v7364_v58 }
  0xe6   : > { %v1485_v43 = vrot.slane %v1442_v14, 5  ;;  %v1852_v25 = vpack.c.bf16 %v1816_v18, %v1815_v27  ;;  %v1374_v61 = vsel %vm1359_vm3, %v1371_v9, %v1373_v29  ;;  %v1554_v15 = vmul.f32 %v7451_v48, %v7366_v59 }
  0xe7   : > { %v7805_v45 = vmul.f32 %v7447_v39, %v7366_v59  ;;  %v1376_v63 = vsel %vm1359_vm3, %v1373_v29, %v1375_v56  ;;  %v1419_v16 = vadd.f32 %v1374_v61, %v1307_v8  ;;  %v1487_v37 = vrot.slane %v7796_v47, 5 }
  0xe8   : > { %v1486_v20 = vsel %vm1471_vm4, %v1483_v44, %v1485_v43  ;;  %1999 = vmatpush1.bf16.msra.mxu0 %v1852_v25  ;;  %v1420_v9 = vadd.f32 %v1376_v63, %v1308_v21  ;;  %v1597_v6 = vrot.slane %v1554_v15, 6  ;;  %v1666_v26 = vmul.f32 %v7451_v48, %v7368_v60 }
  0xe9   : > { %v1599_v52 = vrot.slane %v7805_v45, 6  ;;  %2000 = vmatprep.subr.bf16.mxu0 %v9320_v22  ;;  %v1488_v27 = vsel %vm1471_vm4, %v1485_v43, %v1487_v37  ;;  %v1531_v40 = vadd.f32 %v1486_v20, %v1419_v16  ;;  %v7823_v55 = vmul.f32 %v7447_v39, %v7368_v60 }
  0xea   : > { %v955_v44 = vmul.f32 %v7447_v39, %v7345_v50  ;;  %v1532_v14 = vadd.f32 %v1488_v27, %v1420_v9  ;;  %v1598_v18 = vsel %vm1583_vm5, %v1595_v11, %v1597_v6  ;;  %v1709_v17 = vrot.slane %v1666_v26, 7 }
  0xeb   : > { %v1600_v48 = vsel %vm1583_vm5, %v1597_v6, %v1599_v52  ;;  %v1643_v8 = vadd.f32 %v1598_v18, %v1531_v40  ;;  %v1711_v29 = vrot.slane %v7823_v55, 7  ;;  %v956_v21 = vmul.f32 %v7445_v38, %v7345_v50 }
  0xec   : > { %v996_v43 = vmul.f32 %v7445_v38, %v7342_v49  ;;  %v1644_v39 = vadd.f32 %v1600_v48, %v1532_v14  ;;  %v1710_v5 = vsel %vm1695_vm6, %v1707_v36, %v1709_v17  ;;  %v7843_v11 = vmul.f32 %v7442_v35, %v7342_v49 }
  0xed   : > { %v1108_v25 = vmul.f32 %v7445_v38, %v7352_v53  ;;  %v1712_v61 = vsel %vm1695_vm6, %v1709_v17, %v1711_v29  ;;  %v1755_v15 = vadd.f32 %v1710_v5, %v1643_v8  ;;  %v7852_v16 = vmul.f32 %v7442_v35, %v7352_v53 }
  0xee   : > { %v1041_v63 = vrot.slane %v996_v43, 1  ;;  %v1756_v41 = vadd.f32 %v1712_v61, %v1644_v39  ;;  %v1043_v36 = vrot.slane %v7843_v11, 1  ;;  %v1220_v9 = vmul.f32 %v7445_v38, %v7356_v54 }
  0xef   : > { %v1153_v20 = vrot.slane %v1108_v25, 2  ;;  %v1777_v6 = vmul.f32 %v7348_v51, %v1755_v15  ;;  %v1155_v27 = vrot.slane %v7852_v16, 2  ;;  %v7864_v40 = vmul.f32 %v7442_v35, %v7356_v54 }
  0xf0   : > { %v1042_v26 = vsel %vm1023_vm0, %v1039_v28, %v1041_v63  ;;  %v1778_v14 = vmul.f32 %v7348_v51, %v1756_v41  ;;  %v1044_v18 = vsel %vm1023_vm0, %v1041_v63, %v1043_v36  ;;  %v1265_v43 = vrot.slane %v1220_v9, 3 }
  0xf1   : > { %v1085_v48 = vadd.f32 %v1042_v26, %v955_v44  ;;  %v1154_v17 = vsel %vm1135_vm1, %v1151_v33, %v1153_v20  ;;  %v1799_v1 = vadd.f32 %v7371_v62, %v1777_v6  ;;  %v1086_v28 = vadd.f32 %v1044_v18, %v956_v21 }
  0xf2   : > { %v1156_v8 = vsel %vm1135_vm1, %v1153_v20, %v1155_v27  ;;  %v1800_v39 = vadd.f32 %v7371_v62, %v1778_v14  ;;  %v1267_v25 = vrot.slane %v7864_v40, 3  ;;  %v1332_v44 = vmul.f32 %v7445_v38, %v7362_v57 }
  0xf3   : > { %v1197_v5 = vadd.f32 %v1154_v17, %v1085_v48  ;;  %v1817_v61 = vmax.f32 %v1799_v1, 0.0  ;;  %v1198_v7 = vadd.f32 %v1156_v8, %v1086_v28  ;;  %v1266_v33 = vsel %vm1247_vm2, %v1263_v2, %v1265_v43 }
  0xf4   : > { %v7886_v21 = vmul.f32 %v7442_v35, %v7362_v57  ;;  %v1818_v15 = vmax.f32 %v1800_v39, 0.0  ;;  %v1268_v63 = vsel %vm1247_vm2, %v1265_v43, %v1267_v25  ;;  %v1377_v20 = vrot.slane %v1332_v44, 4 }
  0xf5   : > { %v1309_v41 = vadd.f32 %v1266_v33, %v1197_v5  ;;  %v1310_v9 = vadd.f32 %v1268_v63, %v1198_v7  ;;  %v1444_v26 = vmul.f32 %v7445_v38, %v7364_v58  ;;  %v7896_v10 = vmul.f32 %v7442_v35, %v7364_v58 }
  0xf6   : > { %v1379_v6 = vrot.slane %v7886_v21, 4  ;;  %v1853_v2 = vpack.c.bf16 %v1818_v15, %v1817_v61  ;;  %v1378_v14 = vsel %vm1359_vm3, %v1375_v56, %v1377_v20  ;;  %v1556_v18 = vmul.f32 %v7445_v38, %v7366_v59 }
  0xf7   : > { %v7905_v48 = vmul.f32 %v7442_v35, %v7366_v59  ;;  %v1421_v1 = vadd.f32 %v1378_v14, %v1309_v41  ;;  %v1489_v28 = vrot.slane %v1444_v26, 5  ;;  %v1491_v8 = vrot.slane %v7896_v10, 5 }
  0xf8   : > { %v1380_v17 = vsel %vm1359_vm3, %v1377_v20, %v1379_v6  ;;  %2001 = vmatpush1.bf16.msra.mxu0 %v1853_v2  ;;  %v1601_v4 = vrot.slane %v1556_v18, 6  ;;  %v1668_v39 = vmul.f32 %v7445_v38, %v7368_v60  ;;  %v7923_v61 = vmul.f32 %v7442_v35, %v7368_v60 }
  0xf9   : > { %v1422_v43 = vadd.f32 %v1380_v17, %v1310_v9  ;;  %v1603_v56 = vrot.slane %v7905_v48, 6  ;;  %2002 = vmatprep.subr.bf16.mxu0 %v9320_v22  ;;  %v1490_v5 = vsel %vm1471_vm4, %v1487_v37, %v1489_v28  ;;  %v1492_v44 = vsel %vm1471_vm4, %v1489_v28, %v1491_v8 }
  0xfa   : > { %v957_v7 = vmul.f32 %v7442_v35, %v7345_v50  ;;  %v1533_v33 = vadd.f32 %v1490_v5, %v1421_v1  ;;  %v1602_v38 = vsel %vm1583_vm5, %v1599_v52, %v1601_v4  ;;  %v1713_v37 = vrot.slane %v1668_v39, 7 }
  0xfb   : > { %v1534_v15 = vadd.f32 %v1492_v44, %v1422_v43  ;;  %v1604_v47 = vsel %vm1583_vm5, %v1601_v4, %v1603_v56  ;;  %v1715_v63 = vrot.slane %v7923_v61, 7  ;;  %v958_v41 = vmul.f32 %v7469_v24, %v7345_v50 }
  0xfc   : > { %v998_v20 = vmul.f32 %v7469_v24, %v7342_v49  ;;  %v1645_v35 = vadd.f32 %v1602_v38, %v1533_v33  ;;  %v7940_v45 = vmul.f32 %v7467_v23, %v7342_v49  ;;  %v1110_v52 = vmul.f32 %v7469_v24, %v7352_v53 }
  0xfd   : > { %v1646_v9 = vadd.f32 %v1604_v47, %v1534_v15  ;;  %v1714_v26 = vsel %vm1695_vm6, %v1711_v29, %v1713_v37  ;;  %v1716_v2 = vsel %vm1695_vm6, %v1713_v37, %v1715_v63  ;;  %v7952_v18 = vmul.f32 %v7467_v23, %v7352_v53 }
  0xfe   : > { %v1045_v14 = vrot.slane %v998_v20, 1  ;;  %v1757_v17 = vadd.f32 %v1714_v26, %v1645_v35  ;;  %v1047_v28 = vrot.slane %v7940_v45, 1  ;;  %v1157_v43 = vrot.slane %v1110_v52, 2 }
  0xff   : > { %v1758_v1 = vadd.f32 %v1716_v2, %v1646_v9  ;;  %v1159_v29 = vrot.slane %v7952_v18, 2  ;;  %v1222_v4 = vmul.f32 %v7469_v24, %v7356_v54  ;;  %v7963_v39 = vmul.f32 %v7467_v23, %v7356_v54 }
 0x100   : > { %v1046_v55 = vsel %vm1023_vm0, %v1043_v36, %v1045_v14  ;;  %v1779_v5 = vmul.f32 %v7348_v51, %v1757_v17  ;;  %v1048_v33 = vsel %vm1023_vm0, %v1045_v14, %v1047_v28  ;;  %v1158_v36 = vsel %vm1135_vm1, %v1155_v27, %v1157_v43 }
 0x101   : > { %v1780_v44 = vmul.f32 %v7348_v51, %v1758_v1  ;;  %v1087_v11 = vadd.f32 %v1046_v55, %v957_v7  ;;  %v1088_v15 = vadd.f32 %v1048_v33, %v958_v41  ;;  %v1160_v38 = vsel %vm1135_vm1, %v1157_v43, %v1159_v29 }
 0x102   : > { %v1269_v47 = vrot.slane %v1222_v4, 3  ;;  %v1801_v37 = vadd.f32 %v7371_v62, %v1779_v5  ;;  %v1271_v9 = vrot.slane %v7963_v39, 3  ;;  %v1334_v16 = vmul.f32 %v7469_v24, %v7362_v57 }
 0x103   : > { %v1802_v20 = vadd.f32 %v7371_v62, %v1780_v44  ;;  %v1199_v35 = vadd.f32 %v1158_v36, %v1087_v11  ;;  %v1200_v52 = vadd.f32 %v1160_v38, %v1088_v15  ;;  %v7986_v27 = vmul.f32 %v7467_v23, %v7362_v57 }
 0x104   : > { %v1270_v7 = vsel %vm1247_vm2, %v1267_v25, %v1269_v47  ;;  %v1819_v41 = vmax.f32 %v1801_v37, 0.0  ;;  %v1272_v2 = vsel %vm1247_vm2, %v1269_v47, %v1271_v9  ;;  %v1381_v1 = vrot.slane %v1334_v16, 4 }
 0x105   : > { %v1820_v26 = vmax.f32 %v1802_v20, 0.0  ;;  %v1311_v14 = vadd.f32 %v1270_v7, %v1199_v35  ;;  %v1312_v17 = vadd.f32 %v1272_v2, %v1200_v52  ;;  %v1383_v40 = vrot.slane %v7986_v27, 4 }
 0x106   : > { %v1446_v25 = vmul.f32 %v7469_v24, %v7364_v58  ;;  %v7996_v55 = vmul.f32 %v7467_v23, %v7364_v58  ;;  %v1558_v4 = vmul.f32 %v7469_v24, %v7366_v59  ;;  %v8002_v5 = vmul.f32 %v7467_v23, %v7366_v59 }
 0x107   : > { %v1854_v43 = vpack.c.bf16 %v1820_v26, %v1819_v41  ;;  %v1382_v44 = vsel %vm1359_vm3, %v1379_v6, %v1381_v1  ;;  %v1384_v33 = vsel %vm1359_vm3, %v1381_v1, %v1383_v40  ;;  %v1670_v15 = vmul.f32 %v7469_v24, %v7368_v60 }
 0x108   : > { %v1493_v11 = vrot.slane %v1446_v25, 5  ;;  %v1423_v36 = vadd.f32 %v1382_v44, %v1311_v14  ;;  %v1424_v38 = vadd.f32 %v1384_v33, %v1312_v17  ;;  %v1495_v47 = vrot.slane %v7996_v55, 5 }
 0x109   : > { %2003 = vmatpush1.bf16.msra.mxu0 %v1854_v43  ;;  %v1605_v37 = vrot.slane %v1558_v4, 6  ;;  %v1607_v6 = vrot.slane %v8002_v5, 6  ;;  %v8020_v20 = vmul.f32 %v7467_v23, %v7368_v60  ;;  %v1717_v35 = vrot.slane %v1670_v15, 7 }
 0x10a   : > { %2004 = vmatprep.subr.bf16.mxu0 %v9320_v22  ;;  %v1494_v21 = vsel %vm1471_vm4, %v1491_v8, %v1493_v11  ;;  %v1496_v24 = vsel %vm1471_vm4, %v1493_v11, %v1495_v47  ;;  %v959_v10 = vmul.f32 %v7467_v23, %v7345_v50  ;;  %v960_v48 = vmul.f32 %v7465_v19, %v7345_v50 }
 0x10b   : > { %v1535_v52 = vadd.f32 %v1494_v21, %v1423_v36  ;;  %v1606_v7 = vsel %vm1583_vm5, %v1603_v56, %v1605_v37  ;;  %v1536_v8 = vadd.f32 %v1496_v24, %v1424_v38  ;;  %v1608_v16 = vsel %vm1583_vm5, %v1605_v37, %v1607_v6 }
 0x10c   : > { %v1718_v41 = vsel %vm1695_vm6, %v1715_v63, %v1717_v35  ;;  %v1719_v26 = vrot.slane %v8020_v20, 7  ;;  %v1000_v56 = vmul.f32 %v7465_v19, %v7342_v49  ;;  %v8043_v23 = vmul.f32 %v7456_v3, %v7342_v49 }
 0x10d   : > { %v1647_v2 = vadd.f32 %v1606_v7, %v1535_v52  ;;  %v1648_v14 = vadd.f32 %v1608_v16, %v1536_v8  ;;  %v1112_v63 = vmul.f32 %v7465_v19, %v7352_v53  ;;  %v8052_v17 = vmul.f32 %v7456_v3, %v7352_v53 }
 0x10e   : > { %v1720_v61 = vsel %vm1695_vm6, %v1717_v35, %v1719_v26  ;;  %v1049_v25 = vrot.slane %v1000_v56, 1  ;;  %v1051_v43 = vrot.slane %v8043_v23, 1  ;;  %v1224_v4 = vmul.f32 %v7465_v19, %v7356_v54 }
 0x10f   : > { %v1759_v1 = vadd.f32 %v1718_v41, %v1647_v2  ;;  %v1760_v44 = vadd.f32 %v1720_v61, %v1648_v14  ;;  %v1161_v33 = vrot.slane %v1112_v63, 2  ;;  %v1163_v11 = vrot.slane %v8052_v17, 2 }
 0x110   : > { %v8060_v15 = vmul.f32 %v7456_v3, %v7356_v54  ;;  %v1050_v38 = vsel %vm1023_vm0, %v1047_v28, %v1049_v25  ;;  %v1052_v37 = vsel %vm1023_vm0, %v1049_v25, %v1051_v43  ;;  %v1273_v21 = vrot.slane %v1224_v4, 3 }
 0x111   : > { %v1781_v36 = vmul.f32 %v7348_v51, %v1759_v1  ;;  %v1782_v35 = vmul.f32 %v7348_v51, %v1760_v44  ;;  %v1089_v24 = vadd.f32 %v1050_v38, %v959_v10  ;;  %v1090_v52 = vadd.f32 %v1052_v37, %v960_v48 }
 0x112   : > { %v1162_v7 = vsel %vm1135_vm1, %v1159_v29, %v1161_v33  ;;  %v1164_v45 = vsel %vm1135_vm1, %v1161_v33, %v1163_v11  ;;  %v1274_v28 = vsel %vm1247_vm2, %v1271_v9, %v1273_v21  ;;  %v1275_v16 = vrot.slane %v8060_v15, 3 }
 0x113   : > { %v1803_v8 = vadd.f32 %v7371_v62, %v1781_v36  ;;  %v1804_v41 = vadd.f32 %v7371_v62, %v1782_v35  ;;  %v1201_v10 = vadd.f32 %v1162_v7, %v1089_v24  ;;  %v1202_v2 = vadd.f32 %v1164_v45, %v1090_v52 }
 0x114   : > { %v1336_v18 = vmul.f32 %v7465_v19, %v7362_v57  ;;  %v1276_v48 = vsel %vm1247_vm2, %v1273_v21, %v1275_v16  ;;  %v8089_v56 = vmul.f32 %v7456_v3, %v7362_v57  ;;  %v1448_v39 = vmul.f32 %v7465_v19, %v7364_v58 }
 0x115   : > { %v1821_v29 = vmax.f32 %v1803_v8, 0.0  ;;  %v1822_v9 = vmax.f32 %v1804_v41, 0.0  ;;  %v1313_v14 = vadd.f32 %v1274_v28, %v1201_v10  ;;  %v1314_v61 = vadd.f32 %v1276_v48, %v1202_v2 }
 0x116   : > { %v1385_v63 = vrot.slane %v1336_v18, 4  ;;  %v1387_v1 = vrot.slane %v8089_v56, 4  ;;  %v8096_v25 = vmul.f32 %v7456_v3, %v7364_v58  ;;  %v1497_v4 = vrot.slane %v1448_v39, 5 }
 0x117   : > { %v1560_v44 = vmul.f32 %v7465_v19, %v7366_v59  ;;  %v1855_v33 = vpack.c.bf16 %v1822_v9, %v1821_v29  ;;  %v8105_v38 = vmul.f32 %v7456_v3, %v7366_v59  ;;  %v1672_v37 = vmul.f32 %v7465_v19, %v7368_v60 }
 0x118   : > { %v1386_v36 = vsel %vm1359_vm3, %v1383_v40, %v1385_v63  ;;  %v1388_v21 = vsel %vm1359_vm3, %v1385_v63, %v1387_v1  ;;  %v1498_v24 = vsel %vm1471_vm4, %v1495_v47, %v1497_v4  ;;  %v1499_v27 = vrot.slane %v8096_v25, 5 }
 0x119   : > { %v1425_v35 = vadd.f32 %v1386_v36, %v1313_v14  ;;  %2005 = vmatpush1.bf16.msra.mxu0 %v1855_v33  ;;  %v1426_v40 = vadd.f32 %v1388_v21, %v1314_v61  ;;  %v1609_v52 = vrot.slane %v1560_v44, 6  ;;  %v1611_v7 = vrot.slane %v8105_v38, 6 }
 0x11a   : > { %v8119_v8 = vmul.f32 %v7456_v3, %v7368_v60  ;;  %2006 = vmatprep.subr.bf16.mxu0 %v9320_v22  ;;  %v1500_v19 = vsel %vm1471_vm4, %v1497_v4, %v1499_v27  ;;  %v1721_v45 = vrot.slane %v1672_v37, 7  ;;  %v961_v47 = vmul.f32 %v7456_v3, %v7345_v50 }
 0x11b   : > { %v1537_v55 = vadd.f32 %v1498_v24, %v1425_v35  ;;  %v1538_v28 = vadd.f32 %v1500_v19, %v1426_v40  ;;  %v1610_v41 = vsel %vm1583_vm5, %v1607_v6, %v1609_v52  ;;  %v1612_v10 = vsel %vm1583_vm5, %v1609_v52, %v1611_v7 }
 0x11c   : > { %v1723_v2 = vrot.slane %v8119_v8, 7  ;;  %v1722_v29 = vsel %vm1695_vm6, %v1719_v26, %v1721_v45  ;;  %v962_v48 = vmul.f32 %v7531_v34, %v7345_v50  ;;  %v1002_v3 = vmul.f32 %v7531_v34, %v7342_v49 }
 0x11d   : > { %v1649_v18 = vadd.f32 %v1610_v41, %v1537_v55  ;;  %v1650_v5 = vadd.f32 %v1612_v10, %v1538_v28  ;;  %v8146_v39 = vmul.f32 %v7509_v0, %v7342_v49  ;;  %v1114_v20 = vmul.f32 %v7531_v34, %v7352_v53 }
 0x11e   : > { %v1724_v6 = vsel %vm1695_vm6, %v1721_v45, %v1723_v2  ;;  %v1053_v26 = vrot.slane %v1002_v3, 1  ;;  %v8152_v14 = vmul.f32 %v7509_v0, %v7352_v53  ;;  %v1226_v61 = vmul.f32 %v7531_v34, %v7356_v54 }
 0x11f   : > { %v1761_v9 = vadd.f32 %v1722_v29, %v1649_v18  ;;  %v1762_v63 = vadd.f32 %v1724_v6, %v1650_v5  ;;  %v1055_v4 = vrot.slane %v8146_v39, 1  ;;  %v1165_v44 = vrot.slane %v1114_v20, 2 }
 0x120   : > { %v8159_v49 = vmul.f32 %v7509_v0, %v7356_v54  ;;  %v1054_v36 = vsel %vm1023_vm0, %v1051_v43, %v1053_v26  ;;  %v1167_v53 = vrot.slane %v8152_v14, 2  ;;  %v1277_v37 = vrot.slane %v1226_v61, 3 }
 0x121   : > { %v1783_v33 = vmul.f32 %v7348_v51, %v1761_v9  ;;  %v1784_v21 = vmul.f32 %v7348_v51, %v1762_v63  ;;  %v1056_v35 = vsel %vm1023_vm0, %v1053_v26, %v1055_v4  ;;  %v1091_v24 = vadd.f32 %v1054_v36, %v961_v47 }
 0x122   : > { %v1166_v40 = vsel %vm1135_vm1, %v1163_v11, %v1165_v44  ;;  %v1092_v52 = vadd.f32 %v1056_v35, %v962_v48  ;;  %v1168_v19 = vsel %vm1135_vm1, %v1165_v44, %v1167_v53  ;;  %v1278_v23 = vsel %vm1247_vm2, %v1275_v16, %v1277_v37 }
 0x123   : > { %v1805_v54 = vadd.f32 %v7371_v62, %v1783_v33  ;;  %v1806_v43 = vadd.f32 %v7371_v62, %v1784_v21  ;;  %v1203_v55 = vadd.f32 %v1166_v40, %v1091_v24  ;;  %v1279_v45 = vrot.slane %v8159_v49, 3 }
 0x124   : > { %v1338_v47 = vmul.f32 %v7531_v34, %v7362_v57  ;;  %v1204_v28 = vadd.f32 %v1168_v19, %v1092_v52  ;;  %v1339_v11 = vmul.f32 %v7509_v0, %v7362_v57  ;;  %v1450_v41 = vmul.f32 %v7531_v34, %v7364_v58 }
 0x125   : > { %v1823_v17 = vmax.f32 %v1805_v54, 0.0  ;;  %v1824_v10 = vmax.f32 %v1806_v43, 0.0  ;;  %v1280_v15 = vsel %vm1247_vm2, %v1277_v37, %v1279_v45  ;;  %v1315_v16 = vadd.f32 %v1278_v23, %v1203_v55 }
 0x126   : > { %v1389_v18 = vrot.slane %v1338_v47, 4  ;;  %v1316_v29 = vadd.f32 %v1280_v15, %v1204_v28  ;;  %v1391_v48 = vrot.slane %v1339_v11, 4  ;;  %v1451_v3 = vmul.f32 %v7509_v0, %v7364_v58 }
 0x127   : > { %v1501_v5 = vrot.slane %v1450_v41, 5  ;;  %v1856_v6 = vpack.c.bf16 %v1824_v10, %v1823_v17  ;;  %v1562_v57 = vmul.f32 %v7531_v34, %v7366_v59  ;;  %v1563_v20 = vmul.f32 %v7509_v0, %v7366_v59  ;;  %v9325_v17 = vld [vmem:[#allocation8_spill] sm:$0xff] }
 0x128   : > { %v1390_v39 = vsel %vm1359_vm3, %v1387_v1, %v1389_v18  ;;  %v1392_v9 = vsel %vm1359_vm3, %v1389_v18, %v1391_v48  ;;  %v1503_v58 = vrot.slane %v1451_v3, 5  ;;  %v1674_v1 = vmul.f32 %v7531_v34, %v7368_v60 }
 0x129   : > { %v1427_v26 = vadd.f32 %v1390_v39, %v1315_v16  ;;  %v1502_v14 = vsel %vm1471_vm4, %v1499_v27, %v1501_v5  ;;  %2007 = vmatpush1.bf16.msra.mxu0 %v1856_v6  ;;  %v1428_v61 = vadd.f32 %v1392_v9, %v1316_v29  ;;  %v1613_v63 = vrot.slane %v1562_v57, 6 }
 0x12a   : > { %v1615_v56 = vrot.slane %v1563_v20, 6  ;;  %v9321_v44 = vrot.slane %v7491_v42, 4  ;;  %2008 = vmatprep.subr.bf16.mxu0 %v9320_v22  ;;  %v1504_v59 = vsel %vm1471_vm4, %v1501_v5, %v1503_v58  ;;  %v1675_v25 = vmul.f32 %v7509_v0, %v7368_v60 }
 0x12b   : > { %v1539_v33 = vadd.f32 %v1502_v14, %v1427_v26  ;;  %v1540_v27 = vadd.f32 %v1504_v59, %v1428_v61  ;;  %v1614_v36 = vsel %vm1583_vm5, %v1611_v7, %v1613_v63  ;;  %v1725_v37 = vrot.slane %v1674_v1, 7  ;;  %v6966_v59 = vld [vmem:[%s9269_s11 + $0x24] ss:$8 sps:$4 sm:$0xff]  }
 0x12c   : > { %v1430_v49 = vadd.f32 %v9321_v44, %v7547_v46  ;;  %v963_v34 = vmul.f32 %v7509_v0, %v7345_v50  ;;  %v1616_v21 = vsel %vm1583_vm5, %v1613_v63, %v1615_v56  ;;  %v1727_v35 = vrot.slane %v1675_v25, 7  ;;  %v6962_v0 = vld [vmem:[%s9269_s11 + $0x4] ss:$8 sps:$4 sm:$0xff]   ;;  %v6969_v25 = vld [vmem:[%s9269_s11 + $0x34] ss:$8 sps:$4 sm:$0xff]  }
 0x12d   : > { %v1651_v46 = vadd.f32 %v1614_v36, %v1539_v33  ;;  %v9322_v24 = vrot.slane %v7477_v30, 1  ;;  %v1505_v54 = vrot.slane %v7499_v12, 5  ;;  %v1652_v52 = vadd.f32 %v1616_v21, %v1540_v27  ;;  %5742 = vmatprep.mubr.msk.bf16.mxu0 %vm1955_vm7, %v6962_v0  ;;  %v6968_v33 = vld [vmem:[%s9269_s11 + $0x20] ss:$8 sps:$4 sm:$0xff]   ;;  %v6971_v27 = vld [vmem:[%s9269_s11 + $0x30] ss:$8 sps:$4 sm:$0xff]  }
 0x12e   : > { %v1726_v38 = vsel %vm1695_vm6, %v1723_v2, %v1725_v37  ;;  %v1728_v50 = vsel %vm1695_vm6, %v1725_v37, %v1727_v35  ;;  %v9323_v23 = vrot.slane %v7481_v31, 2  ;;  %v9324_v2 = vrot.slane %v7485_v32, 3  ;;  %v6972_v36 = vld [vmem:[%s9269_s11 + $0x44] ss:$8 sps:$4 sm:$0xff]   ;;  %v6974_v37 = vld [vmem:[%s9269_s11 + $0x40] ss:$8 sps:$4 sm:$0xff]  }
 0x12f   : > { %v1058_v40 = vsel %vm1023_vm0, %v1055_v4, %v9322_v24  ;;  %v1763_v19 = vadd.f32 %v1726_v38, %v1651_v46  ;;  %v1617_v4 = vrot.slane %v7503_v13, 6  ;;  %v1764_v12 = vadd.f32 %v1728_v50, %v1652_v52  ;;  %v6977_v21 = vld [vmem:[%s9269_s11 + $0x50] ss:$8 sps:$4 sm:$0xff]   ;;  %v6978_v46 = vld [vmem:[%s9269_s11 + $0x64] ss:$8 sps:$4 sm:$0xff]  }
 0x130   : > { %v1093_v7 = vadd.f32 %v1058_v40, %v963_v34  ;;  %v1170_v30 = vsel %vm1135_vm1, %v1167_v53, %v9323_v23  ;;  %v1542_v55 = vadd.f32 %v1505_v54, %v1430_v49  ;;  %v1282_v47 = vsel %vm1247_vm2, %v1279_v45, %v9324_v2  ;;  %v6960_v49 = vld [vmem:[%s9269_s11] ss:$8 sps:$4 sm:$0xff]   ;;  %v6975_v34 = vld [vmem:[%s9269_s11 + $0x54] ss:$8 sps:$4 sm:$0xff]   ;;  %v6983_v40 = vld [vmem:[%s9269_s11 + $0x70] ss:$8 sps:$4 sm:$0xff]  }
 0x131   : > { %v1785_v8 = vmul.f32 %v7348_v51, %v1763_v19  ;;  %v1676_v28 = vmul.f32 %v7368_v60, %v9325_v17  ;;  %v1786_v11 = vmul.f32 %v7348_v51, %v1764_v12  ;;  %v9326_v53 = vmov %v9321_v44  ;;  %v6981_v24 = vld [vmem:[%s9269_s11 + $0x74] ss:$8 sps:$4 sm:$0xff]   ;;  %v6986_v52 = vld [vmem:[%s9269_s11 + $0x80] ss:$8 sps:$4 sm:$0xff]   ;;  %v6989_v0 = vld [vmem:[%s9269_s11 + $0x90] ss:$8 sps:$4 sm:$0xff]  }
 0x132   : > { %v1205_v43 = vadd.f32 %v1170_v30, %v1093_v7  ;;  %v1654_v41 = vadd.f32 %v1617_v4, %v1542_v55  ;;  %v1394_v10 = vsel %vm1359_vm3, %v1391_v48, %v9326_v53  ;;  %v1506_v60 = vsel %vm1471_vm4, %v1503_v58, %v1505_v54  ;;  %v6984_v54 = vld [vmem:[%s9269_s11 + $0x84] ss:$8 sps:$4 sm:$0xff]   ;;  %v6987_v38 = vld [vmem:[%s9269_s11 + $0x94] ss:$8 sps:$4 sm:$0xff]  }
 0x133   : > { %v1807_v13 = vadd.f32 %v7371_v62, %v1785_v8  ;;  %v1729_v15 = vrot.slane %v1676_v28, 7  ;;  %v1808_v32 = vadd.f32 %v7371_v62, %v1786_v11  ;;  %v1618_v5 = vsel %vm1583_vm5, %v1615_v56, %v1617_v4  ;;  %v1849_v7 = vld [vmem:[%s9269_s11 + $0xa0] sm:$0x33]  ;;  %v6992_v23 = vld [vmem:[%s7290_s24 + $0x10] sm:$0xff]   ;;  %v6993_v4 = vld [vmem:[%s7290_s24 + $0x18] sm:$0xff]  }
 0x134   : > { %v1317_v31 = vadd.f32 %v1282_v47, %v1205_v43  ;;  %v7148_v14 = vmov 65535   ;;  %v5741_v50 = vcombine.high %v1849_v7, %v1849_v7  ;;  %v5740_v19 = vcombine.low %v1849_v7, %v1849_v7 }
 0x135   : > { %v1825_v16 = vmax.f32 %v1807_v13, 0.0  ;;  %v1766_v18 = vadd.f32 %v1729_v15, %v1654_v41  ;;  %v1826_v29 = vmax.f32 %v1808_v32, 0.0  ;;  %v1730_v42 = vsel %vm1695_vm6, %v1727_v35, %v1729_v15  ;;  %v6980_v35 = vld [vmem:[%s9269_s11 + $0x60] ss:$8 sps:$4 sm:$0xff]  }
 0x136   : > { %v1429_v45 = vadd.f32 %v1394_v10, %v1317_v31  ;;  %v1989_v58 = vsel %vm1359_vm3, 4294967295, %v7148_v14  ;;  %v7149_v30 = vmov 0.0   ;;  %vm4394_vm4 = vcmask 367616  }
 0x137   : > { %v1857_v6 = vpack.c.bf16 %v1826_v29, %v1825_v16  ;;  %v1788_v57 = vmul.f32 %v7348_v51, %v1766_v18  ;;  %v1990_v56 = vsel %vm1247_vm2, %v1989_v58, 0  ;;  %6172 = vmatprep.subr.bf16.mxu1 %v7149_v30  ;;  %6176 = vmatprep.mubr.msk.bf16.mxu1 %vm7150_vm8, %v7149_v30 }
 0x138   : > { %v1541_v3 = vadd.f32 %v1506_v60, %v1429_v45  ;;  %6173 = vmatpush3.bf16.msra.mxu1 %v6992_v23 }
 0x139   : > { %2009 = vmatpush1.bf16.msra.mxu0 %v1857_v6  ;;  %v1810_v9 = vadd.f32 %v7371_v62, %v1788_v57  ;;  %6174 = vmatprep.subr.bf16.mxu1 %v7149_v30 }
 0x13a   : > { %v1653_v39 = vadd.f32 %v1618_v5, %v1541_v3  ;;  %2010 = vmatprep.subr.bf16.mxu0 %v9320_v22 }
 0x13b   : > { %v1828_v63 = vmax.f32 %v1810_v9, 0.0 }
 0x13c   : > { %v1765_v48 = vadd.f32 %v1730_v42, %v1653_v39  ;;  %6175 = vmatpush3.bf16.msra.mxu1 %v6993_v4 }
 0x13d   : > { %6196 = vmatprep.subr.bf16.mxu1 %v7149_v30 }
 0x13e   : > { %v1787_v20 = vmul.f32 %v7348_v51, %v1765_v48  ;;  %v6963_v51 = vld [vmem:[%s9269_s11 + $0x14] ss:$8 sps:$4 sm:$0xff]  }
 0x140   : > { %v1809_v26 = vadd.f32 %v7371_v62, %v1787_v20  ;;  %v6965_v62 = vld [vmem:[%s9269_s11 + $0x10] ss:$8 sps:$4 sm:$0xff]  }
 0x142   : > { %v1827_v61 = vmax.f32 %v1809_v26, 0.0 }
 0x144   : > { %v1858_v1 = vpack.c.bf16 %v1828_v63, %v1827_v61 }
 0x146   : > { %v1992_v44 = vand.u32 %v1990_v56, %v1858_v1 }
 0x148   : > { %2011 = vmatpush1.bf16.msra.mxu0 %v1992_v44 }
 0x149   : > { %6364 = vmatprep.subr.bf16.mxu0 %v7149_v30 }
 0x14b   : > { %2027 = vmatmul.mubr.bf16.vlgmr.msra.gmra.mrb[0].mxu0 %v6960_v49 }
 0x14c   : > { %5743 = vmatprep.mubr.msk.bf16.mxu0 %vm1955_vm7, %v6963_v51 }
 0x153   : > { %2035 = vmatmul.mubr.bf16.gmra.mrb[4].mxu0 %v6965_v62 }
 0x154   : > { %5744 = vmatprep.mubr.msk.bf16.mxu0 %vm1955_vm7, %v6966_v59 }
 0x15b   : > { %2043 = vmatmul.mubr.bf16.gmra.mrb[8].mxu0 %v6968_v33 }
 0x15c   : > { %5745 = vmatprep.mubr.msk.bf16.mxu0 %vm1955_vm7, %v6969_v25 }
 0x163   : > { %2051 = vmatmul.mubr.bf16.gmra.mrb[12].mxu0 %v6971_v27 }
 0x164   : > { %5746 = vmatprep.mubr.msk.bf16.mxu0 %vm1955_vm7, %v6972_v36 }
 0x16b   : > { %2059 = vmatmul.mubr.bf16.gmra.mrb[16].mxu0 %v6974_v37 }
 0x16c   : > { %5747 = vmatprep.mubr.msk.bf16.mxu0 %vm1955_vm7, %v6975_v34 }
 0x173   : > { %2067 = vmatmul.mubr.bf16.gmra.mrb[20].mxu0 %v6977_v21 }
 0x174   : > { %5748 = vmatprep.mubr.msk.bf16.mxu0 %vm1955_vm7, %v6978_v46 }
 0x17b   : > { %2075 = vmatmul.mubr.bf16.gmra.mrb[24].mxu0 %v6980_v35 }
 0x17c   : > { %5749 = vmatprep.mubr.msk.bf16.mxu0 %vm1955_vm7, %v6981_v24 }
 0x183   : > { %2083 = vmatmul.mubr.bf16.gmra.mrb[28].mxu0 %v6983_v40 }
 0x184   : > { %5750 = vmatprep.mubr.msk.bf16.mxu0 %vm1955_vm7, %v6984_v54 }
 0x18b   : > { %2091 = vmatmul.mubr.bf16.gmra.mrb[32].mxu0 %v6986_v52 }
 0x18c   : > { %5751 = vmatprep.mubr.msk.bf16.mxu0 %vm1955_vm7, %v6987_v38 }
 0x193   : > { %2099 = vmatmul.mubr.bf16.gmra.mrb[36].mxu0 %v6989_v0 }
 0x194   : > { %5752 = vmatprep.mubr.msk.bf16.mxu0 %vm1955_vm7, %v5741_v50  ;;  %vm4896_vm7 = vcmask 521220  }
 0x19b   : > { %2107 = vmatmul.mubr.bf16.gmra.mrb[40].mxu0 %v5740_v19 }
 0x19c   : > { %6374 = vmatprep.mubr.msk.bf16.mxu0 %vm7150_vm8, %v7149_v30 }
 0x21e   : > { %v2028_v12 = vpop.f32.mrb[0].mxu0 }
 0x21f   : > { %v2030_v43 = vpop.f32.mrb[1].mxu0 }
 0x220   : > { %v2031_v55 = vpop.f32.mrb[2].mxu0 }
 0x221   : > { %v2033_v8 = vpop.f32.mrb[3].mxu0 }
 0x226   : > { %v2036_v2 = vpop.f32.mrb[4].mxu0 }
 0x227   : > { %v2038_v47 = vpop.f32.mrb[5].mxu0 }
 0x228   : > { %v2039_v17 = vpop.f32.mrb[6].mxu0 }
 0x229   : > { %v2041_v28 = vpop.f32.mrb[7].mxu0 }
 0x22e   : > { %v8332_v11 = vpop.f32.mrb[8].mxu0 }
 0x22f   : > { %v2046_v31 = vpop.f32.mrb[9].mxu0 }
 0x230   : > { %v8334_v41 = vpop.f32.mrb[10].mxu0 }
 0x231   : > { %v2049_v13 = vpop.f32.mrb[11].mxu0 }
 0x236   : > { %v8336_v53 = vpop.f32.mrb[12].mxu0 }
 0x237   : > { %v2054_v10 = vpop.f32.mrb[13].mxu0 }
 0x238   : > { %v8338_v15 = vpop.f32.mrb[14].mxu0 }
 0x239   : > { %v2057_v32 = vpop.f32.mrb[15].mxu0 }
 0x23e   : > { %v8340_v45 = vpop.f32.mrb[16].mxu0 }
 0x23f   : > { %v2062_v16 = vpop.f32.mrb[17].mxu0 }
 0x240   : > { %v8342_v60 = vpop.f32.mrb[18].mxu0 }
 0x241   : > { %v2065_v18 = vpop.f32.mrb[19].mxu0 }
 0x246   : > { %v8344_v29 = vpop.f32.mrb[20].mxu0 }
 0x247   : > { %v2070_v3 = vpop.f32.mrb[21].mxu0  ;;  %v2125_v6 = vrot.slane %v8344_v29, 2 }
 0x248   : > { %v2071_v5 = vpop.f32.mrb[22].mxu0  ;;  %v6994_v3 = vld [vmem:[%s7290_s24] sm:$0xff]  }
 0x249   : > { %v2126_v39 = vrot.slane %v2071_v5, 2  ;;  %v2073_v57 = vpop.f32.mrb[23].mxu0 }
 0x24b   : > { %v2127_v42 = vsel %vm1135_vm1, %v2125_v6, %v2126_v39 }
 0x24c   : > { %v2157_v48 = vmax.f32 %v2028_v12, %v2127_v42 }
 0x24e   : > { %v2076_v20 = vpop.f32.mrb[24].mxu0 }
 0x24f   : > { %v2128_v9 = vrot.slane %v2076_v20, 2  ;;  %v2078_v26 = vpop.f32.mrb[25].mxu0 }
 0x250   : > { %v2079_v58 = vpop.f32.mrb[26].mxu0 }
 0x251   : > { %v2129_v61 = vsel %vm1135_vm1, %v2126_v39, %v2128_v9  ;;  %v2130_v63 = vrot.slane %v2079_v58, 2  ;;  %v2081_v56 = vpop.f32.mrb[27].mxu0 }
 0x252   : > { %v2158_v1 = vmax.f32 %v2031_v55, %v2129_v61 }
 0x253   : > { %v2131_v44 = vsel %vm1135_vm1, %v2128_v9, %v2130_v63 }
 0x254   : > { %v8350_v49 = vpack.c.bf16 %v2158_v1, %v2157_v48  ;;  %v2159_v51 = vmax.f32 %v2036_v2, %v2131_v44 }
 0x256   : > { %v2084_v62 = vpop.f32.mrb[28].mxu0  ;;  %v2209_v59 = vshrl.u32 %v8350_v49, 16  ;;  %v2211_v33 = vshll.u32 %v8350_v49, 16  ;;  %v2449_v43 = vrot.slane %v8350_v49, 1  ;;  %v2699_v55 = vrot.slane %v8350_v49, 2 }
 0x257   : > { %v2132_v25 = vrot.slane %v2084_v62, 2  ;;  %v2086_v27 = vpop.f32.mrb[29].mxu0  ;;  %v2950_v10 = vrot.slane %v8350_v49, 3 }
 0x258   : > { %v2087_v36 = vpop.f32.mrb[30].mxu0  ;;  %v2569_v37 = vrot.slane %v2209_v59, 1  ;;  %v2570_v34 = vrot.slane %v2211_v33, 2  ;;  %v2819_v21 = vrot.slane %v2209_v59, 2  ;;  %v2820_v40 = vrot.slane %v2211_v33, 3 }
 0x259   : > { %v2133_v46 = vsel %vm1135_vm1, %v2130_v63, %v2132_v25  ;;  %v2134_v35 = vrot.slane %v2087_v36, 2  ;;  %v2089_v24 = vpop.f32.mrb[31].mxu0  ;;  %v3072_v54 = vrot.slane %v2209_v59, 3  ;;  %v3073_v7 = vrot.slane %v2211_v33, 4 }
 0x25a   : > { %v2160_v52 = vmax.f32 %v2039_v17, %v2133_v46  ;;  %v2571_v38 = vor.u32 %v2570_v34, %v2569_v37  ;;  %v2213_v50 = vrot.slane %v2211_v33, 1  ;;  %v2821_v19 = vor.u32 %v2820_v40, %v2819_v21 }
 0x25b   : > { %v2135_v0 = vsel %vm1135_vm1, %v2132_v25, %v2134_v35  ;;  %v8359_v12 = vor.u32 %v3073_v7, %v3072_v54 }
 0x25c   : > { %v8356_v23 = vpack.c.bf16 %v2160_v52, %v2159_v51  ;;  %v2161_v4 = vmax.f32 %v8332_v11, %v2135_v0  ;;  %v2214_v13 = vor.u32 %v2213_v50, %v2209_v59 }
 0x25e   : > { %v2092_v8 = vpop.f32.mrb[32].mxu0  ;;  %v2216_v2 = vshll.u32 %v8356_v23, 16  ;;  %v2220_v47 = vshrl.u32 %v8356_v23, 16  ;;  %v2450_v17 = vrot.slane %v8356_v23, 1  ;;  %v2700_v28 = vrot.slane %v8356_v23, 2 }
 0x25f   : > { %v2136_v11 = vrot.slane %v2092_v8, 2  ;;  %v2094_v31 = vpop.f32.mrb[33].mxu0  ;;  %v2951_v32 = vrot.slane %v8356_v23, 3 }
 0x260   : > { %v2095_v16 = vpop.f32.mrb[34].mxu0  ;;  %v2218_v18 = vrot.slane %v2216_v2, 1  ;;  %v8371_v5 = vsel %vm1023_vm0, %v2449_v43, %v2450_v17  ;;  %v2572_v6 = vrot.slane %v2220_v47, 1  ;;  %v2573_v39 = vrot.slane %v2216_v2, 2 }
 0x261   : > { %v2137_v57 = vsel %vm1135_vm1, %v2134_v35, %v2136_v11  ;;  %v2138_v42 = vrot.slane %v2095_v16, 2  ;;  %v2097_v48 = vpop.f32.mrb[35].mxu0  ;;  %v8375_v20 = vsel %vm1135_vm1, %v2699_v55, %v2700_v28  ;;  %v2822_v9 = vrot.slane %v2220_v47, 2 }
 0x262   : > { %v2162_v26 = vmax.f32 %v8334_v41, %v2137_v57  ;;  %v2219_v58 = vsel %vm2207_vm9, %v2214_v13, %v2218_v18  ;;  %v2574_v61 = vor.u32 %v2573_v39, %v2572_v6  ;;  %v2823_v56 = vrot.slane %v2216_v2, 3  ;;  %v6995_v41 = vld [vmem:[%s7290_s24 + $0x8] sm:$0xff]  }
 0x263   : > { %v2139_v63 = vsel %vm1135_vm1, %v2136_v11, %v2138_v42  ;;  %6177 = vmatmul.mubr.msk.bf16.vlgmr.msra.gmra.mrb[0].mxu1 %vm2259_vm10, %v2219_v58  ;;  %v8382_v1 = vsel %vm1247_vm2, %v2950_v10, %v2951_v32  ;;  %v3075_v44 = vrot.slane %v2220_v47, 3  ;;  %v3076_v33 = vrot.slane %v2216_v2, 4 }
 0x264   : > { %v8384_v51 = vpack.c.bf16 %v2162_v26, %v2161_v4  ;;  %v2163_v62 = vmax.f32 %v8336_v53, %v2139_v63  ;;  %6180 = vmatprep.mubr.msk.bf16.mxu1 %vm7150_vm8, %v7149_v30  ;;  %6197 = vmatpush3.bf16.msra.mxu1 %v6994_v3  ;;  %v8391_v59 = vsel %vm2568_vm11, %v2571_v38, %v2574_v61 }
 0x265   : > { %v2222_v25 = vor.u32 %v2220_v47, %v2218_v18  ;;  %6198 = vmatprep.subr.bf16.mxu1 %v7149_v30  ;;  %v2824_v27 = vor.u32 %v2823_v56, %v2822_v9  ;;  %v3077_v54 = vor.u32 %v3076_v33, %v3075_v44 }
 0x266   : > { %v2100_v36 = vpop.f32.mrb[36].mxu0  ;;  %v2224_v37 = vshll.u32 %v8384_v51, 16  ;;  %v2228_v34 = vshrl.u32 %v8384_v51, 16  ;;  %v2452_v53 = vrot.slane %v8384_v51, 1  ;;  %v2702_v21 = vrot.slane %v8384_v51, 2 }
 0x267   : > { %v2140_v46 = vrot.slane %v2100_v36, 2  ;;  %v2102_v35 = vpop.f32.mrb[37].mxu0  ;;  %v8399_v24 = vsel %vm2818_vm12, %v2821_v19, %v2824_v27  ;;  %v2953_v40 = vrot.slane %v8384_v51, 3  ;;  %v8419_v10 = vsel %vm3071_vm13, %v8359_v12, %v3077_v54 }
 0x268   : > { %v2103_v52 = vpop.f32.mrb[38].mxu0  ;;  %v2226_v38 = vrot.slane %v2224_v37, 1  ;;  %6199 = vmatpush3.bf16.msra.mxu1 %v6995_v41  ;;  %v8403_v7 = vsel %vm1023_vm0, %v2450_v17, %v2452_v53  ;;  %v2576_v0 = vrot.slane %v2228_v34, 1  ;;  %v2577_v50 = vrot.slane %v2224_v37, 2 }
 0x269   : > { %v2141_v4 = vsel %vm1135_vm1, %v2138_v42, %v2140_v46  ;;  %v2142_v43 = vrot.slane %v2103_v52, 2  ;;  %v2105_v55 = vpop.f32.mrb[39].mxu0  ;;  %6220 = vmatprep.subr.bf16.mxu1 %v7149_v30  ;;  %v8408_v19 = vsel %vm1135_vm1, %v2700_v28, %v2702_v21  ;;  %v2826_v8 = vrot.slane %v2228_v34, 2 }
 0x26a   : > { %v2164_v2 = vmax.f32 %v8338_v15, %v2141_v4  ;;  %v2227_v47 = vsel %vm2207_vm9, %v2222_v25, %v2226_v38  ;;  %v2578_v11 = vor.u32 %v2577_v50, %v2576_v0  ;;  %v2827_v31 = vrot.slane %v2224_v37, 3 }
 0x26b   : > { %v2143_v17 = vsel %vm1135_vm1, %v2140_v46, %v2142_v43  ;;  %6181 = vmatmul.mubr.msk.bf16.gmra.mrb[4].mxu1 %vm2259_vm10, %v2227_v47  ;;  %v8415_v13 = vsel %vm1247_vm2, %v2951_v32, %v2953_v40  ;;  %v3079_v18 = vrot.slane %v2228_v34, 3  ;;  %v2230_v3 = vor.u32 %v2228_v34, %v2226_v38 }
 0x26c   : > { %v8421_v28 = vpack.c.bf16 %v2164_v2, %v2163_v62  ;;  %v2165_v16 = vmax.f32 %v8340_v45, %v2143_v17  ;;  %6184 = vmatprep.mubr.msk.bf16.mxu1 %vm7150_vm8, %v7149_v30  ;;  %v8427_v15 = vsel %vm2568_vm11, %v2574_v61, %v2578_v11  ;;  %v2828_v6 = vor.u32 %v2827_v31, %v2826_v8 }
 0x26d   : > { %v3080_v39 = vrot.slane %v2224_v37, 4 }
 0x26e   : > { %v2108_v32 = vpop.f32.mrb[40].mxu0  ;;  %v2232_v57 = vshll.u32 %v8421_v28, 16  ;;  %v2236_v12 = vshrl.u32 %v8421_v28, 16  ;;  %v2454_v42 = vrot.slane %v8421_v28, 1  ;;  %v2704_v48 = vrot.slane %v8421_v28, 2 }
 0x26f   : > { %v2144_v45 = vrot.slane %v2108_v32, 2  ;;  %v2110_v9 = vpop.f32.mrb[41].mxu0  ;;  %v8434_v26 = vsel %vm2818_vm12, %v2824_v27, %v2828_v6  ;;  %v2955_v58 = vrot.slane %v8421_v28, 3  ;;  %v3081_v61 = vor.u32 %v3080_v39, %v3079_v18 }
 0x270   : > { %v2111_v63 = vpop.f32.mrb[42].mxu0  ;;  %v2234_v56 = vrot.slane %v2232_v57, 1  ;;  %v8438_v44 = vsel %vm1023_vm0, %v2452_v53, %v2454_v42  ;;  %v2580_v62 = vrot.slane %v2236_v12, 1  ;;  %v2581_v41 = vrot.slane %v2232_v57, 2 }
 0x271   : > { %v2145_v33 = vsel %vm1135_vm1, %v2142_v43, %v2144_v45  ;;  %v2167_v25 = vmax.f32 %v8344_v29, %v2144_v45  ;;  %v2112_v36 = vpop.f32.mrb[43].mxu0  ;;  %v8443_v37 = vsel %vm1135_vm1, %v2702_v21, %v2704_v48  ;;  %v2830_v27 = vrot.slane %v2236_v12, 2 }
 0x272   : > { %v2166_v34 = vmax.f32 %v8342_v60, %v2145_v33  ;;  %v2235_v46 = vsel %vm2207_vm9, %v2230_v3, %v2234_v56  ;;  %v2238_v35 = vor.u32 %v2236_v12, %v2234_v56  ;;  %v2582_v52 = vor.u32 %v2581_v41, %v2580_v62 }
 0x273   : > { %v2173_v38 = vpack.c.bf16 %v2167_v25, %v2167_v25  ;;  %6185 = vmatmul.mubr.msk.bf16.gmra.mrb[8].mxu1 %vm2259_vm10, %v2235_v46  ;;  %v2831_v53 = vrot.slane %v2232_v57, 3  ;;  %v8449_v0 = vsel %vm1247_vm2, %v2953_v40, %v2955_v58  ;;  %v8452_v29 = vsel %vm3071_vm13, %v3077_v54, %v3081_v61 }
 0x274   : > { %v8454_v50 = vpack.c.bf16 %v2166_v34, %v2165_v16  ;;  %6188 = vmatprep.mubr.msk.bf16.mxu1 %vm7150_vm8, %v7149_v30  ;;  %v8459_v60 = vsel %vm2568_vm11, %v2578_v11, %v2582_v52  ;;  %v3083_v21 = vrot.slane %v2236_v12, 3  ;;  %v3084_v4 = vrot.slane %v2232_v57, 4 }
 0x275   : > { %v2959_v43 = vrot.slane %v2173_v38, 3  ;;  %v3092_v55 = vshrl.u32 %v2173_v38, 16  ;;  %v3095_v8 = vshll.u32 %v2173_v38, 16  ;;  %v2832_v2 = vor.u32 %v2831_v53, %v2830_v27 }
 0x276   : > { %v2240_v40 = vshll.u32 %v8454_v50, 16  ;;  %v2244_v47 = vshrl.u32 %v8454_v50, 16  ;;  %v2456_v54 = vrot.slane %v8454_v50, 1  ;;  %v2706_v17 = vrot.slane %v8454_v50, 2 }
 0x277   : > { %v3094_v31 = vrot.slane %v3092_v55, 3  ;;  %v3097_v16 = vrot.slane %v3095_v8, 4  ;;  %v8466_v18 = vsel %vm2818_vm12, %v2828_v6, %v2832_v2  ;;  %v2957_v11 = vrot.slane %v8454_v50, 3 }
 0x278   : > { %v2242_v3 = vrot.slane %v2240_v40, 1  ;;  %v2457_v39 = vsel %vm1023_vm0, %v2454_v42, %v2456_v54  ;;  %v2584_v32 = vrot.slane %v2244_v47, 1  ;;  %v2585_v57 = vrot.slane %v2240_v40, 2 }
 0x279   : > { %v8475_v12 = vsel %vm1135_vm1, %v2704_v48, %v2706_v17  ;;  %v2834_v45 = vrot.slane %v2244_v47, 2  ;;  %v2835_v9 = vrot.slane %v2240_v40, 3  ;;  %v8478_v63 = vsel %vm1247_vm2, %v2955_v58, %v2957_v11 }
 0x27a   : > { %v2243_v6 = vsel %vm2207_vm9, %v2238_v35, %v2242_v3  ;;  %v8481_v56 = vor.u32 %v2585_v57, %v2584_v32  ;;  %v8484_v62 = vsel %vm1247_vm2, %v2957_v11, %v2959_v43  ;;  %v3085_v41 = vor.u32 %v3084_v4, %v3083_v21 }
 0x27b   : > { %6189 = vmatmul.mubr.msk.bf16.gmra.mrb[12].mxu1 %vm2259_vm10, %v2243_v6  ;;  %v8487_v42 = vor.u32 %v2835_v9, %v2834_v45  ;;  %v3087_v48 = vrot.slane %v2244_v47, 3  ;;  %v3088_v33 = vrot.slane %v2240_v40, 4  ;;  %v3098_v25 = vor.u32 %v3097_v16, %v3094_v31 }
 0x27c   : > { %6192 = vmatprep.mubr.msk.bf16.mxu1 %vm7150_vm8, %v7149_v30  ;;  %v2587_v58 = vsel %vm2568_vm11, %v2582_v52, %v8481_v56  ;;  %v8498_v27 = vsel %vm3071_vm13, %v3081_v61, %v3085_v41  ;;  %v2246_v38 = vor.u32 %v2244_v47, %v2242_v3  ;;  %v6996_v52 = vld [vmem:[%s7290_s24 + $0x20] sm:$0xff]   ;;  %v6997_v61 = vld [vmem:[%s7290_s24 + $0x28] sm:$0xff]  }
 0x27d   : > { %v8495_v36 = vsel %vm2818_vm12, %v2832_v2, %v8487_v42  ;;  %v3089_v34 = vor.u32 %v3088_v33, %v3087_v48 }
 0x27f   : > { %v8501_v46 = vsel %vm3071_vm13, %v3085_v41, %v3089_v34  ;;  %v8504_v35 = vsel %vm3071_vm13, %v3089_v34, %v3098_v25 }
 0x283   : > { %6193 = vmatmul.mubr.msk.bf16.gmra.mrb[16].mxu1 %vm2259_vm10, %v2246_v38 }
 0x284   : > { %6200 = vmatprep.mubr.msk.bf16.mxu1 %vm7150_vm8, %v7149_v30 }
 0x28b   : > { %6201 = vmatmul.mubr.msk.bf16.vlgmr.msra.gmra.mrb[0].mxu1 %vm2259_vm10, %v8350_v49  ;;  %v6998_v49 = vld [vmem:[%s7290_s24 + $0x30] sm:$0xff]  }
 0x28c   : > { %6204 = vmatprep.mubr.msk.bf16.mxu1 %vm7150_vm8, %v7149_v30  ;;  %6221 = vmatpush3.bf16.msra.mxu1 %v6996_v52 }
 0x28d   : > { %6222 = vmatprep.subr.bf16.mxu1 %v7149_v30 }
 0x290   : > { %6223 = vmatpush3.bf16.msra.mxu1 %v6997_v61 }
 0x291   : > { %6244 = vmatprep.subr.bf16.mxu1 %v7149_v30 }
 0x293   : > { %6205 = vmatmul.mubr.msk.bf16.gmra.mrb[4].mxu1 %vm2259_vm10, %v8356_v23  ;;  %v6999_v23 = vld [vmem:[%s7290_s24 + $0x38] sm:$0xff]  }
 0x294   : > { %6208 = vmatprep.mubr.msk.bf16.mxu1 %vm7150_vm8, %v7149_v30 }
 0x29b   : > { %6209 = vmatmul.mubr.msk.bf16.gmra.mrb[8].mxu1 %vm2259_vm10, %v8384_v51  ;;  %v7001_v51 = vld [vmem:[%s7290_s24 + $0x48] sm:$0xff]  }
 0x29c   : > { %6212 = vmatprep.mubr.msk.bf16.mxu1 %vm7150_vm8, %v7149_v30 }
 0x2a3   : > { %6213 = vmatmul.mubr.msk.bf16.gmra.mrb[12].mxu1 %vm2259_vm10, %v8421_v28  ;;  %v7007_v28 = vld [vmem:[%s7290_s24 + $0x78] sm:$0xff]  }
 0x2a4   : > { %6216 = vmatprep.mubr.msk.bf16.mxu1 %vm7150_vm8, %v7149_v30 }
 0x2ab   : > { %6217 = vmatmul.mubr.msk.bf16.gmra.mrb[16].mxu1 %vm2259_vm10, %v8454_v50 }
 0x2ac   : > { %6224 = vmatprep.mubr.msk.bf16.mxu1 %vm7150_vm8, %v7149_v30 }
 0x2b3   : > { %6225 = vmatmul.mubr.msk.bf16.vlgmr.msra.gmra.mrb[0].mxu1 %vm2259_vm10, %v8371_v5  ;;  %v7000_v5 = vld [vmem:[%s7290_s24 + $0x40] sm:$0xff]  }
 0x2b4   : > { %6228 = vmatprep.mubr.msk.bf16.mxu1 %vm7150_vm8, %v7149_v30  ;;  %6245 = vmatpush3.bf16.msra.mxu1 %v6998_v49 }
 0x2b5   : > { %6246 = vmatprep.subr.bf16.mxu1 %v7149_v30 }
 0x2b8   : > { %6247 = vmatpush3.bf16.msra.mxu1 %v6999_v23 }
 0x2b9   : > { %6268 = vmatprep.subr.bf16.mxu1 %v7149_v30 }
 0x2bb   : > { %6229 = vmatmul.mubr.msk.bf16.gmra.mrb[4].mxu1 %vm2259_vm10, %v8403_v7  ;;  %v7003_v7 = vld [vmem:[%s7290_s24 + $0x58] sm:$0xff]  }
 0x2bc   : > { %6232 = vmatprep.mubr.msk.bf16.mxu1 %vm7150_vm8, %v7149_v30 }
 0x2c3   : > { %6233 = vmatmul.mubr.msk.bf16.gmra.mrb[8].mxu1 %vm2259_vm10, %v8438_v44 }
 0x2c4   : > { %6236 = vmatprep.mubr.msk.bf16.mxu1 %vm7150_vm8, %v7149_v30 }
 0x2cb   : > { %6237 = vmatmul.mubr.msk.bf16.gmra.mrb[12].mxu1 %vm2259_vm10, %v2457_v39 }
 0x2cc   : > { %6240 = vmatprep.mubr.msk.bf16.mxu1 %vm7150_vm8, %v7149_v30 }
 0x2d3   : > { %6241 = vmatmul.mubr.msk.bf16.gmra.mrb[16].mxu1 %vm2259_vm10, %v2456_v54 }
 0x2d4   : > { %6248 = vmatprep.mubr.msk.bf16.mxu1 %vm7150_vm8, %v7149_v30 }
 0x2db   : > { %6249 = vmatmul.mubr.msk.bf16.vlgmr.msra.gmra.mrb[0].mxu1 %vm2259_vm10, %v8391_v59  ;;  %v7002_v59 = vld [vmem:[%s7290_s24 + $0x50] sm:$0xff]  }
 0x2dc   : > { %6252 = vmatprep.mubr.msk.bf16.mxu1 %vm7150_vm8, %v7149_v30  ;;  %6269 = vmatpush3.bf16.msra.mxu1 %v7000_v5 }
 0x2dd   : > { %6270 = vmatprep.subr.bf16.mxu1 %v7149_v30 }
 0x2e0   : > { %6271 = vmatpush3.bf16.msra.mxu1 %v7001_v51 }
 0x2e1   : > { %6292 = vmatprep.subr.bf16.mxu1 %v7149_v30 }
 0x2e3   : > { %6253 = vmatmul.mubr.msk.bf16.gmra.mrb[4].mxu1 %vm2259_vm10, %v8427_v15  ;;  %v9328_v15 = vld [vmem:[#allocation6_spill] sm:$0xff] }
 0x2e4   : > { %6256 = vmatprep.mubr.msk.bf16.mxu1 %vm7150_vm8, %v7149_v30 }
 0x2eb   : > { %6257 = vmatmul.mubr.msk.bf16.gmra.mrb[8].mxu1 %vm2259_vm10, %v8459_v60 }
 0x2ec   : > { %6260 = vmatprep.mubr.msk.bf16.mxu1 %vm7150_vm8, %v7149_v30 }
 0x2f3   : > { %6261 = vmatmul.mubr.msk.bf16.gmra.mrb[12].mxu1 %vm2259_vm10, %v2587_v58 }
 0x2f4   : > { %6264 = vmatprep.mubr.msk.bf16.mxu1 %vm7150_vm8, %v7149_v30 }
 0x2fb   : > { %6265 = vmatmul.mubr.msk.bf16.gmra.mrb[16].mxu1 %vm2259_vm10, %v8481_v56 }
 0x2fc   : > { %6272 = vmatprep.mubr.msk.bf16.mxu1 %vm7150_vm8, %v7149_v30 }
 0x303   : > { %6273 = vmatmul.mubr.msk.bf16.vlgmr.msra.gmra.mrb[0].mxu1 %vm2259_vm10, %v8375_v20  ;;  %v7004_v20 = vld [vmem:[%s7290_s24 + $0x60] sm:$0xff]  }
 0x304   : > { %6276 = vmatprep.mubr.msk.bf16.mxu1 %vm7150_vm8, %v7149_v30  ;;  %6293 = vmatpush3.bf16.msra.mxu1 %v7002_v59 }
 0x305   : > { %6294 = vmatprep.subr.bf16.mxu1 %v7149_v30 }
 0x308   : > { %6295 = vmatpush3.bf16.msra.mxu1 %v7003_v7  ;;  %v3321_v7 = vsel %vm1247_vm2, 4294967295, %v7148_v14  ;;  %v7009_v14 = vld [vmem:[%s9270_s12 + $0x8] sm:$0xff]  }
 0x309   : > { %6316 = vmatprep.subr.bf16.mxu1 %v7149_v30 }
 0x30b   : > { %6277 = vmatmul.mubr.msk.bf16.gmra.mrb[4].mxu1 %vm2259_vm10, %v8408_v19  ;;  %v7005_v19 = vld [vmem:[%s7290_s24 + $0x68] sm:$0xff]  }
 0x30c   : > { %6280 = vmatprep.mubr.msk.bf16.mxu1 %vm7150_vm8, %v7149_v30 }
 0x313   : > { %6281 = vmatmul.mubr.msk.bf16.gmra.mrb[8].mxu1 %vm2259_vm10, %v8443_v37 }
 0x314   : > { %6284 = vmatprep.mubr.msk.bf16.mxu1 %vm7150_vm8, %v7149_v30 }
 0x31b   : > { %6285 = vmatmul.mubr.msk.bf16.gmra.mrb[12].mxu1 %vm2259_vm10, %v8475_v12 }
 0x31c   : > { %6288 = vmatprep.mubr.msk.bf16.mxu1 %vm7150_vm8, %v7149_v30 }
 0x323   : > { %6289 = vmatmul.mubr.msk.bf16.gmra.mrb[16].mxu1 %vm2259_vm10, %v2706_v17 }
 0x324   : > { %6296 = vmatprep.mubr.msk.bf16.mxu1 %vm7150_vm8, %v7149_v30 }
 0x32b   : > { %6297 = vmatmul.mubr.msk.bf16.vlgmr.msra.gmra.mrb[0].mxu1 %vm2259_vm10, %v8399_v24  ;;  %v7006_v24 = vld [vmem:[%s7290_s24 + $0x70] sm:$0xff]   ;;  %s805_s24 = scalar_lea.vmem %s9275_s17, %s6886_s22 }
 0x32c   : > { %6300 = vmatprep.mubr.msk.bf16.mxu1 %vm7150_vm8, %v7149_v30  ;;  %6317 = vmatpush3.bf16.msra.mxu1 %v7004_v20 }
 0x32d   : > { %6318 = vmatprep.subr.bf16.mxu1 %v7149_v30 }
 0x330   : > { %6319 = vmatpush3.bf16.msra.mxu1 %v7005_v19 }
 0x331   : > { %6340 = vmatprep.subr.bf16.mxu1 %v7149_v30 }
 0x333   : > { %6301 = vmatmul.mubr.msk.bf16.gmra.mrb[4].mxu1 %vm2259_vm10, %v8434_v26 }
 0x334   : > { %6304 = vmatprep.mubr.msk.bf16.mxu1 %vm7150_vm8, %v7149_v30 }
 0x33b   : > { %6305 = vmatmul.mubr.msk.bf16.gmra.mrb[8].mxu1 %vm2259_vm10, %v8466_v18 }
 0x33c   : > { %6308 = vmatprep.mubr.msk.bf16.mxu1 %vm7150_vm8, %v7149_v30 }
 0x343   : > { %6309 = vmatmul.mubr.msk.bf16.gmra.mrb[12].mxu1 %vm2259_vm10, %v8495_v36 }
 0x344   : > { %6312 = vmatprep.mubr.msk.bf16.mxu1 %vm7150_vm8, %v7149_v30 }
 0x34b   : > { %6313 = vmatmul.mubr.msk.bf16.gmra.mrb[16].mxu1 %vm2259_vm10, %v8487_v42 }
 0x34c   : > { %6320 = vmatprep.mubr.msk.bf16.mxu1 %vm7150_vm8, %v7149_v30 }
 0x353   : > { %6321 = vmatmul.mubr.msk.bf16.vlgmr.msra.gmra.mrb[0].mxu1 %vm2259_vm10, %v8382_v1  ;;  %v2206_v1 = vld [vmem:[%s769_s2] sm:$0x3]  ;;  %s788_s2 = scalar_lea.vmem %s9266_s8, %s5705_s0 }
 0x354   : > { %6324 = vmatprep.mubr.msk.bf16.mxu1 %vm7150_vm8, %v7149_v30  ;;  %6341 = vmatpush3.bf16.msra.mxu1 %v7006_v24  ;;  %v8681_v26 = vrot.slane %v2206_v1, %v9328_v15 }
 0x355   : > { %6342 = vmatprep.subr.bf16.mxu1 %v7149_v30 }
 0x358   : > { %6343 = vmatpush3.bf16.msra.mxu1 %v7007_v28  ;;  %v3322_v28 = vsel %vm1135_vm1, %v3321_v7, 0 }
 0x359   : > { %6646 = vmatprep.subr.bf16.mxu1 %v7149_v30 }
 0x35b   : > { %6325 = vmatmul.mubr.msk.bf16.gmra.mrb[4].mxu1 %vm2259_vm10, %v8415_v13  ;;  %v9327_v13 = vld [vmem:[#allocation7_spill] sm:$0xff] }
 0x35c   : > { %6328 = vmatprep.mubr.msk.bf16.mxu1 %vm7150_vm8, %v7149_v30 }
 0x363   : > { %6329 = vmatmul.mubr.msk.bf16.gmra.mrb[8].mxu1 %vm2259_vm10, %v8449_v0 }
 0x364   : > { %6332 = vmatprep.mubr.msk.bf16.mxu1 %vm7150_vm8, %v7149_v30 }
 0x36b   : > { %6333 = vmatmul.mubr.msk.bf16.gmra.mrb[12].mxu1 %vm2259_vm10, %v8478_v63 }
 0x36c   : > { %6336 = vmatprep.mubr.msk.bf16.mxu1 %vm7150_vm8, %v7149_v30 }
 0x373   : > { %6337 = vmatmul.mubr.msk.bf16.gmra.mrb[16].mxu1 %vm2259_vm10, %v8484_v62 }
 0x374   : > { %6344 = vmatprep.mubr.msk.bf16.mxu1 %vm7150_vm8, %v7149_v30 }
 0x37b   : > { %6345 = vmatmul.mubr.msk.bf16.vlgmr.msra.gmra.mrb[0].mxu1 %vm2259_vm10, %v8419_v10  ;;  %v8678_v10 = vrot.slane %v2206_v1, %v9327_v13 }
 0x37c   : > { %6348 = vmatprep.mubr.msk.bf16.mxu1 %vm7150_vm8, %v7149_v30 }
 0x383   : > { %6349 = vmatmul.mubr.msk.bf16.gmra.mrb[4].mxu1 %vm2259_vm10, %v8452_v29 }
 0x384   : > { %6352 = vmatprep.mubr.msk.bf16.mxu1 %vm7150_vm8, %v7149_v30 }
 0x38b   : > { %6353 = vmatmul.mubr.msk.bf16.gmra.mrb[8].mxu1 %vm2259_vm10, %v8498_v27 }
 0x38c   : > { %6356 = vmatprep.mubr.msk.bf16.mxu1 %vm7150_vm8, %v7149_v30 }
 0x393   : > { %6357 = vmatmul.mubr.msk.bf16.gmra.mrb[12].mxu1 %vm2259_vm10, %v8501_v46 }
 0x394   : > { %6360 = vmatprep.mubr.msk.bf16.mxu1 %vm7150_vm8, %v7149_v30 }
 0x39b   : > { %6361 = vmatmul.mubr.msk.bf16.gmra.mrb[16].mxu1 %vm2259_vm10, %v8504_v35 }
 0x39c   : > { %6390 = vmatprep.mubr.msk.bf16.mxu1 %vm7150_vm8, %v7149_v30 }
 0x44e   : > { %v3161_v44 = vpop.f32.mrb[0].mxu1 }
 0x44f   : > { %v3214_v37 = vmul.f32 %v8678_v10, %v3161_v44  ;;  %v6346_v53 = vpop.f32.mrb[1].mxu1 }
 0x450   : > { %v3164_v0 = vpop.f32.mrb[2].mxu1  ;;  %v7010_v53 = vld [vmem:[%s9270_s12 + $0x10] sm:$0xff]  }
 0x451   : > { %v3228_v29 = vadd.f32 %v8681_v26, %v3214_v37  ;;  %v3215_v50 = vmul.f32 %v8678_v10, %v3164_v0  ;;  %v6347_v60 = vpop.f32.mrb[3].mxu1  ;;  %v7011_v37 = vld [vmem:[%s9270_s12 + $0x20] sm:$0xff]   ;;  %v7014_v0 = vld [vmem:[%s9270_s12 + $0x30] ss:$0 sps:$4 sm:$0xff]  }
 0x452   : > { %v7016_v60 = vld [vmem:[%s7305_s21 + $0x28] sm:$0xff]  }
 0x453   : > { %v3229_v21 = vadd.f32 %v8681_v26, %v3215_v50  ;;  %v3238_v4 = vmax.f32 %v3228_v29, 0.0  ;;  %v7012_v29 = vld [vmem:[%s9270_s12 + $0x18] sm:$0xff]   ;;  %v7015_v50 = vld [vmem:[%s7305_s21 + $0x20] sm:$0xff]  }
 0x455   : > { %v3239_v43 = vmax.f32 %v3229_v21, 0.0  ;;  %v7017_v21 = vld [vmem:[%s7305_s21 + $0x30] sm:$0xff]  }
 0x456   : > { %v3169_v55 = vpop.f32.mrb[4].mxu1 }
 0x457   : > { %v3261_v8 = vpack.c.bf16 %v3239_v43, %v3238_v4  ;;  %v3216_v2 = vmul.f32 %v8678_v10, %v3169_v55  ;;  %v6350_v40 = vpop.f32.mrb[5].mxu1  ;;  %v7018_v4 = vld [vmem:[%s7305_s21 + $0x38] sm:$0xff]  }
 0x458   : > { %v3172_v47 = vpop.f32.mrb[6].mxu1 }
 0x459   : > { %v3230_v54 = vadd.f32 %v8681_v26, %v3216_v2  ;;  %v3217_v17 = vmul.f32 %v8678_v10, %v3172_v47  ;;  %v6351_v31 = vpop.f32.mrb[7].mxu1  ;;  %6365 = vmatpush3.bf16.msra.mxu0 %v3261_v8  ;;  %6651 = vmatpush3.bf16.msra.mxu1 %v3261_v8 }
 0x45a   : > { %6366 = vmatprep.subr.bf16.mxu0 %v7149_v30  ;;  %6647 = vmatprep.subr.bf16.mxu1 %v7149_v30 }
 0x45b   : > { %v3231_v16 = vadd.f32 %v8681_v26, %v3217_v17  ;;  %v3240_v18 = vmax.f32 %v3230_v54, 0.0 }
 0x45d   : > { %v3241_v11 = vmax.f32 %v3231_v16, 0.0 }
 0x45e   : > { %v3177_v3 = vpop.f32.mrb[8].mxu1 }
 0x45f   : > { %v3262_v39 = vpack.c.bf16 %v3241_v11, %v3240_v18  ;;  %v3218_v32 = vmul.f32 %v8678_v10, %v3177_v3  ;;  %v6354_v57 = vpop.f32.mrb[9].mxu1 }
 0x460   : > { %v3180_v12 = vpop.f32.mrb[10].mxu1 }
 0x461   : > { %v3232_v45 = vadd.f32 %v8681_v26, %v3218_v32  ;;  %v3219_v9 = vmul.f32 %v8678_v10, %v3180_v12  ;;  %v6355_v63 = vpop.f32.mrb[11].mxu1  ;;  %6367 = vmatpush3.bf16.msra.mxu0 %v3262_v39  ;;  %6652 = vmatpush3.bf16.msra.mxu1 %v3262_v39 }
 0x462   : > { %6368 = vmatprep.subr.bf16.mxu0 %v7149_v30  ;;  %6648 = vmatprep.subr.bf16.mxu1 %v7149_v30 }
 0x463   : > { %v3233_v6 = vadd.f32 %v8681_v26, %v3219_v9  ;;  %v3242_v56 = vmax.f32 %v3232_v45, 0.0 }
 0x465   : > { %v3243_v62 = vmax.f32 %v3233_v6, 0.0 }
 0x466   : > { %v3185_v42 = vpop.f32.mrb[12].mxu1 }
 0x467   : > { %v3263_v41 = vpack.c.bf16 %v3243_v62, %v3242_v56  ;;  %v3220_v48 = vmul.f32 %v8678_v10, %v3185_v42  ;;  %v6358_v33 = vpop.f32.mrb[13].mxu1 }
 0x468   : > { %v3188_v58 = vpop.f32.mrb[14].mxu1 }
 0x469   : > { %v3234_v25 = vadd.f32 %v8681_v26, %v3220_v48  ;;  %v3221_v36 = vmul.f32 %v8678_v10, %v3188_v58  ;;  %v6359_v27 = vpop.f32.mrb[15].mxu1  ;;  %6369 = vmatpush3.bf16.msra.mxu0 %v3263_v41  ;;  %6653 = vmatpush3.bf16.msra.mxu1 %v3263_v41 }
 0x46a   : > { %6370 = vmatprep.subr.bf16.mxu0 %v7149_v30  ;;  %6649 = vmatprep.subr.bf16.mxu1 %v7149_v30 }
 0x46b   : > { %v3235_v34 = vadd.f32 %v8681_v26, %v3221_v36  ;;  %v3244_v46 = vmax.f32 %v3234_v25, 0.0 }
 0x46d   : > { %v3245_v35 = vmax.f32 %v3235_v34, 0.0 }
 0x46e   : > { %v3193_v38 = vpop.f32.mrb[16].mxu1 }
 0x46f   : > { %v3264_v52 = vpack.c.bf16 %v3245_v35, %v3244_v46  ;;  %v3222_v61 = vmul.f32 %v8678_v10, %v3193_v38  ;;  %v6362_v49 = vpop.f32.mrb[17].mxu1 }
 0x470   : > { %v3196_v23 = vpop.f32.mrb[18].mxu1 }
 0x471   : > { %v3236_v5 = vadd.f32 %v8681_v26, %v3222_v61  ;;  %v3223_v51 = vmul.f32 %v8678_v10, %v3196_v23  ;;  %v6363_v59 = vpop.f32.mrb[19].mxu1  ;;  %6371 = vmatpush3.bf16.msra.mxu0 %v3264_v52  ;;  %6654 = vmatpush3.bf16.msra.mxu1 %v3264_v52  ;;  %v7008_v10 = vld [vmem:[%s9270_s12] sm:$0xff]  }
 0x472   : > { %6372 = vmatprep.subr.bf16.mxu0 %v7149_v30  ;;  %6650 = vmatprep.subr.bf16.mxu1 %v7149_v30 }
 0x473   : > { %v3237_v20 = vadd.f32 %v8681_v26, %v3223_v51  ;;  %v3246_v19 = vmax.f32 %v3236_v5, 0.0  ;;  %v7013_v26 = vld [vmem:[%s9270_s12 + $0x28] sm:$0xff]  }
 0x475   : > { %v3247_v24 = vmax.f32 %v3237_v20, 0.0 }
 0x477   : > { %v3265_v1 = vpack.c.bf16 %v3247_v24, %v3246_v19 }
 0x479   : > { %v3324_v44 = vand.u32 %v3322_v28, %v3265_v1 }
 0x47b   : > { %6373 = vmatpush3.bf16.msra.mxu0 %v3324_v44  ;;  %6655 = vmatpush3.bf16.msra.mxu1 %v3324_v44 }
 0x47c   : > { %6402 = vmatprep.subr.bf16.mxu0 %v7149_v30 }
 0x47e   : > { %6375 = vmatmul.mubr.msk.bf16.vlgmr.msra.gmra.mrb[44].mxu0 %vm3299_vm14, %v7008_v10  ;;  %6391 = vmatmul.mubr.msk.bf16.vlgmr.msra.gmra.mrb[20].mxu1 %vm3299_vm14, %v7011_v37 }
 0x47f   : > { %6378 = vmatprep.mubr.msk.bf16.mxu0 %vm7150_vm8, %v7149_v30  ;;  %6394 = vmatprep.mubr.msk.bf16.mxu1 %vm7150_vm8, %v7149_v30 }
 0x480   : > { %6403 = vmatpush3.bf16.msra.mxu0 %v7015_v50 }
 0x481   : > { %6404 = vmatprep.subr.bf16.mxu0 %v7149_v30 }
 0x484   : > { %6405 = vmatpush3.bf16.msra.mxu0 %v7016_v60 }
 0x485   : > { %6406 = vmatprep.subr.bf16.mxu0 %v7149_v30 }
 0x486   : > { %6379 = vmatmul.mubr.msk.bf16.gmra.mrb[48].mxu0 %vm3299_vm14, %v7009_v14  ;;  %6395 = vmatmul.mubr.msk.bf16.gmra.mrb[24].mxu1 %vm3299_vm14, %v7013_v26 }
 0x487   : > { %6382 = vmatprep.mubr.msk.bf16.mxu0 %vm7150_vm8, %v7149_v30  ;;  %6398 = vmatprep.mubr.msk.bf16.mxu1 %vm7150_vm8, %v7149_v30 }
 0x488   : > { %6407 = vmatpush3.bf16.msra.mxu0 %v7017_v21 }
 0x489   : > { %6408 = vmatprep.subr.bf16.mxu0 %v7149_v30 }
 0x48c   : > { %6409 = vmatpush3.bf16.msra.mxu0 %v7018_v4 }
 0x48d   : > { %6422 = vmatprep.subr.bf16.mxu0 %v7149_v30 }
 0x48e   : > { %6383 = vmatmul.mubr.msk.bf16.gmra.mrb[52].mxu0 %vm3299_vm14, %v7010_v53  ;;  %6399 = vmatmul.mubr.msk.bf16.gmra.mrb[28].mxu1 %vm3299_vm14, %v7014_v0 }
 0x48f   : > { %6386 = vmatprep.mubr.msk.bf16.mxu0 %vm7150_vm8, %v7149_v30  ;;  %6574 = vmatprep.mubr.msk.f32.mxu1 %vm7150_vm8, %v7149_v30 }
 0x496   : > { %6387 = vmatmul.mubr.msk.bf16.gmra.mrb[56].mxu0 %vm3299_vm14, %v7012_v29 }
 0x497   : > { %6410 = vmatprep.mubr.msk.bf16.mxu0 %vm7150_vm8, %v7149_v30 }
 0x551   : > { %v8765_v43 = vpop.f32.mrb[44].mxu0  ;;  %v8767_v55 = vpop.f32.mrb[20].mxu1 }
 0x552   : > { %v6376_v8 = vpop.f32.mrb[45].mxu0  ;;  %v3424_v2 = vrot.slane %v8767_v55, 4  ;;  %v6392_v40 = vpop.f32.mrb[21].mxu1 }
 0x553   : > { %v8770_v47 = vpop.f32.mrb[46].mxu0  ;;  %v3395_v54 = vpop.f32.mrb[22].mxu1 }
 0x554   : > { %v6377_v17 = vpop.f32.mrb[47].mxu0  ;;  %v3426_v31 = vrot.slane %v3395_v54, 4  ;;  %v6393_v16 = vpop.f32.mrb[23].mxu1 }
 0x556   : > { %v3427_v18 = vsel %vm1359_vm3, %v3424_v2, %v3426_v31 }
 0x559   : > { %v3368_v11 = vpop.f32.mrb[48].mxu0  ;;  %v3400_v3 = vpop.f32.mrb[24].mxu1 }
 0x55a   : > { %v6380_v39 = vpop.f32.mrb[49].mxu0  ;;  %v3443_v32 = vmax.f32 %v3368_v11, %v3427_v18  ;;  %v3428_v57 = vrot.slane %v3400_v3, 4  ;;  %v6396_v12 = vpop.f32.mrb[25].mxu1 }
 0x55b   : > { %v3371_v45 = vpop.f32.mrb[50].mxu0  ;;  %v3403_v9 = vpop.f32.mrb[26].mxu1 }
 0x55c   : > { %v6381_v63 = vpop.f32.mrb[51].mxu0  ;;  %v3429_v6 = vsel %vm1359_vm3, %v3426_v31, %v3428_v57  ;;  %v3430_v56 = vrot.slane %v3403_v9, 4  ;;  %v6397_v62 = vpop.f32.mrb[27].mxu1 }
 0x55d   : > { %v3444_v42 = vmax.f32 %v3371_v45, %v3429_v6 }
 0x55e   : > { %v3431_v41 = vsel %vm1359_vm3, %v3428_v57, %v3430_v56 }
 0x55f   : > { %v8777_v48 = vpack.c.bf16 %v3444_v42, %v3443_v32 }
 0x561   : > { %v3376_v33 = vpop.f32.mrb[52].mxu0  ;;  %v3408_v58 = vpop.f32.mrb[28].mxu1  ;;  %v8780_v25 = vshll.u32 %v8777_v48, 16  ;;  %v3529_v36 = vshrl.u32 %v8777_v48, 16  ;;  %v3722_v14 = vrot.slane %v8777_v48, 1  ;;  %v3931_v26 = vrot.slane %v8777_v48, 2 }
 0x562   : > { %v6384_v27 = vpop.f32.mrb[53].mxu0  ;;  %v3445_v34 = vmax.f32 %v3376_v33, %v3431_v41  ;;  %v3432_v46 = vrot.slane %v3408_v58, 4  ;;  %v6400_v35 = vpop.f32.mrb[29].mxu1  ;;  %v4150_v6 = vrot.slane %v8777_v48, 3 }
 0x563   : > { %v3379_v38 = vpop.f32.mrb[54].mxu0  ;;  %v3411_v52 = vpop.f32.mrb[30].mxu1  ;;  %v3825_v61 = vrot.slane %v3529_v36, 1  ;;  %v3826_v49 = vrot.slane %v8780_v25, 2  ;;  %v4036_v23 = vrot.slane %v3529_v36, 2  ;;  %v4037_v7 = vrot.slane %v8780_v25, 3 }
 0x564   : > { %v6385_v5 = vpop.f32.mrb[55].mxu0  ;;  %v3433_v51 = vsel %vm1359_vm3, %v3430_v56, %v3432_v46  ;;  %v6401_v59 = vpop.f32.mrb[31].mxu1  ;;  %v4255_v20 = vrot.slane %v3529_v36, 3  ;;  %v4256_v19 = vrot.slane %v8780_v25, 4  ;;  %v3527_v1 = vrot.slane %v8780_v25, 1 }
 0x565   : > { %v3446_v24 = vmax.f32 %v3379_v38, %v3433_v51  ;;  %v8787_v28 = vor.u32 %v3826_v49, %v3825_v61  ;;  %v8790_v44 = vor.u32 %v4037_v7, %v4036_v23 }
 0x566   : > { %v8792_v10 = vor.u32 %v4256_v19, %v4255_v20  ;;  %v3531_v40 = vor.u32 %v3529_v36, %v3527_v1 }
 0x567   : > { %v8794_v37 = vpack.c.bf16 %v3446_v24, %v3445_v34 }
 0x569   : > { %v3384_v53 = vpop.f32.mrb[56].mxu0  ;;  %v8799_v0 = vshll.u32 %v8794_v37, 16  ;;  %v8802_v29 = vshrl.u32 %v8794_v37, 16  ;;  %v3724_v50 = vrot.slane %v8794_v37, 1  ;;  %v3933_v60 = vrot.slane %v8794_v37, 2 }
 0x56a   : > { %v3421_v21 = vrot.slane %v3384_v53, 4  ;;  %v6388_v4 = vpop.f32.mrb[57].mxu0  ;;  %v3447_v8 = vmax.f32 %v3384_v53, %v3432_v46  ;;  %v4152_v54 = vrot.slane %v8794_v37, 3 }
 0x56b   : > { %v3387_v17 = vpop.f32.mrb[58].mxu0  ;;  %v3535_v31 = vrot.slane %v8799_v0, 1  ;;  %v8813_v16 = vsel %vm1023_vm0, %v3722_v14, %v3724_v50  ;;  %v3829_v18 = vrot.slane %v8802_v29, 1  ;;  %v3830_v11 = vrot.slane %v8799_v0, 2 }
 0x56c   : > { %v3422_v3 = vrot.slane %v3387_v17, 4  ;;  %v3451_v39 = vpack.c.bf16 %v3447_v8, %v3447_v8  ;;  %v6389_v32 = vpop.f32.mrb[59].mxu0  ;;  %v8818_v57 = vsel %vm1135_vm1, %v3931_v26, %v3933_v60  ;;  %v4040_v12 = vrot.slane %v8802_v29, 2 }
 0x56d   : > { %v8824_v45 = vsel %vm2207_vm9, %v3531_v40, %v3535_v31  ;;  %v8826_v9 = vor.u32 %v3830_v11, %v3829_v18  ;;  %v4041_v63 = vrot.slane %v8799_v0, 3  ;;  %v8842_v55 = vsel %vm1247_vm2, %v4150_v6, %v4152_v54 }
 0x56e   : > { %v3423_v56 = vsel %vm1359_vm3, %v3421_v21, %v3422_v3  ;;  %v3425_v62 = vsel %vm1359_vm3, %v3422_v3, %v3424_v2  ;;  %v4045_v42 = vshrl.u32 %v3451_v39, 16  ;;  %v4048_v41 = vshll.u32 %v3451_v39, 16 }
 0x56f   : > { %v3441_v33 = vmax.f32 %v8765_v43, %v3423_v56  ;;  %v3442_v58 = vmax.f32 %v8770_v47, %v3425_v62  ;;  %v8839_v36 = vsel %vm2568_vm11, %v8787_v28, %v8826_v9  ;;  %v3935_v27 = vrot.slane %v3451_v39, 2 }
 0x570   : > { %v4042_v34 = vor.u32 %v4041_v63, %v4040_v12  ;;  %v4047_v46 = vrot.slane %v4045_v42, 2  ;;  %v4050_v35 = vrot.slane %v4048_v41, 3  ;;  %v4154_v43 = vrot.slane %v3451_v39, 3  ;;  %v7019_v39 = vld [vmem:[%s7305_s21] sm:$0xff]  }
 0x571   : > { %v3448_v2 = vpack.c.bf16 %v3442_v58, %v3441_v33  ;;  %v8845_v38 = vsel %vm1135_vm1, %v3933_v60, %v3935_v27  ;;  %v4259_v47 = vrot.slane %v8802_v29, 3  ;;  %v4260_v49 = vrot.slane %v8799_v0, 4  ;;  %v7024_v58 = vld [vmem:[%s7305_s21 + $0x48] sm:$0xff]   ;;  %v7025_v0 = vld [vmem:[%s7305_s21 + $0x50] sm:$0xff]  }
 0x572   : > { %v8850_v52 = vsel %vm2818_vm12, %v8790_v44, %v4042_v34  ;;  %v4051_v61 = vor.u32 %v4050_v35, %v4047_v46  ;;  %v4263_v23 = vrot.slane %v4045_v42, 3  ;;  %v8857_v24 = vsel %vm1247_vm2, %v4152_v54, %v4154_v43  ;;  %v7029_v27 = vld [vmem:[%s7305_s21 + $0x70] sm:$0xff]   ;;  %v7032_v46 = vld [vmem:[%s7305_s21 + $0x88] sm:$0xff]   ;;  %v7039_v43 = vld [vmem:[%s7305_s21 + $0xc0] sm:$0xff]  }
 0x573   : > { %v3518_v5 = vshrl.u32 %v3448_v2, 16  ;;  %v3520_v51 = vshll.u32 %v3448_v2, 16  ;;  %v3721_v59 = vrot.slane %v3448_v2, 1  ;;  %v3930_v7 = vrot.slane %v3448_v2, 2  ;;  %v7033_v35 = vld [vmem:[%s7305_s21 + $0x90] sm:$0xff]  }
 0x574   : > { %v8854_v20 = vsel %vm2818_vm12, %v4042_v34, %v4051_v61  ;;  %v4149_v19 = vrot.slane %v3448_v2, 3  ;;  %v4261_v53 = vor.u32 %v4260_v49, %v4259_v47  ;;  %v4264_v56 = vrot.slane %v4048_v41, 4  ;;  %v7020_v41 = vld [vmem:[%s7305_s21 + $0x8] sm:$0xff]   ;;  %v7030_v34 = vld [vmem:[%s7305_s21 + $0x78] sm:$0xff]   ;;  %v7041_v47 = vld [vmem:[%s7305_s21 + $0xd0] sm:$0xff]  }
 0x575   : > { %v3522_v60 = vrot.slane %v3520_v51, 1  ;;  %v3723_v21 = vsel %vm1023_vm0, %v3721_v59, %v3722_v14  ;;  %v3822_v4 = vrot.slane %v3518_v5, 1  ;;  %v3823_v8 = vrot.slane %v3520_v51, 2  ;;  %v7043_v61 = vld [vmem:[%s7305_s21 + $0xe0] sm:$0xff]   ;;  %v7045_v49 = vld [vmem:[%s7305_s21 + $0xf0] sm:$0xff]  }
 0x576   : > { %v8861_v40 = vsel %vm1135_vm1, %v3930_v7, %v3931_v26  ;;  %v4033_v17 = vrot.slane %v3518_v5, 2  ;;  %v4034_v18 = vrot.slane %v3520_v51, 3  ;;  %v8864_v11 = vsel %vm1247_vm2, %v4149_v19, %v4150_v6 }
 0x577   : > { %v3523_v3 = vor.u32 %v3522_v60, %v3518_v5  ;;  %v3824_v32 = vor.u32 %v3823_v8, %v3822_v4  ;;  %v4252_v54 = vrot.slane %v3518_v5, 3  ;;  %v4253_v12 = vrot.slane %v3520_v51, 4  ;;  %v3516_v5 = vld [vmem:[%s778_s28] sm:$0x3] }
 0x578   : > { %v4035_v63 = vor.u32 %v4034_v18, %v4033_v17  ;;  %v8869_v14 = vsel %vm3071_vm13, %v8792_v10, %v4261_v53  ;;  %v4265_v33 = vor.u32 %v4264_v56, %v4263_v23  ;;  %v7046_v23 = vld [vmem:[%s7305_s21 + $0xf8] sm:$0xff]   ;;  %v4366_v51 = vrot.slane %v3516_v5, %v9327_v13 }
 0x579   : > { %v3528_v26 = vsel %vm2207_vm9, %v3523_v3, %v3527_v1  ;;  %v3828_v6 = vsel %vm2568_vm11, %v3824_v32, %v8787_v28  ;;  %v4254_v62 = vor.u32 %v4253_v12, %v4252_v54  ;;  %v7021_v1 = vld [vmem:[%s7305_s21 + $0x10] sm:$0xff]   ;;  %v4376_v59 = vrot.slane %v3516_v5, %v9328_v15 }
 0x57a   : > { %6411 = vmatmul.mubr.msk.bf16.vlgmr.msra.gmra.mrb[60].mxu0 %vm3564_vm15, %v3528_v26  ;;  %v8879_v42 = vsel %vm2818_vm12, %v4035_v63, %v8790_v44  ;;  %v8890_v28 = vsel %vm3071_vm13, %v4261_v53, %v4265_v33  ;;  %v7022_v44 = vld [vmem:[%s7305_s21 + $0x18] sm:$0xff]   ;;  %vm7152_vm0 = vmmov 1  }
 0x57b   : > { %6414 = vmatprep.mubr.msk.bf16.mxu0 %vm7150_vm8, %v7149_v30  ;;  %6423 = vmatpush3.bf16.msra.mxu0 %v7019_v39  ;;  %v8886_v25 = vsel %vm3071_vm13, %v4254_v62, %v8792_v10  ;;  %v3539_v10 = vor.u32 %v8802_v29, %v3535_v31  ;;  %v7026_v29 = vld [vmem:[%s7305_s21 + $0x58] sm:$0xff]   ;;  %v7027_v31 = vld [vmem:[%s7305_s21 + $0x60] sm:$0xff]   ;;  %vm6623_vm1 = vmpackc.low %vm1247_vm2, %vm7152_vm0  ;;  %vm4720_vm2 = vcmask 162816  }
 0x57c   : > { %6424 = vmatprep.subr.bf16.mxu0 %v7149_v30 }
 0x57f   : > { %6425 = vmatpush3.bf16.msra.mxu0 %v7020_v41 }
 0x580   : > { %6426 = vmatprep.subr.bf16.mxu0 %v7149_v30 }
 0x582   : > { %6415 = vmatmul.mubr.msk.bf16.gmra.mrb[64].mxu0 %vm3564_vm15, %v8824_v45  ;;  %v7023_v45 = vld [vmem:[%s7305_s21 + $0x40] sm:$0xff]  }
 0x583   : > { %6418 = vmatprep.mubr.msk.bf16.mxu0 %vm7150_vm8, %v7149_v30  ;;  %6427 = vmatpush3.bf16.msra.mxu0 %v7021_v1 }
 0x584   : > { %6428 = vmatprep.subr.bf16.mxu0 %v7149_v30 }
 0x587   : > { %6429 = vmatpush3.bf16.msra.mxu0 %v7022_v44 }
 0x588   : > { %6442 = vmatprep.subr.bf16.mxu0 %v7149_v30 }
 0x58a   : > { %6419 = vmatmul.mubr.msk.bf16.gmra.mrb[68].mxu0 %vm3564_vm15, %v3539_v10 }
 0x58b   : > { %6430 = vmatprep.mubr.msk.bf16.mxu0 %vm7150_vm8, %v7149_v30 }
 0x592   : > { %6431 = vmatmul.mubr.msk.bf16.vlgmr.msra.gmra.mrb[60].mxu0 %vm3564_vm15, %v3448_v2  ;;  %v7037_v2 = vld [vmem:[%s7305_s21 + $0xb0] sm:$0xff]  }
 0x593   : > { %6434 = vmatprep.mubr.msk.bf16.mxu0 %vm7150_vm8, %v7149_v30  ;;  %6443 = vmatpush3.bf16.msra.mxu0 %v7023_v45 }
 0x594   : > { %6444 = vmatprep.subr.bf16.mxu0 %v7149_v30 }
 0x597   : > { %6445 = vmatpush3.bf16.msra.mxu0 %v7024_v58  ;;  %v4389_v58 = vld [vmem:[%s9271_s13] sm:$0xff] }
 0x598   : > { %6446 = vmatprep.subr.bf16.mxu0 %v7149_v30 }
 0x59a   : > { %6435 = vmatmul.mubr.msk.bf16.gmra.mrb[64].mxu0 %vm3564_vm15, %v8777_v48  ;;  %v7028_v48 = vld [vmem:[%s7305_s21 + $0x68] sm:$0xff]  }
 0x59b   : > { %6438 = vmatprep.mubr.msk.bf16.mxu0 %vm7150_vm8, %v7149_v30  ;;  %6447 = vmatpush3.bf16.msra.mxu0 %v7025_v0  ;;  %v4390_v0 = vld [vmem:[%s9271_s13 + $0x8] sm:$0xff] }
 0x59c   : > { %6448 = vmatprep.subr.bf16.mxu0 %v7149_v30 }
 0x59f   : > { %6449 = vmatpush3.bf16.msra.mxu0 %v7026_v29  ;;  %v4391_v29 = vld [vmem:[%s9271_s13 + $0x10] sm:$0xff] }
 0x5a0   : > { %6462 = vmatprep.subr.bf16.mxu0 %v7149_v30 }
 0x5a2   : > { %6439 = vmatmul.mubr.msk.bf16.gmra.mrb[68].mxu0 %vm3564_vm15, %v8794_v37  ;;  %v7034_v37 = vld [vmem:[%s7305_s21 + $0x98] sm:$0xff]  }
 0x5a3   : > { %6450 = vmatprep.mubr.msk.bf16.mxu0 %vm7150_vm8, %v7149_v30 }
 0x5aa   : > { %6451 = vmatmul.mubr.msk.bf16.vlgmr.msra.gmra.mrb[60].mxu0 %vm3564_vm15, %v3723_v21 }
 0x5ab   : > { %6454 = vmatprep.mubr.msk.bf16.mxu0 %vm7150_vm8, %v7149_v30  ;;  %6463 = vmatpush3.bf16.msra.mxu0 %v7027_v31  ;;  %v4392_v31 = vld [vmem:[%s9271_s13 + $0x18] sm:$0xff] }
 0x5ac   : > { %6464 = vmatprep.subr.bf16.mxu0 %v7149_v30 }
 0x5af   : > { %6465 = vmatpush3.bf16.msra.mxu0 %v7028_v48  ;;  %v4393_v48 = vld [vmem:[%s9271_s13 + $0x20] sm:$0xff] }
 0x5b0   : > { %6466 = vmatprep.subr.bf16.mxu0 %v7149_v30 }
 0x5b2   : > { %6455 = vmatmul.mubr.msk.bf16.gmra.mrb[64].mxu0 %vm3564_vm15, %v8813_v16  ;;  %v7031_v16 = vld [vmem:[%s7305_s21 + $0x80] sm:$0xff]  }
 0x5b3   : > { %6458 = vmatprep.mubr.msk.bf16.mxu0 %vm7150_vm8, %v7149_v30  ;;  %6467 = vmatpush3.bf16.msra.mxu0 %v7029_v27  ;;  %v4518_v27 = vld [vmem:[%s9272_s14 + $0x8] sm:$0xff] }
 0x5b4   : > { %6468 = vmatprep.subr.bf16.mxu0 %v7149_v30 }
 0x5b7   : > { %6469 = vmatpush3.bf16.msra.mxu0 %v7030_v34  ;;  %v4521_v34 = vld [vmem:[%s9272_s14 + $0x20] sm:$0xff] }
 0x5b8   : > { %6482 = vmatprep.subr.bf16.mxu0 %v7149_v30 }
 0x5ba   : > { %6459 = vmatmul.mubr.msk.bf16.gmra.mrb[68].mxu0 %vm3564_vm15, %v3724_v50  ;;  %v7035_v50 = vld [vmem:[%s7305_s21 + $0xa0] sm:$0xff]  }
 0x5bb   : > { %6470 = vmatprep.mubr.msk.bf16.mxu0 %vm7150_vm8, %v7149_v30 }
 0x5c2   : > { %6471 = vmatmul.mubr.msk.bf16.vlgmr.msra.gmra.mrb[60].mxu0 %vm3564_vm15, %v3828_v6 }
 0x5c3   : > { %6474 = vmatprep.mubr.msk.bf16.mxu0 %vm7150_vm8, %v7149_v30  ;;  %6483 = vmatpush3.bf16.msra.mxu0 %v7031_v16  ;;  %v4517_v16 = vld [vmem:[%s9272_s14] sm:$0xff] }
 0x5c4   : > { %6484 = vmatprep.subr.bf16.mxu0 %v7149_v30 }
 0x5c7   : > { %6485 = vmatpush3.bf16.msra.mxu0 %v7032_v46  ;;  %v6625_v46 = vpack.c.bf16 %v4521_v34, %v4518_v27  ;;  %v7047_v27 = vld [vmem:[%s7298_s19] ss:$8 sps:$4 sm:$0xff]   ;;  %v4703_v34 = vld [vmem:[%s9273_s15 + $0x10] sm:$0xff] }
 0x5c8   : > { %6486 = vmatprep.subr.bf16.mxu0 %v7149_v30 }
 0x5ca   : > { %6475 = vmatmul.mubr.msk.bf16.gmra.mrb[64].mxu0 %vm3564_vm15, %v8839_v36  ;;  %v7036_v36 = vld [vmem:[%s7305_s21 + $0xa8] sm:$0xff]  }
 0x5cb   : > { %6478 = vmatprep.mubr.msk.bf16.mxu0 %vm7150_vm8, %v7149_v30  ;;  %6487 = vmatpush3.bf16.msra.mxu0 %v7033_v35  ;;  %v4520_v35 = vld [vmem:[%s9272_s14 + $0x18] sm:$0xff] }
 0x5cc   : > { %6488 = vmatprep.subr.bf16.mxu0 %v7149_v30 }
 0x5cf   : > { %6489 = vmatpush3.bf16.msra.mxu0 %v7034_v37  ;;  %v6627_v37 = vpack.c.bf16 %v4520_v35, %v4517_v16  ;;  %v4706_v16 = vld [vmem:[%s9273_s15 + $0x28] sm:$0xff] }
 0x5d0   : > { %6502 = vmatprep.subr.bf16.mxu0 %v7149_v30 }
 0x5d2   : > { %6479 = vmatmul.mubr.msk.bf16.gmra.mrb[68].mxu0 %vm3564_vm15, %v8826_v9  ;;  %v7038_v9 = vld [vmem:[%s7305_s21 + $0xb8] sm:$0xff]  }
 0x5d3   : > { %6490 = vmatprep.mubr.msk.bf16.mxu0 %vm7150_vm8, %v7149_v30 }
 0x5da   : > { %6491 = vmatmul.mubr.msk.bf16.vlgmr.msra.gmra.mrb[60].mxu0 %vm3564_vm15, %v8861_v40 }
 0x5db   : > { %6494 = vmatprep.mubr.msk.bf16.mxu0 %vm7150_vm8, %v7149_v30  ;;  %6503 = vmatpush3.bf16.msra.mxu0 %v7035_v50  ;;  %v4524_v50 = vld [vmem:[%s9272_s14 + $0x38] sm:$0xff] }
 0x5dc   : > { %6504 = vmatprep.subr.bf16.mxu0 %v7149_v30 }
 0x5df   : > { %6505 = vmatpush3.bf16.msra.mxu0 %v7036_v36  ;;  %v4527_v36 = vld [vmem:[%s9272_s14 + $0x50] sm:$0xff] }
 0x5e0   : > { %6506 = vmatprep.subr.bf16.mxu0 %v7149_v30 }
 0x5e2   : > { %6495 = vmatmul.mubr.msk.bf16.gmra.mrb[64].mxu0 %vm3564_vm15, %v8818_v57  ;;  %v7040_v57 = vld [vmem:[%s7305_s21 + $0xc8] sm:$0xff]  }
 0x5e3   : > { %6498 = vmatprep.mubr.msk.bf16.mxu0 %vm7150_vm8, %v7149_v30  ;;  %6507 = vmatpush3.bf16.msra.mxu0 %v7037_v2  ;;  %v4523_v2 = vld [vmem:[%s9272_s14 + $0x30] sm:$0xff] }
 0x5e4   : > { %6508 = vmatprep.subr.bf16.mxu0 %v7149_v30 }
 0x5e7   : > { %6509 = vmatpush3.bf16.msra.mxu0 %v7038_v9  ;;  %v6629_v9 = vpack.c.bf16 %v4527_v36, %v4524_v50 }
 0x5e8   : > { %6522 = vmatprep.subr.bf16.mxu0 %v7149_v30 }
 0x5ea   : > { %6499 = vmatmul.mubr.msk.bf16.gmra.mrb[68].mxu0 %vm3564_vm15, %v8845_v38  ;;  %v7042_v38 = vld [vmem:[%s7305_s21 + $0xd8] sm:$0xff]  }
 0x5eb   : > { %6510 = vmatprep.mubr.msk.bf16.mxu0 %vm7150_vm8, %v7149_v30 }
 0x5f2   : > { %6511 = vmatmul.mubr.msk.bf16.vlgmr.msra.gmra.mrb[60].mxu0 %vm3564_vm15, %v8879_v42 }
 0x5f3   : > { %6514 = vmatprep.mubr.msk.bf16.mxu0 %vm7150_vm8, %v7149_v30  ;;  %6523 = vmatpush3.bf16.msra.mxu0 %v7039_v43  ;;  %v4526_v43 = vld [vmem:[%s9272_s14 + $0x48] sm:$0xff] }
 0x5f4   : > { %6524 = vmatprep.subr.bf16.mxu0 %v7149_v30 }
 0x5f7   : > { %6525 = vmatpush3.bf16.msra.mxu0 %v7040_v57  ;;  %v6631_v57 = vpack.c.bf16 %v4526_v43, %v4523_v2  ;;  %v7050_v2 = vld [vmem:[%s7298_s19 + $0x10] ss:$8 sps:$4 sm:$0xff]  }
 0x5f8   : > { %6526 = vmatprep.subr.bf16.mxu0 %v7149_v30 }
 0x5fa   : > { %6515 = vmatmul.mubr.msk.bf16.gmra.mrb[64].mxu0 %vm3564_vm15, %v8850_v52  ;;  %v7044_v52 = vld [vmem:[%s7305_s21 + $0xe8] sm:$0xff]  }
 0x5fb   : > { %6518 = vmatprep.mubr.msk.bf16.mxu0 %vm7150_vm8, %v7149_v30  ;;  %6527 = vmatpush3.bf16.msra.mxu0 %v7041_v47 }
 0x5fc   : > { %6528 = vmatprep.subr.bf16.mxu0 %v7149_v30 }
 0x5ff   : > { %6529 = vmatpush3.bf16.msra.mxu0 %v7042_v38 }
 0x600   : > { %6542 = vmatprep.subr.bf16.mxu0 %v7149_v30 }
 0x602   : > { %6519 = vmatmul.mubr.msk.bf16.gmra.mrb[68].mxu0 %vm3564_vm15, %v8854_v20 }
 0x603   : > { %6530 = vmatprep.mubr.msk.bf16.mxu0 %vm7150_vm8, %v7149_v30 }
 0x60a   : > { %6531 = vmatmul.mubr.msk.bf16.vlgmr.msra.gmra.mrb[60].mxu0 %vm3564_vm15, %v8864_v11 }
 0x60b   : > { %6534 = vmatprep.mubr.msk.bf16.mxu0 %vm7150_vm8, %v7149_v30  ;;  %6543 = vmatpush3.bf16.msra.mxu0 %v7043_v61 }
 0x60c   : > { %6544 = vmatprep.subr.bf16.mxu0 %v7149_v30 }
 0x60f   : > { %6545 = vmatpush3.bf16.msra.mxu0 %v7044_v52 }
 0x610   : > { %6546 = vmatprep.subr.bf16.mxu0 %v7149_v30 }
 0x612   : > { %6535 = vmatmul.mubr.msk.bf16.gmra.mrb[64].mxu0 %vm3564_vm15, %v8842_v55  ;;  %v7151_v55 = vmov 0.0|0.0  }
 0x613   : > { %6538 = vmatprep.mubr.msk.bf16.mxu0 %vm7150_vm8, %v7149_v30  ;;  %6547 = vmatpush3.bf16.msra.mxu0 %v7045_v49 }
 0x614   : > { %6548 = vmatprep.subr.bf16.mxu0 %v7149_v30  ;;  %6615 = vmatprep.subr.bf16.mxu1 %v7151_v55 }
 0x617   : > { %6549 = vmatpush3.bf16.msra.mxu0 %v7046_v23 }
 0x61a   : > { %6539 = vmatmul.mubr.msk.bf16.gmra.mrb[68].mxu0 %vm3564_vm15, %v8857_v24 }
 0x61b   : > { %6550 = vmatprep.mubr.msk.bf16.mxu0 %vm7150_vm8, %v7149_v30 }
 0x622   : > { %6551 = vmatmul.mubr.msk.bf16.vlgmr.msra.gmra.mrb[60].mxu0 %vm3564_vm15, %v8886_v25 }
 0x623   : > { %6554 = vmatprep.mubr.msk.bf16.mxu0 %vm7150_vm8, %v7149_v30 }
 0x62a   : > { %6555 = vmatmul.mubr.msk.bf16.gmra.mrb[64].mxu0 %vm3564_vm15, %v8869_v14 }
 0x62b   : > { %6558 = vmatprep.mubr.msk.bf16.mxu0 %vm7150_vm8, %v7149_v30 }
 0x632   : > { %6559 = vmatmul.mubr.msk.bf16.gmra.mrb[68].mxu0 %vm3564_vm15, %v8890_v28 }
 0x633   : > { %4797 = vmatprep.mubr.f32.mxu0 %v7149_v30 }
 0x6f5   : > { %v4334_v7 = vpop.f32.mrb[60].mxu0 }
 0x6f6   : > { %v4367_v20 = vmul.f32 %v4366_v51, %v4334_v7  ;;  %v6552_v19 = vpop.f32.mrb[61].mxu0 }
 0x6f7   : > { %v4337_v24 = vpop.f32.mrb[62].mxu0 }
 0x6f8   : > { %v4377_v53 = vadd.f32 %v4376_v59, %v4367_v20  ;;  %v4368_v60 = vmul.f32 %v4366_v51, %v4337_v24  ;;  %v6553_v21 = vpop.f32.mrb[63].mxu0 }
 0x6fa   : > { %v4378_v4 = vadd.f32 %v4376_v59, %v4368_v60  ;;  %v4383_v8 = vmax.f32 %v4377_v53, 0.0 }
 0x6fc   : > { %v4384_v40 = vmax.f32 %v4378_v4, 0.0  ;;  %v4525_v4 = vld [vmem:[%s9272_s14 + $0x40] sm:$0xff] }
 0x6fd   : > { %v4342_v17 = vpop.f32.mrb[64].mxu0 }
 0x6fe   : > { %v6616_v18 = vpack.c.bf16 %v4384_v40, %v4383_v8  ;;  %v4369_v11 = vmul.f32 %v4366_v51, %v4342_v17  ;;  %v6556_v3 = vpop.f32.mrb[65].mxu0  ;;  %v4528_v8 = vld [vmem:[%s9272_s14 + $0x58] sm:$0xff] }
 0x6ff   : > { %v4345_v39 = vpop.f32.mrb[66].mxu0  ;;  %v6637_v3 = vpack.c.bf16 %v4528_v8, %v4525_v4  ;;  %v7074_v4 = vld [vmem:[%s7298_s19 + $0x90] ss:$8 sps:$4 sm:$0xff]   ;;  %v7079_v8 = vld [vmem:[%s7298_s19 + $0xa4] ss:$8 sps:$4 sm:$0xff]  }
 0x700   : > { %v4379_v32 = vadd.f32 %v4376_v59, %v4369_v11  ;;  %v4370_v54 = vmul.f32 %v4366_v51, %v4345_v39  ;;  %v6557_v12 = vpop.f32.mrb[67].mxu0  ;;  %6617 = vmatpush3.bf16.msra.mxu1 %v6616_v18 }
 0x701   : > { %6618 = vmatprep.subr.bf16.mxu1 %v7151_v55  ;;  %v4704_v12 = vld [vmem:[%s9273_s15 + $0x18] sm:$0xff] }
 0x702   : > { %v4380_v63 = vadd.f32 %v4376_v59, %v4370_v54  ;;  %v4385_v14 = vmax.f32 %v4379_v32, 0.0  ;;  %v4701_v54 = vld [vmem:[%s9273_s15] sm:$0xff] }
 0x704   : > { %v4386_v56 = vmax.f32 %v4380_v63, 0.0  ;;  %v4702_v63 = vld [vmem:[%s9273_s15 + $0x8] sm:$0xff] }
 0x705   : > { %v4350_v26 = vpop.f32.mrb[68].mxu0 }
 0x706   : > { %v6619_v6 = vpack.c.bf16 %v4386_v56, %v4385_v14  ;;  %v4371_v62 = vmul.f32 %v4366_v51, %v4350_v26  ;;  %v6560_v42 = vpop.f32.mrb[69].mxu0  ;;  %v4705_v14 = vld [vmem:[%s9273_s15 + $0x20] sm:$0xff] }
 0x707   : > { %v4353_v33 = vpop.f32.mrb[70].mxu0 }
 0x708   : > { %v4381_v41 = vadd.f32 %v4376_v59, %v4371_v62  ;;  %v4372_v25 = vmul.f32 %v4366_v51, %v4353_v33  ;;  %v6561_v28 = vpop.f32.mrb[71].mxu0  ;;  %6620 = vmatpush3.bf16.msra.mxu1 %v6619_v6  ;;  %v4519_v51 = vld [vmem:[%s9272_s14 + $0x10] sm:$0xff] }
 0x709   : > { %6621 = vmatprep.subr.bf16.mxu1 %v7151_v55 }
 0x70a   : > { %v4382_v1 = vadd.f32 %v4376_v59, %v4372_v25  ;;  %v4387_v44 = vmax.f32 %v4381_v41, 0.0  ;;  %v4522_v59 = vld [vmem:[%s9272_s14 + $0x28] sm:$0xff]  ;;  %v4708_v25 = vld [vmem:[%s9273_s15 + $0x38] sm:$0xf] }
 0x70b   : > { %v6634_v53 = vpack.c.bf16 %v4522_v59, %v4519_v51  ;;  %v7059_v51 = vld [vmem:[%s7298_s19 + $0x40] ss:$8 sps:$4 sm:$0xff]   ;;  %v7062_v59 = vld [vmem:[%s7298_s19 + $0x50] ss:$8 sps:$4 sm:$0xff]  }
 0x70c   : > { %v4388_v10 = vmax.f32 %v4382_v1, 0.0 }
 0x70e   : > { %v6622_v45 = vpack.c.bf16 %v4388_v10, %v4387_v44  ;;  %v4707_v10 = vld [vmem:[%s9273_s15 + $0x30] sm:$0xf] }
 0x710   : > { %6624 = vmatpush3.bf16.msk.msra.mxu1 %vm6623_vm1, %v6622_v45 }
 0x711   : > { %6626 = vmatprep.subr.bf16.mxu1 %v6625_v46  ;;  %v7052_v46 = vld [vmem:[%s7298_s19 + $0x14] ss:$8 sps:$4 sm:$0xff]  }
 0x713   : > { %6575 = vmatmul.mubr.msk.f32.vlgmr.msra.gmra.mrb[32].mxu1 %vm4394_vm4, %v4389_v58 }
 0x714   : > { %6577 = vmatprep.mubr.msk.f32.mxu1 %vm7150_vm8, %v7149_v30  ;;  %6628 = vmatpush1.bf16.msra.mxu1 %v6627_v37 }
 0x715   : > { %6630 = vmatprep.subr.bf16.mxu1 %v6629_v9  ;;  %v7055_v9 = vld [vmem:[%s7298_s19 + $0x24] ss:$8 sps:$4 sm:$0xff]  }
 0x717   : > { %6578 = vmatmul.mubr.msk.f32.gmra.mrb[34].mxu1 %vm4394_vm4, %v4390_v0  ;;  %v7049_v0 = vld [vmem:[%s7298_s19 + $0x4] ss:$8 sps:$4 sm:$0xff]  }
 0x718   : > { %6580 = vmatprep.mubr.msk.f32.mxu1 %vm7150_vm8, %v7149_v30  ;;  %6632 = vmatpush1.bf16.msra.mxu1 %v6631_v57 }
 0x719   : > { %6633 = vmatprep.subr.bf16.mxu1 %v7151_v55 }
 0x71b   : > { %6581 = vmatmul.mubr.msk.f32.gmra.mrb[36].mxu1 %vm4394_vm4, %v4391_v29 }
 0x71c   : > { %6583 = vmatprep.mubr.msk.f32.mxu1 %vm7150_vm8, %v7149_v30 }
 0x71f   : > { %6584 = vmatmul.mubr.msk.f32.gmra.mrb[38].mxu1 %vm4394_vm4, %v4392_v31 }
 0x720   : > { %6586 = vmatprep.mubr.msk.f32.mxu1 %vm7150_vm8, %v7149_v30 }
 0x723   : > { %6587 = vmatmul.mubr.msk.f32.gmra.mrb[40].mxu1 %vm4394_vm4, %v4393_v48  ;;  %v4719_v48 = vld [vmem:[%s9274_s16] sm:$0x3] }
 0x724   : > { %4602 = vmatprep.mubr.f32.mxu1 %v7149_v30 }
 0x7e6   : > { %v4479_v47 = vpop.f32.mrb[32].mxu1 }
 0x7e7   : > { %v6576_v38 = vpop.f32.mrb[33].mxu1 }
 0x7ea   : > { %v4484_v61 = vpop.f32.mrb[34].mxu1 }
 0x7eb   : > { %v6579_v52 = vpop.f32.mrb[35].mxu1 }
 0x7ec   : > { %v7058_v52 = vld [vmem:[%s7298_s19 + $0x34] ss:$8 sps:$4 sm:$0xff]  }
 0x7ee   : > { %v4489_v49 = vpop.f32.mrb[36].mxu1 }
 0x7ef   : > { %v6582_v23 = vpop.f32.mrb[37].mxu1  ;;  %v4506_v7 = vrot.slane %v4489_v49, 4 }
 0x7f0   : > { %v7056_v23 = vld [vmem:[%s7298_s19 + $0x30] ss:$8 sps:$4 sm:$0xff]  }
 0x7f2   : > { %v4494_v5 = vpop.f32.mrb[38].mxu1 }
 0x7f3   : > { %v4507_v20 = vrot.slane %v4494_v5, 4  ;;  %v6585_v19 = vpop.f32.mrb[39].mxu1  ;;  %v7061_v5 = vld [vmem:[%s7298_s19 + $0x44] ss:$8 sps:$4 sm:$0xff]  }
 0x7f4   : > { %v7070_v19 = vld [vmem:[%s7298_s19 + $0x74] ss:$8 sps:$4 sm:$0xff]  }
 0x7f5   : > { %v4508_v24 = vsel %vm1359_vm3, %v4506_v7, %v4507_v20  ;;  %v7067_v7 = vld [vmem:[%s7298_s19 + $0x64] ss:$8 sps:$4 sm:$0xff]  }
 0x7f6   : > { %v4514_v60 = vmax.f32 %v4479_v47, %v4508_v24  ;;  %v4499_v21 = vpop.f32.mrb[40].mxu1  ;;  %v4709_v47 = vld [vmem:[%s9273_s15 + $0x40] sm:$0xf]  ;;  %v7068_v24 = vld [vmem:[%s7298_s19 + $0x70] ss:$8 sps:$4 sm:$0xff]  }
 0x7f7   : > { %v4509_v40 = vrot.slane %v4499_v21, 4  ;;  %v6588_v17 = vpop.f32.mrb[41].mxu1  ;;  %v7076_v21 = vld [vmem:[%s7298_s19 + $0x94] ss:$8 sps:$4 sm:$0xff]  }
 0x7f8   : > { %5885 = vmatmul.mubr.msk.f32.vlgmr.msra.gmra.mrb[42].mxu1 %vm2259_vm10, %v4514_v60  ;;  %v7082_v17 = vld [vmem:[%s7298_s19 + $0xb4] ss:$8 sps:$4 sm:$0xff]  }
 0x7f9   : > { %v4510_v18 = vsel %vm1359_vm3, %v4507_v20, %v4509_v40  ;;  %v4516_v11 = vmax.f32 %v4489_v49, %v4509_v40  ;;  %4608 = vmatprep.mubr.f32.mxu1 %v7149_v30  ;;  %6635 = vmatpush3.bf16.msra.mxu1 %v6634_v53  ;;  %v7065_v20 = vld [vmem:[%s7298_s19 + $0x60] ss:$8 sps:$4 sm:$0xff]   ;;  %v7073_v53 = vld [vmem:[%s7298_s19 + $0x84] ss:$8 sps:$4 sm:$0xff]  }
 0x7fa   : > { %v4515_v39 = vmax.f32 %v4484_v61, %v4510_v18  ;;  %6636 = vmatprep.subr.bf16.mxu1 %v7151_v55  ;;  %v7053_v61 = vld [vmem:[%s7298_s19 + $0x20] ss:$8 sps:$4 sm:$0xff]   ;;  %v7080_v18 = vld [vmem:[%s7298_s19 + $0xb0] ss:$8 sps:$4 sm:$0xff]  }
 0x7fb   : > { %v7077_v40 = vld [vmem:[%s7298_s19 + $0xa0] ss:$8 sps:$4 sm:$0xff]  }
 0x7fc   : > { %5886 = vmatmul.mubr.msk.f32.gmra.mrb[44].mxu1 %vm2259_vm10, %v4515_v39 }
 0x7fd   : > { %4614 = vmatprep.mubr.f32.mxu1 %v7149_v30  ;;  %6638 = vmatpush3.bf16.msra.mxu1 %v6637_v3  ;;  %v7083_v3 = vld [vmem:[%s7298_s19 + $0xc0] ss:$8 sps:$4 sm:$0xff]  }
 0x7fe   : > { %6643 = vmatprep.subr.bf16.mxu1 %v7151_v55 }
 0x800   : > { %5887 = vmatmul.mubr.msk.f32.gmra.mrb[46].mxu1 %vm2259_vm10, %v4516_v11 }
 0x801   : > { %6597 = vmatprep.mubr.msk.f32.mxu1 %vm7150_vm8, %v7149_v30 }
 0x804   : > { %6598 = vmatmul.mubr.msk.f32.vlgmr.msra.gmra.mrb[48].mxu1 %vm2259_vm10, %v4514_v60  ;;  %v7071_v60 = vld [vmem:[%s7298_s19 + $0x80] ss:$8 sps:$4 sm:$0xff]  }
 0x805   : > { %6600 = vmatprep.mubr.msk.f32.mxu1 %vm7150_vm8, %v7149_v30 }
 0x808   : > { %6601 = vmatmul.mubr.msk.f32.gmra.mrb[50].mxu1 %vm2259_vm10, %v4515_v39  ;;  %v7088_v39 = vld [vmem:[%s7298_s19 + $0xd4] ss:$8 sps:$4 sm:$0xff]  }
 0x809   : > { %6603 = vmatprep.mubr.msk.f32.mxu1 %vm7150_vm8, %v7149_v30 }
 0x80c   : > { %6604 = vmatmul.mubr.msk.f32.gmra.mrb[52].mxu1 %vm2259_vm10, %v4516_v11  ;;  %v7085_v11 = vld [vmem:[%s7298_s19 + $0xc4] ss:$8 sps:$4 sm:$0xff]  }
 0x80d   : > { %6612 = vmatprep.mubr.msk.f32.mxu1 %vm7150_vm8, %v7149_v30 }
 0x8cb   : > { %v4604_v55 = vpop.f32.mrb[42].mxu1 }
 0x8cc   : > { %v4606_v32 = vpop.f32.mrb[43].mxu1  ;;  %v4710_v26 = vmul.f32 %v4701_v54, %v4604_v55  ;;  %v7086_v55 = vld [vmem:[%s7298_s19 + $0xd0] ss:$8 sps:$4 sm:$0xff]   ;;  %v7089_v54 = vld [vmem:[%s7298_s19 + $0xe0] ss:$8 sps:$4 sm:$0xff]  }
 0x8cd   : > { %v4711_v42 = vmul.f32 %v4702_v63, %v4606_v32  ;;  %v7091_v32 = vld [vmem:[%s7298_s19 + $0xe4] ss:$8 sps:$4 sm:$0xff]   ;;  %v7094_v63 = vld [vmem:[%s7298_s19 + $0xf4] ss:$8 sps:$4 sm:$0xff]  }
 0x8cf   : > { %v4610_v56 = vpop.f32.mrb[44].mxu1 }
 0x8d0   : > { %v4713_v6 = vmul.f32 %v4704_v12, %v4610_v56  ;;  %v4612_v62 = vpop.f32.mrb[45].mxu1  ;;  %v7092_v12 = vld [vmem:[%s7298_s19 + $0xf0] ss:$8 sps:$4 sm:$0xff]   ;;  %v7107_v56 = vld [vmem:[%s7312_s26 + $0x40] sm:$0xff]  }
 0x8d1   : > { %v4714_v33 = vmul.f32 %v4705_v14, %v4612_v62  ;;  %v7097_v14 = vld [vmem:[%s7298_s19 + $0x104] ss:$8 sps:$4 sm:$0xff]  }
 0x8d2   : > { %v6641_v41 = vpack.c.bf16 %v4713_v6, %v4710_v26  ;;  %v7108_v26 = vld [vmem:[%s7312_s26] sm:$0xff]   ;;  %v7109_v6 = vld [vmem:[%s7312_s26 + $0x48] sm:$0xff]  }
 0x8d3   : > { %v6639_v28 = vpack.c.bf16 %v4714_v33, %v4711_v42  ;;  %v4616_v1 = vpop.f32.mrb[46].mxu1  ;;  %v7110_v62 = vld [vmem:[%s7312_s26 + $0x8] sm:$0xff]   ;;  %v7111_v42 = vld [vmem:[%s7312_s26 + $0x50] sm:$0xff]  }
 0x8d4   : > { %v4618_v44 = vpop.f32.mrb[47].mxu1  ;;  %v4716_v29 = vmul.f32 %v4707_v10, %v4616_v1  ;;  %v7112_v33 = vld [vmem:[%s7312_s26 + $0x10] sm:$0xff]   ;;  %v7116_v1 = vld [vmem:[%s7312_s26 + $0x20] sm:$0xff]   ;;  %v7153_v10 = vmov 1983009808  }
 0x8d5   : > { %v4717_v45 = vmul.f32 %v4708_v25, %v4618_v44  ;;  %6640 = vmatprep.subr.bf16.mxu0 %v6639_v28  ;;  %v7114_v25 = vld [vmem:[%s7312_s26 + $0x18] sm:$0xff]   ;;  %v7115_v28 = vld [vmem:[%s7312_s26 + $0x60] sm:$0xff]   ;;  %v7117_v44 = vld [vmem:[%s7312_s26 + $0x68] sm:$0xff]  }
 0x8d6   : > { %6642 = vmatpush1.bf16.msra.mxu0 %v6641_v41  ;;  %v7113_v41 = vld [vmem:[%s7312_s26 + $0x58] sm:$0xff]  }
 0x8d7   : > { %v4687_v58 = vpop.f32.mrb[48].mxu1  ;;  %5891 = vmatprep.subr.msk.mxu0 %vm1359_vm3, %v4717_v45  ;;  %v4879_v45 = vunpack.c.l.s4 %v7153_v10 }
 0x8d8   : > { %v6599_v31 = vpop.f32.mrb[49].mxu1  ;;  %v4712_v37 = vmul.f32 %v4703_v34, %v4687_v58 }
 0x8d9   : > { %v4880_v34 = vunpack.c.0.s8 %v4879_v45 }
 0x8da   : > { %5892 = vmatpush1.msk.msra.mxu0 %vm1359_vm3, %v4716_v29 }
 0x8db   : > { %v4692_v35 = vpop.f32.mrb[50].mxu1  ;;  %5893 = vmatmul.mubr.msk.f32.vlgmr.msra.gmra.mrb[72].mxu0 %vm4720_vm2, %v4719_v48  ;;  %5146 = vmatprep.subr.bf16.mxu0 %v7049_v0 }
 0x8dc   : > { %v4715_v50 = vmul.f32 %v4706_v16, %v4692_v35  ;;  %v6602_v36 = vpop.f32.mrb[51].mxu1  ;;  %5147 = vmatpush1.bf16.msra.mxu0 %v7047_v27  ;;  %v7100_v16 = vld [vmem:[%s7298_s19 + $0x114] ss:$8 sps:$4 sm:$0xff]   ;;  %v9329_v35 = vld [vmem:[#allocation5_spill] sm:$0xff] }
 0x8dd   : > { %5148 = vmatprep.subr.bf16.mxu0 %v7052_v46  ;;  %v7098_v46 = vld [vmem:[%s7298_s19 + $0x110] ss:$8 sps:$4 sm:$0xff]   ;;  %v7101_v36 = vld [vmem:[%s7298_s19 + $0x120] ss:$8 sps:$4 sm:$0xff]  }
 0x8de   : > { %v6644_v43 = vpack.c.bf16 %v4715_v50, %v4712_v37  ;;  %v4883_v37 = vsub.s32 %v4880_v34, %v9329_v35  ;;  %v7103_v50 = vld [vmem:[%s7298_s19 + $0x124] ss:$8 sps:$4 sm:$0xff]  }
 0x8df   : > { %v4697_v57 = vpop.f32.mrb[52].mxu1 }
 0x8e0   : > { %6645 = vmatpush3.bf16.msra.mxu1 %v6644_v43  ;;  %v6605_v38 = vpop.f32.mrb[53].mxu1  ;;  %5149 = vmatpush1.bf16.msra.mxu0 %v7050_v2  ;;  %v4718_v49 = vmul.f32 %v4709_v47, %v4697_v57  ;;  %v7106_v43 = vld [vmem:[%s7298_s19 + $0x134] ss:$8 sps:$4 sm:$0xff]  }
 0x8e1   : > { %6610 = vmatprep.subr.mxu1 %v7149_v30  ;;  %5150 = vmatprep.subr.bf16.mxu0 %v7055_v9  ;;  %v7064_v30 = vld [vmem:[%s7298_s19 + $0x54] ss:$8 sps:$4 sm:$0xff]   ;;  %v7104_v38 = vld [vmem:[%s7298_s19 + $0x130] ss:$8 sps:$4 sm:$0xff]  }
 0x8e4   : > { %6611 = vmatpush3.msk.msra.mxu1 %vm1359_vm3, %v4718_v49  ;;  %5151 = vmatpush1.bf16.msra.mxu0 %v7053_v61  ;;  %vm4894_vm3 = vcmask 1043458   ;;  %v7119_v49 = vld [vmem:[%s7312_s26 + $0x70] sm:$0xff]  }
 0x8e5   : > { %6613 = vmatmul.mubr.msk.f32.vlgmr.msra.gmra.mrb[54].mxu1 %vm4720_vm2, %v4719_v48  ;;  %5152 = vmatprep.subr.bf16.mxu0 %v7058_v52  ;;  %v7095_v48 = vld [vmem:[%s7298_s19 + $0x100] ss:$8 sps:$4 sm:$0xff]   ;;  %vm4895_vm6 = vmor %vm4894_vm3, %vm1583_vm5 }
 0x8e6   : > { %6150 = vmatprep.subr.bf16.mxu1 %v7107_v56  ;;  %vm4897_vm8 = vmor %vm4896_vm7, %vm4895_vm6  ;;  %v7118_v52 = vld [vmem:[%s7312_s26 + $0x28] sm:$0xff]  }
 0x8e7   : > { %6151 = vmatpush3.bf16.msra.mxu1 %v7108_v26 }
 0x8e8   : > { %5153 = vmatpush1.bf16.msra.mxu0 %v7056_v23  ;;  %6152 = vmatprep.subr.bf16.mxu1 %v7109_v6  ;;  %v7120_v23 = vld [vmem:[%s7312_s26 + $0x30] sm:$0xff]  }
 0x8e9   : > { %5154 = vmatprep.subr.bf16.mxu0 %v7061_v5  ;;  %v7121_v5 = vld [vmem:[%s7312_s26 + $0x78] sm:$0xff]  }
 0x8eb   : > { %6153 = vmatpush3.bf16.msra.mxu1 %v7110_v62 }
 0x8ec   : > { %5155 = vmatpush1.bf16.msra.mxu0 %v7059_v51  ;;  %6154 = vmatprep.subr.bf16.mxu1 %v7111_v42  ;;  %v7122_v51 = vld [vmem:[%s7312_s26 + $0x38] sm:$0xff]  }
 0x8ed   : > { %5156 = vmatprep.subr.bf16.mxu0 %v7064_v30  ;;  %v4899_v30 = vld [vmem:[%s788_s2] sm:$0xf] }
 0x8ef   : > { %6155 = vmatpush3.bf16.msra.mxu1 %v7112_v33 }
 0x8f0   : > { %5157 = vmatpush1.bf16.msra.mxu0 %v7062_v59  ;;  %6156 = vmatprep.subr.bf16.mxu1 %v7113_v41  ;;  %v5232_v59 = vrot.slane %v4899_v30, %v9327_v13 }
 0x8f1   : > { %5158 = vmatprep.subr.bf16.mxu0 %v7067_v7  ;;  %v9330_v7 = vsub.s32 2, %v9329_v35 }
 0x8f3   : > { %6157 = vmatpush3.bf16.msra.mxu1 %v7114_v25 }
 0x8f4   : > { %5159 = vmatpush1.bf16.msra.mxu0 %v7065_v20  ;;  %6158 = vmatprep.subr.bf16.mxu1 %v7115_v28  ;;  %v5236_v20 = vrot.slane %v4899_v30, %v9330_v7 }
 0x8f5   : > { %5160 = vmatprep.subr.bf16.mxu0 %v7070_v19  ;;  %v5252_v19 = vrot.slane %v4899_v30, %v9328_v15 }
 0x8f7   : > { %6159 = vmatpush3.bf16.msra.mxu1 %v7116_v1 }
 0x8f8   : > { %5161 = vmatpush1.bf16.msra.mxu0 %v7068_v24  ;;  %6160 = vmatprep.subr.bf16.mxu1 %v7117_v44  ;;  %v9331_v24 = vsub.s32 3, %v9329_v35 }
 0x8f9   : > { %5162 = vmatprep.subr.bf16.mxu0 %v7073_v53 }
 0x8fa   : > { %v5256_v53 = vrot.slane %v4899_v30, %v9331_v24 }
 0x8fb   : > { %6161 = vmatpush3.bf16.msra.mxu1 %v7118_v52 }
 0x8fc   : > { %5163 = vmatpush1.bf16.msra.mxu0 %v7071_v60  ;;  %6162 = vmatprep.subr.bf16.mxu1 %v7119_v49  ;;  %v5242_v60 = vrot.slane %v5232_v59, %v9327_v13 }
 0x8fd   : > { %5164 = vmatprep.subr.bf16.mxu0 %v7076_v21  ;;  %v5246_v21 = vrot.slane %v5236_v20, %v9327_v13 }
 0x8ff   : > { %6163 = vmatpush3.bf16.msra.mxu1 %v7120_v23 }
 0x900   : > { %5165 = vmatpush1.bf16.msra.mxu0 %v7074_v4  ;;  %6164 = vmatprep.subr.bf16.mxu1 %v7121_v5  ;;  %v5262_v4 = vrot.slane %v5252_v19, %v9328_v15 }
 0x901   : > { %5166 = vmatprep.subr.bf16.mxu0 %v7079_v8 }
 0x903   : > { %6165 = vmatpush3.bf16.msra.mxu1 %v7122_v51 }
 0x904   : > { %5167 = vmatpush1.bf16.msra.mxu0 %v7077_v40  ;;  %v5266_v40 = vrot.slane %v5256_v53, %v9328_v15  ;;  %v5937_v15 = vld [vmem:[%s796_s3] ss:$0 sm:$0xff] }
 0x905   : > { %5168 = vmatprep.subr.bf16.mxu0 %v7082_v17 }
 0x908   : > { %5169 = vmatpush1.bf16.msra.mxu0 %v7080_v18 }
 0x909   : > { %5170 = vmatprep.subr.bf16.mxu0 %v7085_v11 }
 0x90c   : > { %5171 = vmatpush1.bf16.msra.mxu0 %v7083_v3 }
 0x90d   : > { %5172 = vmatprep.subr.bf16.mxu0 %v7088_v39 }
 0x910   : > { %5173 = vmatpush1.bf16.msra.mxu0 %v7086_v55 }
 0x911   : > { %5174 = vmatprep.subr.bf16.mxu0 %v7091_v32 }
 0x914   : > { %5175 = vmatpush1.bf16.msra.mxu0 %v7089_v54 }
 0x915   : > { %5176 = vmatprep.subr.bf16.mxu0 %v7094_v63 }
 0x918   : > { %5177 = vmatpush1.bf16.msra.mxu0 %v7092_v12 }
 0x919   : > { %5187 = vmatprep.subr.bf16.mxu0 %v7097_v14 }
 0x9ae   : > { %v4799_v58 = vpop.f32.mrb[72].mxu0 }
 0x9af   : > { %v4801_v0 = vpop.f32.mrb[73].mxu0  ;;  %v4900_v27 = vpack.c.bf16 %v4799_v58, %v4799_v58 }
 0x9b0   : > { %v4877_v29 = vcombine.low %v4799_v58, %v4801_v0  ;;  %v4901_v31 = vpack.c.bf16 %v4801_v0, %v4801_v0 }
 0x9b2   : > { %5178 = vmatprep.mubr.bf16.mxu0 %v4901_v31  ;;  %v4884_v9 = vrot.slane %v4877_v29, %v4883_v37 }
 0x9b3   : > { %5179 = vmatmul.mubr.bf16.vlgmr.msra.gmra.mrb[76].mxu0 %v4900_v27 }
 0x9b4   : > { %5188 = vmatpush1.bf16.msra.mxu0 %v7095_v48  ;;  %5219 = vmatprep.mubr.bf16.mxu0 %v9320_v22 }
 0x9b5   : > { %5189 = vmatprep.subr.bf16.mxu0 %v7100_v16 }
 0x9b8   : > { %5190 = vmatpush1.bf16.msra.mxu0 %v7098_v46  ;;  %v4870_v2 = vpop.f32.mrb[54].mxu1 }
 0x9b9   : > { %5191 = vmatprep.subr.bf16.mxu0 %v7103_v50  ;;  %v4891_v57 = vrot.slane %v4870_v2, %v4883_v37  ;;  %v6614_v22 = vpop.f32.mrb[55].mxu1  ;;  %v4902_v61 = vpack.c.bf16 %v4870_v2, %v4870_v2 }
 0x9bb   : > { %v4892_v47 = vcombine.low %v4884_v9, %v4891_v57 }
 0x9bc   : > { %5192 = vmatpush1.bf16.msra.mxu0 %v7101_v36 }
 0x9bd   : > { %5193 = vmatprep.subr.bf16.mxu0 %v7106_v43  ;;  %4898 = vst.msk [vmem:[%s805_s24] sm:$0x3f] %vm4897_vm8, %v4892_v47 }
 0x9c0   : > { %5194 = vmatpush1.bf16.msra.mxu0 %v7104_v38 }
 0x9c3   : > { %5936 = vmatmul.mubr.msk.bf16.vlgmr.msra.gmra.mrb[76].mxu0 %vm3564_vm15, %v4902_v61 }
 0xa96   : > { %v5221_v8 = vpop.f32.mrb[76].mxu0 }
 0xa97   : > { %v5247_v17 = vmul.f32 %v5242_v60, %v5221_v8  ;;  %v5223_v18 = vpop.f32.mrb[77].mxu0 }
 0xa98   : > { %v5248_v11 = vmul.f32 %v5246_v21, %v5223_v18  ;;  %v5225_v3 = vpop.f32.mrb[78].mxu0 }
 0xa99   : > { %v5267_v39 = vadd.f32 %v5262_v4, %v5247_v17  ;;  %v5226_v55 = vpop.f32.mrb[79].mxu0 }
 0xa9a   : > { %v5268_v32 = vadd.f32 %v5266_v40, %v5248_v11 }
 0xa9b   : > { %v5269_v54 = vmax.f32 %v5267_v39, 0.0 }
 0xa9c   : > { %v5270_v12 = vmax.f32 %v5268_v32, 0.0 }
 0xa9d   : > { %v5271_v14 = vpack.c.bf16 %v5269_v54, %v5269_v54 }
 0xa9e   : > { %v5272_v63 = vpack.c.bf16 %v5270_v12, %v5270_v12 }
 0xaa0   : > { %5440 = vmatprep.mubr.bf16.mxu1 %v5272_v63 }
 0xaa1   : > { %5441 = vmatmul.mubr.bf16.vlgmr.msra.gmra.mrb[56].mxu1 %v5271_v14 }
 0xb74   : > { %v6166_v13 = vpop.f32.mrb[56].mxu1 }
 0xb75   : > { %v6167_v56 = vpop.f32.mrb[57].mxu1 }
 0xb76   : > { %v6168_v26 = vadd.f32 %v6167_v56, %v6166_v13  ;;  %v6169_v6 = vpop.f32.mrb[58].mxu1 }
 0xb77   : > { %v6170_v62 = vpop.f32.mrb[59].mxu1 }
 0xb78   : > { %v5443_v42 = vadd.f32 %v6168_v26, %v5937_v15 }
 0xb7a   : > { %5448 = vst [vmem:[%s812_s7] sm:$0x3] %v5443_v42 }
 0xb7b PF: > { %s9332_s28 = sld [smem:[#allocation3_spill]]  ;;  %s9333_s27 = sld [smem:[#allocation2_spill]] }
 0xb81   : > { %s29_s29 = sadd.s32 1, %s9332_s28   ;;  %s9334_s28 = sld [smem:[#allocation4_spill]] }
 0xb82   : > { %p26_p5 = scmp.ge.s32.totalorder %s29_s29, 4  }
 0xb84   :  { %28 = sbr.rel (!%p26_p5) target bundleno = 7 (0x7), region = 160 }

</bundles_post_ra>
